<compile_context>
chip_gen: v7x
topology: tpu7x:2x2x1
jax: 0.10.0
libtpu: 0.0.40
codegen_flags: <defaults>
</compile_context>

<pallas_src>
import jax
import jax.numpy as jnp
from jax.experimental import pallas as pl
from jax.experimental.pallas import tpu as pltpu

_EPS = 1e-5  # nn.BatchNorm2d default eps


# ---------------------------------------------------------------------------
# In-kernel helpers
# ---------------------------------------------------------------------------
def _partial_stats(v):
    """One-pass per-channel sum / sum-of-squares, padded to 8 sublanes."""
    s = jnp.sum(v, axis=0, keepdims=True)
    ss = jnp.sum(v * v, axis=0, keepdims=True)
    return jnp.concatenate(
        [s, ss, jnp.zeros((6, v.shape[1]), jnp.float32)], axis=0)


# ---------------------------------------------------------------------------
# K1: fused conv1 (1x1) + downsample conv (1x1) + partial BN stats
# ---------------------------------------------------------------------------
def _k1_conv1_dn(x_ref, w_ref, h1_ref, dv_ref, s1_ref, sd_ref):
    cm = h1_ref.shape[1]
    # single MXU matmul against concat([w1, wd]) -> x is read once
    u = jnp.dot(x_ref[...], w_ref[...], preferred_element_type=jnp.float32)
    h1 = u[:, :cm]
    dv = u[:, cm:]
    h1_ref[...] = h1
    dv_ref[...] = dv
    s1_ref[0] = _partial_stats(h1)
    sd_ref[0] = _partial_stats(dv)


# ---------------------------------------------------------------------------
# K2: bn1+relu (folded), 3x3 conv as one K=9*Cm im2col matmul, bn2 stats
# ---------------------------------------------------------------------------
def _k2_conv3x3(h1_ref, sc_ref, sh_ref, w2_ref, h2_ref, s2_ref, pad_ref):
    hw, cm = h1_ref.shape[1], h1_ref.shape[2]
    hp, wp = pad_ref.shape[0], pad_ref.shape[1]
    h, w = hp - 2, wp - 2

    # bn1 folded into per-channel scale/shift (stats from K1), then ReLU.
    a = jnp.maximum(h1_ref[0] * sc_ref[...] + sh_ref[...], 0.0)     # (H*W, Cm)

    # Zero only the 1-wide border of the padded scratch, then the interior.
    pad_ref[0:1, :, :] = jnp.zeros((1, wp, cm), jnp.float32)
    pad_ref[h + 1:h + 2, :, :] = jnp.zeros((1, wp, cm), jnp.float32)
    pad_ref[:, 0:1, :] = jnp.zeros((hp, 1, cm), jnp.float32)
    pad_ref[:, w + 1:w + 2, :] = jnp.zeros((hp, 1, cm), jnp.float32)
    pad_ref[1:h + 1, 1:w + 1, :] = a.reshape(h, w, cm)

    # Full im2col: one MXU matmul with K = 9*Cm instead of 9 narrow K=Cm dots.
    # TODO(synk): the dj (W) window offsets are sublane-misaligned; a
    # pltpu.roll-based shift would avoid the relayout but is not used here.
    parts = [pad_ref[di:di + h, dj:dj + w, :].reshape(hw, cm).astype(jnp.bfloat16)
             for di in range(3) for dj in range(3)]
    win = jnp.concatenate(parts, axis=-1)                           # (H*W, 9*Cm)
    h2 = jnp.dot(win, w2_ref[...], preferred_element_type=jnp.float32)

    h2_ref[0] = h2
    s2_ref[0] = _partial_stats(h2)


# ---------------------------------------------------------------------------
# K3: bn2+relu (folded), conv3 (1x1), partial bn3 stats
# ---------------------------------------------------------------------------
def _k3_conv3(h2_ref, sc_ref, sh_ref, w3_ref, h3_ref, s3_ref):
    a = jnp.maximum(h2_ref[0] * sc_ref[...] + sh_ref[...], 0.0)     # bn2 + relu
    h3 = jnp.dot(a.astype(jnp.bfloat16), w3_ref[...],
                 preferred_element_type=jnp.float32)
    h3_ref[0] = h3
    s3_ref[0] = _partial_stats(h3)


# ---------------------------------------------------------------------------
# K4: bn3 + bn_d (folded), residual add, relu, padded output (border = const)
# ---------------------------------------------------------------------------
def _k4_residual(h3_ref, dv_ref, sc3_ref, sh3_ref, scd_ref, shd_ref, out_ref):
    c3 = h3_ref.shape[2]
    hp, wp = out_ref.shape[1], out_ref.shape[2]
    h, w = hp - 2, wp - 2

    main = h3_ref[0] * sc3_ref[...] + sh3_ref[...]                  # bn3
    ident = dv_ref[0] * scd_ref[...] + shd_ref[...]                 # bn_d
    interior = jnp.maximum(main + ident, 0.0).reshape(1, h, w, c3)

    # The zero-padded border of both branches becomes a per-channel constant
    # after BN: relu(shift3 + shift_d).  Border-only stores (no full zero fill,
    # no read-back of the output).
    border = jnp.maximum(sh3_ref[...] + shd_ref[...], 0.0).reshape(1, 1, 1, c3)
    out_ref[:, 0:1, :, :] = jnp.broadcast_to(border, (1, 1, wp, c3))
    out_ref[:, h + 1:h + 2, :, :] = jnp.broadcast_to(border, (1, 1, wp, c3))
    out_ref[:, :, 0:1, :] = jnp.broadcast_to(border, (1, hp, 1, c3))
    out_ref[:, :, w + 1:w + 2, :] = jnp.broadcast_to(border, (1, hp, 1, c3))
    out_ref[:, 1:h + 1, 1:w + 1, :] = interior


# ---------------------------------------------------------------------------
# Wrapper-side helpers
# ---------------------------------------------------------------------------
def _round_up(v, m):
    return (v + m - 1) // m * m


def _pick_row_tile(total, target):
    """Largest multiple of 8 that divides `total` and is <= target."""
    if total <= target:
        return total
    for t in range(min(target, total), 7, -1):
        if total % t == 0 and t % 8 == 0:
            return t
    return total


def _pad_last(a, to):
    d = to - a.shape[-1]
    if d == 0:
        return a
    return jnp.pad(a, [(0, 0)] * (a.ndim - 1) + [(0, d)])


def _pad2(w, rows, cols):
    return jnp.pad(w, ((0, rows - w.shape[0]), (0, cols - w.shape[1])))


def _scale_shift(partial_stats, gamma, beta, count):
    """Fold training-mode BN (biased var) into per-channel scale/shift."""
    s = jnp.sum(partial_stats[:, 0, :], axis=0)
    ss = jnp.sum(partial_stats[:, 1, :], axis=0)
    mean = s / count
    var = jnp.maximum(ss / count - mean * mean, 0.0)
    scale = gamma.reshape(-1) * jax.lax.rsqrt(var + _EPS)
    shift = beta.reshape(-1) - mean * scale
    return scale.reshape(1, -1), shift.reshape(1, -1)


# ---------------------------------------------------------------------------
# Public forward
# ---------------------------------------------------------------------------
def bottleneck_forward(x_nchw, params, *, row_tile=256):
    """NCHW in, NCHW out (N, 4*out_channel, H+2, W+2)."""
    f32, bf16 = jnp.float32, jnp.bfloat16
    x = jnp.transpose(x_nchw, (0, 2, 3, 1)).astype(f32)              # NHWC
    N, H, W, Cin = x.shape
    Hp, Wp = H + 2, W + 2
    Cm = params["w1"].shape[1]
    C3 = params["w3"].shape[1]

    # Pad channel dims to the 128-lane width; padded channels stay exactly
    # zero everywhere and are sliced off at the end.
    Cin_p = _round_up(Cin, 128)
    Cm_p = _round_up(Cm, 128)
    C3_p = _round_up(C3, 128)

    R = N * H * W
    TR = _pick_row_tile(R, row_tile)
    T1 = R // TR
    cnt = float(N * H * W)        # BN1 / BN2 element count (unpadded)
    cnt_pad = float(N * Hp * Wp)  # BN3 / BN_d count (stats over padded tensor)

    cp = pltpu.CompilerParams(dimension_semantics=("parallel",))

    # ---- wrapper-side layout plumbing (channel pad, bf16 weights) ---------
    x2d = _pad_last(x.reshape(R, Cin), Cin_p).astype(bf16)
    w1d = jnp.concatenate(
        [_pad2(params["w1"], Cin_p, Cm_p),
         _pad2(params["wd"], Cin_p, C3_p)], axis=1).astype(bf16)     # fused
    w2r = jnp.pad(params["w2"],
                  ((0, 0), (0, 0), (0, Cm_p - Cm), (0, Cm_p - Cm))
                  ).reshape(9 * Cm_p, Cm_p).astype(bf16)             # im2col weight
    w3p = _pad2(params["w3"], Cm_p, C3_p).astype(bf16)
    g1, b1 = _pad_last(params["g1"], Cm_p), _pad_last(params["b1"], Cm_p)
    g2, b2 = _pad_last(params["g2"], Cm_p), _pad_last(params["b2"], Cm_p)
    g3, b3 = _pad_last(params["g3"], C3_p), _pad_last(params["b3"], C3_p)
    gd, bd = _pad_last(params["gd"], C3_p), _pad_last(params["bd"], C3_p)

    # ---- K1: fused conv1 + downsample conv over row tiles ------------------
    h1_raw, dv_raw, st1, st_d = pl.pallas_call(
        _k1_conv1_dn,
        grid=(T1,),
        in_specs=[pl.BlockSpec((TR, Cin_p), lambda i: (i, 0)),
                  pl.BlockSpec((Cin_p, Cm_p + C3_p), lambda i: (0, 0))],
        out_specs=(pl.BlockSpec((TR, Cm_p), lambda i: (i, 0)),
                   pl.BlockSpec((TR, C3_p), lambda i: (i, 0)),
                   pl.BlockSpec((1, 8, Cm_p), lambda i: (i, 0, 0)),
                   pl.BlockSpec((1, 8, C3_p), lambda i: (i, 0, 0))),
        out_shape=(jax.ShapeDtypeStruct((R, Cm_p), f32),
                   jax.ShapeDtypeStruct((R, C3_p), f32),
                   jax.ShapeDtypeStruct((T1, 8, Cm_p), f32),
                   jax.ShapeDtypeStruct((T1, 8, C3_p), f32)),
        compiler_params=cp,
    )(x2d, w1d)
    sc1, sh1 = _scale_shift(st1, g1, b1, cnt)
    scd, shd = _scale_shift(st_d, gd, bd, cnt_pad)   # padded-tensor statistics

    # ---- K2: bn1+relu, 3x3 conv (single K=9*Cm matmul per image) -----------
    h2_raw, st2 = pl.pallas_call(
        _k2_conv3x3,
        grid=(N,),
        in_specs=[pl.BlockSpec((1, H * W, Cm_p), lambda n: (n, 0, 0)),
                  pl.BlockSpec((1, Cm_p), lambda n: (0, 0)),
                  pl.BlockSpec((1, Cm_p), lambda n: (0, 0)),
                  pl.BlockSpec((9 * Cm_p, Cm_p), lambda n: (0, 0))],
        out_specs=(pl.BlockSpec((1, H * W, Cm_p), lambda n: (n, 0, 0)),
                   pl.BlockSpec((1, 8, Cm_p), lambda n: (n, 0, 0))),
        out_shape=(jax.ShapeDtypeStruct((N, H * W, Cm_p), f32),
                   jax.ShapeDtypeStruct((N, 8, Cm_p), f32)),
        scratch_shapes=[pltpu.VMEM((Hp, Wp, Cm_p), f32)],
        compiler_params=cp,
    )(h1_raw.reshape(N, H * W, Cm_p), sc1, sh1, w2r)
    sc2, sh2 = _scale_shift(st2, g2, b2, cnt)

    # ---- K3: bn2+relu, conv3 (1x1), partial bn3 stats -----------------------
    h3_raw, st3 = pl.pallas_call(
        _k3_conv3,
        grid=(N,),
        in_specs=[pl.BlockSpec((1, H * W, Cm_p), lambda n: (n, 0, 0)),
                  pl.BlockSpec((1, Cm_p), lambda n: (0, 0)),
                  pl.BlockSpec((1, Cm_p), lambda n: (0, 0)),
                  pl.BlockSpec((Cm_p, C3_p), lambda n: (0, 0))],
        out_specs=(pl.BlockSpec((1, H * W, C3_p), lambda n: (n, 0, 0)),
                   pl.BlockSpec((1, 8, C3_p), lambda n: (n, 0, 0))),
        out_shape=(jax.ShapeDtypeStruct((N, H * W, C3_p), f32),
                   jax.ShapeDtypeStruct((N, 8, C3_p), f32)),
        compiler_params=cp,
    )(h2_raw, sc2, sh2, w3p)
    sc3, sh3 = _scale_shift(st3, g3, b3, cnt_pad)    # padded-tensor statistics

    # ---- K4: bn3 + bn_d + residual + relu, padded output --------------------
    out_p = pl.pallas_call(
        _k4_residual,
        grid=(N,),
        in_specs=[pl.BlockSpec((1, H * W, C3_p), lambda n: (n, 0, 0)),
                  pl.BlockSpec((1, H * W, C3_p), lambda n: (n, 0, 0)),
                  pl.BlockSpec((1, C3_p), lambda n: (0, 0)),
                  pl.BlockSpec((1, C3_p), lambda n: (0, 0)),
                  pl.BlockSpec((1, C3_p), lambda n: (0, 0)),
                  pl.BlockSpec((1, C3_p), lambda n: (0, 0))],
        out_specs=pl.BlockSpec((1, Hp, Wp, C3_p), lambda n: (n, 0, 0, 0)),
        out_shape=jax.ShapeDtypeStruct((N, Hp, Wp, C3_p), f32),
        compiler_params=cp,
    )(h3_raw, dv_raw.reshape(N, H * W, C3_p), sc3, sh3, scd, shd)

    return jnp.transpose(out_p[..., :C3], (0, 3, 1, 2))              # NCHW


# ---------------------------------------------------------------------------
# Deterministic parameter init (shapes from Bottleneck.__init__)
# ---------------------------------------------------------------------------
def init_params(key, in_channel, out_channel, expansion=4):
    Cm = out_channel
    C3 = out_channel * expansion
    ks = jax.random.split(key, 12)

    def conv_w(k, fan_in, shape):
        return jax.random.normal(k, shape, jnp.float32) * jnp.sqrt(2.0 / fan_in)

    return dict(
        w1=conv_w(ks[0], in_channel, (in_channel, Cm)),       # conv1 1x1
        w2=conv_w(ks[1], 9 * Cm, (3, 3, Cm, Cm)),             # conv2 3x3 (kh,kw,cin,cout)
        w3=conv_w(ks[2], Cm, (Cm, C3)),                       # conv3 1x1
        wd=conv_w(ks[3], in_channel, (in_channel, C3)),       # downsample 1x1
        g1=1.0 + 0.1 * jax.random.normal(ks[4], (1, Cm), jnp.float32),
        b1=0.1 * jax.random.normal(ks[5], (1, Cm), jnp.float32),
        g2=1.0 + 0.1 * jax.random.normal(ks[6], (1, Cm), jnp.float32),
        b2=0.1 * jax.random.normal(ks[7], (1, Cm), jnp.float32),
        g3=1.0 + 0.1 * jax.random.normal(ks[8], (1, C3), jnp.float32),
        b3=0.1 * jax.random.normal(ks[9], (1, C3), jnp.float32),
        gd=1.0 + 0.1 * jax.random.normal(ks[10], (1, C3), jnp.float32),
        bd=0.1 * jax.random.normal(ks[11], (1, C3), jnp.float32),
    )


# ---------------------------------------------------------------------------
# Pure-JAX f32 reference (same math as the PyTorch forward)
# ---------------------------------------------------------------------------
def ref_forward(x_nchw, params):
    x = jnp.transpose(x_nchw, (0, 2, 3, 1)).astype(jnp.float32)
    N, H, W, _ = x.shape

    def bn(v, g, b):
        m = jnp.mean(v, axis=(0, 1, 2), keepdims=True)
        var = jnp.mean((v - m) ** 2, axis=(0, 1, 2), keepdims=True)
        return ((v - m) / jnp.sqrt(var + _EPS) * g.reshape(1, 1, 1, -1)
                + b.reshape(1, 1, 1, -1))

    def conv1x1(v, w, pad):
        y = jnp.einsum("nhwc,cd->nhwd", v, w)
        if pad:
            y = jnp.pad(y, ((0, 0), (1, 1), (1, 1), (0, 0)))
        return y

    def conv3x3(v, w):
        vp = jnp.pad(v, ((0, 0), (1, 1), (1, 1), (0, 0)))
        y = 0.0
        for di in range(3):
            for dj in range(3):
                y = y + jnp.einsum("nhwc,cd->nhwd",
                                   vp[:, di:di + H, dj:dj + W, :], w[di, dj])
        return y

    identity = bn(conv1x1(x, params["wd"], True), params["gd"], params["bd"])
    h = jax.nn.relu(bn(conv1x1(x, params["w1"], False), params["g1"], params["b1"]))
    h = jax.nn.relu(bn(conv3x3(h, params["w2"]), params["g2"], params["b2"]))
    h = bn(conv1x1(h, params["w3"], True), params["g3"], params["b3"])
    out = jax.nn.relu(h + identity)
    return jnp.transpose(out, (0, 3, 1, 2))


# ---------------------------------------------------------------------------
if __name__ == "__main__":
    key = jax.random.PRNGKey(0)
    kx, kp = jax.random.split(key)

    N, Cin, H, W = 2, 8, 16, 16
    out_channel = 4                        # -> 4 * 4 = 16 output channels

    x = jax.random.normal(kx, (N, Cin, H, W), jnp.float32)
    params = init_params(kp, Cin, out_channel)

    fwd = jax.jit(bottleneck_forward)
    out = jax.block_until_ready(fwd(x, params))
    ref = jax.block_until_ready(ref_forward(x, params))

    assert out.shape == (N, out_channel * 4, H + 2, W + 2), out.shape
    assert bool(jnp.all(jnp.isfinite(out)))
    max_err = float(jnp.max(jnp.abs(out - ref)))
    # bf16 MXU inputs (per perf review); BN / accumulation in f32.
    assert bool(jnp.allclose(out, ref, atol=1e-1, rtol=5e-2)), max_err
    print("KERNEL_OK")
</pallas_src>

<mosaic_0001>
module attributes {stable_mosaic.version = 11 : i64} {
  func.func @_k1_conv1_dn(%arg0: i32, %arg1: memref<256x128xbf16, #tpu.memory_space<vmem>>, %arg2: memref<128x256xbf16, #tpu.memory_space<vmem>>, %arg3: memref<256x128xf32, #tpu.memory_space<vmem>>, %arg4: memref<256x128xf32, #tpu.memory_space<vmem>>, %arg5: memref<1x8x128xf32, #tpu.memory_space<vmem>>, %arg6: memref<1x8x128xf32, #tpu.memory_space<vmem>>) attributes {dimension_semantics = [#tpu.dimension_semantics<parallel>], iteration_bounds = array<i64: 2>, scalar_prefetch = 0 : i64, scratch_operands = 0 : i64, tpu.core_type = #tpu.core_type<tc>, window_params = [{transform_indices = @transform_0, window_bounds = array<i64: 256, 128>}, {pipeline_mode = #tpu.pipeline_mode<synchronous>, transform_indices = @transform_1, window_bounds = array<i64: 128, 256>}, {transform_indices = @transform_2, window_bounds = array<i64: 256, 128>}, {transform_indices = @transform_3, window_bounds = array<i64: 256, 128>}, {transform_indices = @transform_4, window_bounds = array<i64: 1, 8, 128>}, {transform_indices = @transform_5, window_bounds = array<i64: 1, 8, 128>}]} {
    %c0 = arith.constant 0 : index
    %c0_0 = arith.constant 0 : index
    %0 = vector.load %arg1[%c0, %c0_0] : memref<256x128xbf16, #tpu.memory_space<vmem>>, vector<256x128xbf16>
    %c0_1 = arith.constant 0 : index
    %c0_2 = arith.constant 0 : index
    %1 = vector.load %arg2[%c0_1, %c0_2] : memref<128x256xbf16, #tpu.memory_space<vmem>>, vector<128x256xbf16>
    %cst = arith.constant dense<0.000000e+00> : vector<256x256xf32>
    %2 = tpu.matmul %0, %1, %cst {dimension_numbers = #tpu.dot_dimension_numbers<[1], [0], [0], [1], [0, 0, 1, 1], [], []>} : vector<256x128xbf16>, vector<128x256xbf16>, vector<256x256xf32> -> vector<256x256xf32>
    %3 = vector.extract_strided_slice %2 {offsets = [0, 0], sizes = [256, 128], strides = [1, 1]} : vector<256x256xf32> to vector<256x128xf32>
    %4 = vector.extract_strided_slice %2 {offsets = [0, 128], sizes = [256, 128], strides = [1, 1]} : vector<256x256xf32> to vector<256x128xf32>
    %c0_3 = arith.constant 0 : index
    %c0_4 = arith.constant 0 : index
    %5 = vector.load %arg3[%c0_3, %c0_4] : memref<256x128xf32, #tpu.memory_space<vmem>>, vector<256x128xf32>
    tpu.vector_store %arg3[%c0_3, %c0_4], %3 {strides = array<i32>} : memref<256x128xf32, #tpu.memory_space<vmem>>, vector<256x128xf32>,
    %c0_5 = arith.constant 0 : index
    %c0_6 = arith.constant 0 : index
    %6 = vector.load %arg4[%c0_5, %c0_6] : memref<256x128xf32, #tpu.memory_space<vmem>>, vector<256x128xf32>
    tpu.vector_store %arg4[%c0_5, %c0_6], %4 {strides = array<i32>} : memref<256x128xf32, #tpu.memory_space<vmem>>, vector<256x128xf32>,
    %cst_7 = arith.constant dense<0.000000e+00> : vector<128xf32>
    %7 = vector.multi_reduction <add>, %3, %cst_7 [0] : vector<256x128xf32> to vector<128xf32>
    %8 = vector.shape_cast %7 : vector<128xf32> to vector<1x128xf32>
    %9 = arith.mulf %3, %3 : vector<256x128xf32>
    %cst_8 = arith.constant dense<0.000000e+00> : vector<128xf32>
    %10 = vector.multi_reduction <add>, %9, %cst_8 [0] : vector<256x128xf32> to vector<128xf32>
    %11 = vector.shape_cast %10 : vector<128xf32> to vector<1x128xf32>
    %cst_9 = arith.constant 0.000000e+00 : f32
    %12 = vector.broadcast %cst_9 : f32 to vector<6x128xf32>
    %13 = tpu.concatenate %8, %11, %12 in 0 : vector<1x128xf32>, vector<1x128xf32>, vector<6x128xf32> -> vector<8x128xf32>
    %c0_10 = arith.constant 0 : index
    %c0_11 = arith.constant 0 : index
    %c0_12 = arith.constant 0 : index
    %14 = vector.load %arg5[%c0_10, %c0_11, %c0_12] : memref<1x8x128xf32, #tpu.memory_space<vmem>>, vector<1x8x128xf32>
    %15 = vector.shape_cast %14 : vector<1x8x128xf32> to vector<8x128xf32>
    %16 = vector.shape_cast %13 : vector<8x128xf32> to vector<1x8x128xf32>
    tpu.vector_store %arg5[%c0_10, %c0_11, %c0_12], %16 {strides = array<i32>} : memref<1x8x128xf32, #tpu.memory_space<vmem>>, vector<1x8x128xf32>,
    %cst_13 = arith.constant dense<0.000000e+00> : vector<128xf32>
    %17 = vector.multi_reduction <add>, %4, %cst_13 [0] : vector<256x128xf32> to vector<128xf32>
    %18 = vector.shape_cast %17 : vector<128xf32> to vector<1x128xf32>
    %19 = arith.mulf %4, %4 : vector<256x128xf32>
    %cst_14 = arith.constant dense<0.000000e+00> : vector<128xf32>
    %20 = vector.multi_reduction <add>, %19, %cst_14 [0] : vector<256x128xf32> to vector<128xf32>
    %21 = vector.shape_cast %20 : vector<128xf32> to vector<1x128xf32>
    %cst_15 = arith.constant 0.000000e+00 : f32
    %22 = vector.broadcast %cst_15 : f32 to vector<6x128xf32>
    %23 = tpu.concatenate %18, %21, %22 in 0 : vector<1x128xf32>, vector<1x128xf32>, vector<6x128xf32> -> vector<8x128xf32>
    %c0_16 = arith.constant 0 : index
    %c0_17 = arith.constant 0 : index
    %c0_18 = arith.constant 0 : index
    %24 = vector.load %arg6[%c0_16, %c0_17, %c0_18] : memref<1x8x128xf32, #tpu.memory_space<vmem>>, vector<1x8x128xf32>
    %25 = vector.shape_cast %24 : vector<1x8x128xf32> to vector<8x128xf32>
    %26 = vector.shape_cast %23 : vector<8x128xf32> to vector<1x8x128xf32>
    tpu.vector_store %arg6[%c0_16, %c0_17, %c0_18], %26 {strides = array<i32>} : memref<1x8x128xf32, #tpu.memory_space<vmem>>, vector<1x8x128xf32>,
    return
  }
  func.func @transform_0(%arg0: i32) -> (i32, i32) {
    %c0_i32 = arith.constant 0 : i32
    %c0_i32_0 = arith.constant 0 : i32
    return %arg0, %c0_i32 : i32, i32
  }
  func.func @transform_1(%arg0: i32) -> (i32, i32) {
    %c0_i32 = arith.constant 0 : i32
    %c0_i32_0 = arith.constant 0 : i32
    %c0_i32_1 = arith.constant 0 : i32
    return %c0_i32, %c0_i32_0 : i32, i32
  }
  func.func @transform_2(%arg0: i32) -> (i32, i32) {
    %c0_i32 = arith.constant 0 : i32
    %c0_i32_0 = arith.constant 0 : i32
    return %arg0, %c0_i32 : i32, i32
  }
  func.func @transform_3(%arg0: i32) -> (i32, i32) {
    %c0_i32 = arith.constant 0 : i32
    %c0_i32_0 = arith.constant 0 : i32
    return %arg0, %c0_i32 : i32, i32
  }
  func.func @transform_4(%arg0: i32) -> (i32, i32, i32) {
    %c0_i32 = arith.constant 0 : i32
    %c0_i32_0 = arith.constant 0 : i32
    %c0_i32_1 = arith.constant 0 : i32
    return %arg0, %c0_i32, %c0_i32_0 : i32, i32, i32
  }
  func.func @transform_5(%arg0: i32) -> (i32, i32, i32) {
    %c0_i32 = arith.constant 0 : i32
    %c0_i32_0 = arith.constant 0 : i32
    %c0_i32_1 = arith.constant 0 : i32
    return %arg0, %c0_i32, %c0_i32_0 : i32, i32, i32
  }
}

module attributes {stable_mosaic.version = 11 : i64} {
  func.func @_k2_conv3x3(%arg0: i32, %arg1: memref<1x256x128xf32, #tpu.memory_space<vmem>>, %arg2: memref<1x128xf32, #tpu.memory_space<vmem>>, %arg3: memref<1x128xf32, #tpu.memory_space<vmem>>, %arg4: memref<1152x128xbf16, #tpu.memory_space<vmem>>, %arg5: memref<1x256x128xf32, #tpu.memory_space<vmem>>, %arg6: memref<1x8x128xf32, #tpu.memory_space<vmem>>, %arg7: memref<18x18x128xf32, #tpu.memory_space<vmem>>) attributes {dimension_semantics = [#tpu.dimension_semantics<parallel>], iteration_bounds = array<i64: 2>, scalar_prefetch = 0 : i64, scratch_operands = 1 : i64, tpu.core_type = #tpu.core_type<tc>, window_params = [{transform_indices = @transform_0, window_bounds = array<i64: 1, 256, 128>}, {pipeline_mode = #tpu.pipeline_mode<synchronous>, transform_indices = @transform_1, window_bounds = array<i64: 1, 128>}, {pipeline_mode = #tpu.pipeline_mode<synchronous>, transform_indices = @transform_2, window_bounds = array<i64: 1, 128>}, {pipeline_mode = #tpu.pipeline_mode<synchronous>, transform_indices = @transform_3, window_bounds = array<i64: 1152, 128>}, {transform_indices = @transform_4, window_bounds = array<i64: 1, 256, 128>}, {transform_indices = @transform_5, window_bounds = array<i64: 1, 8, 128>}]} {
    %c0 = arith.constant 0 : index
    %c0_0 = arith.constant 0 : index
    %c0_1 = arith.constant 0 : index
    %0 = vector.load %arg1[%c0, %c0_0, %c0_1] : memref<1x256x128xf32, #tpu.memory_space<vmem>>, vector<1x256x128xf32>
    %1 = vector.shape_cast %0 : vector<1x256x128xf32> to vector<256x128xf32>
    %c0_2 = arith.constant 0 : index
    %c0_3 = arith.constant 0 : index
    %2 = vector.load %arg2[%c0_2, %c0_3] : memref<1x128xf32, #tpu.memory_space<vmem>>, vector<1x128xf32>
    %3 = vector.broadcast %2 : vector<1x128xf32> to vector<256x128xf32>
    %4 = arith.mulf %1, %3 : vector<256x128xf32>
    %c0_4 = arith.constant 0 : index
    %c0_5 = arith.constant 0 : index
    %5 = vector.load %arg3[%c0_4, %c0_5] : memref<1x128xf32, #tpu.memory_space<vmem>>, vector<1x128xf32>
    %6 = vector.broadcast %5 : vector<1x128xf32> to vector<256x128xf32>
    %7 = arith.addf %4, %6 : vector<256x128xf32>
    %cst = arith.constant 0.000000e+00 : f32
    %8 = vector.broadcast %cst : f32 to vector<256x128xf32>
    %9 = arith.maximumf %7, %8 : vector<256x128xf32>
    %cst_6 = arith.constant 0.000000e+00 : f32
    %10 = vector.broadcast %cst_6 : f32 to vector<1x18x128xf32>
    %c0_7 = arith.constant 0 : index
    %c0_8 = arith.constant 0 : index
    %c0_9 = arith.constant 0 : index
    %11 = vector.load %arg7[%c0_7, %c0_8, %c0_9] : memref<18x18x128xf32, #tpu.memory_space<vmem>>, vector<1x18x128xf32>
    tpu.vector_store %arg7[%c0_7, %c0_8, %c0_9], %10 {strides = array<i32>} : memref<18x18x128xf32, #tpu.memory_space<vmem>>, vector<1x18x128xf32>,
    %cst_10 = arith.constant 0.000000e+00 : f32
    %12 = vector.broadcast %cst_10 : f32 to vector<1x18x128xf32>
    %c17 = arith.constant 17 : index
    %c0_11 = arith.constant 0 : index
    %c0_12 = arith.constant 0 : index
    %13 = vector.load %arg7[%c17, %c0_11, %c0_12] : memref<18x18x128xf32, #tpu.memory_space<vmem>>, vector<1x18x128xf32>
    tpu.vector_store %arg7[%c17, %c0_11, %c0_12], %12 {strides = array<i32>} : memref<18x18x128xf32, #tpu.memory_space<vmem>>, vector<1x18x128xf32>,
    %cst_13 = arith.constant 0.000000e+00 : f32
    %14 = vector.broadcast %cst_13 : f32 to vector<18x1x128xf32>
    %c0_14 = arith.constant 0 : index
    %c0_15 = arith.constant 0 : index
    %c0_16 = arith.constant 0 : index
    %15 = vector.load %arg7[%c0_14, %c0_15, %c0_16] : memref<18x18x128xf32, #tpu.memory_space<vmem>>, vector<18x1x128xf32>
    tpu.vector_store %arg7[%c0_14, %c0_15, %c0_16], %14 {strides = array<i32>} : memref<18x18x128xf32, #tpu.memory_space<vmem>>, vector<18x1x128xf32>,
    %cst_17 = arith.constant 0.000000e+00 : f32
    %16 = vector.broadcast %cst_17 : f32 to vector<18x1x128xf32>
    %c0_18 = arith.constant 0 : index
    %c17_19 = arith.constant 17 : index
    %c0_20 = arith.constant 0 : index
    %17 = vector.load %arg7[%c0_18, %c17_19, %c0_20] : memref<18x18x128xf32, #tpu.memory_space<vmem>>, vector<18x1x128xf32>
    tpu.vector_store %arg7[%c0_18, %c17_19, %c0_20], %16 {strides = array<i32>} : memref<18x18x128xf32, #tpu.memory_space<vmem>>, vector<18x1x128xf32>,
    %18 = vector.shape_cast %9 : vector<256x128xf32> to vector<16x16x128xf32>
    %c1 = arith.constant 1 : index
    %c1_21 = arith.constant 1 : index
    %c0_22 = arith.constant 0 : index
    %19 = vector.load %arg7[%c1, %c1_21, %c0_22] : memref<18x18x128xf32, #tpu.memory_space<vmem>>, vector<16x16x128xf32>
    tpu.vector_store %arg7[%c1, %c1_21, %c0_22], %18 {strides = array<i32>} : memref<18x18x128xf32, #tpu.memory_space<vmem>>, vector<16x16x128xf32>,
    %c0_23 = arith.constant 0 : index
    %c0_24 = arith.constant 0 : index
    %c0_25 = arith.constant 0 : index
    %20 = vector.load %arg7[%c0_23, %c0_24, %c0_25] : memref<18x18x128xf32, #tpu.memory_space<vmem>>, vector<16x16x128xf32>
    %21 = vector.shape_cast %20 : vector<16x16x128xf32> to vector<256x128xf32>
    %22 = arith.truncf %21 : vector<256x128xf32> to vector<256x128xbf16>
    %c0_26 = arith.constant 0 : index
    %c1_27 = arith.constant 1 : index
    %c0_28 = arith.constant 0 : index
    %23 = vector.load %arg7[%c0_26, %c1_27, %c0_28] : memref<18x18x128xf32, #tpu.memory_space<vmem>>, vector<16x16x128xf32>
    %24 = vector.shape_cast %23 : vector<16x16x128xf32> to vector<256x128xf32>
    %25 = arith.truncf %24 : vector<256x128xf32> to vector<256x128xbf16>
    %c0_29 = arith.constant 0 : index
    %c2 = arith.constant 2 : index
    %c0_30 = arith.constant 0 : index
    %26 = vector.load %arg7[%c0_29, %c2, %c0_30] : memref<18x18x128xf32, #tpu.memory_space<vmem>>, vector<16x16x128xf32>
    %27 = vector.shape_cast %26 : vector<16x16x128xf32> to vector<256x128xf32>
    %28 = arith.truncf %27 : vector<256x128xf32> to vector<256x128xbf16>
    %c1_31 = arith.constant 1 : index
    %c0_32 = arith.constant 0 : index
    %c0_33 = arith.constant 0 : index
    %29 = vector.load %arg7[%c1_31, %c0_32, %c0_33] : memref<18x18x128xf32, #tpu.memory_space<vmem>>, vector<16x16x128xf32>
    %30 = vector.shape_cast %29 : vector<16x16x128xf32> to vector<256x128xf32>
    %31 = arith.truncf %30 : vector<256x128xf32> to vector<256x128xbf16>
    %c1_34 = arith.constant 1 : index
    %c1_35 = arith.constant 1 : index
    %c0_36 = arith.constant 0 : index
    %32 = vector.load %arg7[%c1_34, %c1_35, %c0_36] : memref<18x18x128xf32, #tpu.memory_space<vmem>>, vector<16x16x128xf32>
    %33 = vector.shape_cast %32 : vector<16x16x128xf32> to vector<256x128xf32>
    %34 = arith.truncf %33 : vector<256x128xf32> to vector<256x128xbf16>
    %c1_37 = arith.constant 1 : index
    %c2_38 = arith.constant 2 : index
    %c0_39 = arith.constant 0 : index
    %35 = vector.load %arg7[%c1_37, %c2_38, %c0_39] : memref<18x18x128xf32, #tpu.memory_space<vmem>>, vector<16x16x128xf32>
    %36 = vector.shape_cast %35 : vector<16x16x128xf32> to vector<256x128xf32>
    %37 = arith.truncf %36 : vector<256x128xf32> to vector<256x128xbf16>
    %c2_40 = arith.constant 2 : index
    %c0_41 = arith.constant 0 : index
    %c0_42 = arith.constant 0 : index
    %38 = vector.load %arg7[%c2_40, %c0_41, %c0_42] : memref<18x18x128xf32, #tpu.memory_space<vmem>>, vector<16x16x128xf32>
    %39 = vector.shape_cast %38 : vector<16x16x128xf32> to vector<256x128xf32>
    %40 = arith.truncf %39 : vector<256x128xf32> to vector<256x128xbf16>
    %c2_43 = arith.constant 2 : index
    %c1_44 = arith.constant 1 : index
    %c0_45 = arith.constant 0 : index
    %41 = vector.load %arg7[%c2_43, %c1_44, %c0_45] : memref<18x18x128xf32, #tpu.memory_space<vmem>>, vector<16x16x128xf32>
    %42 = vector.shape_cast %41 : vector<16x16x128xf32> to vector<256x128xf32>
    %43 = arith.truncf %42 : vector<256x128xf32> to vector<256x128xbf16>
    %c2_46 = arith.constant 2 : index
    %c2_47 = arith.constant 2 : index
    %c0_48 = arith.constant 0 : index
    %44 = vector.load %arg7[%c2_46, %c2_47, %c0_48] : memref<18x18x128xf32, #tpu.memory_space<vmem>>, vector<16x16x128xf32>
    %45 = vector.shape_cast %44 : vector<16x16x128xf32> to vector<256x128xf32>
    %46 = arith.truncf %45 : vector<256x128xf32> to vector<256x128xbf16>
    %47 = tpu.concatenate %22, %25, %28, %31, %34, %37, %40, %43, %46 in 1 : vector<256x128xbf16>, vector<256x128xbf16>, vector<256x128xbf16>, vector<256x128xbf16>, vector<256x128xbf16>, vector<256x128xbf16>, vector<256x128xbf16>, vector<256x128xbf16>, vector<256x128xbf16> -> vector<256x1152xbf16>
    %c0_49 = arith.constant 0 : index
    %c0_50 = arith.constant 0 : index
    %48 = vector.load %arg4[%c0_49, %c0_50] : memref<1152x128xbf16, #tpu.memory_space<vmem>>, vector<1152x128xbf16>
    %cst_51 = arith.constant dense<0.000000e+00> : vector<256x128xf32>
    %49 = tpu.matmul %47, %48, %cst_51 {dimension_numbers = #tpu.dot_dimension_numbers<[1], [0], [0], [1], [0, 0, 1, 1], [], []>} : vector<256x1152xbf16>, vector<1152x128xbf16>, vector<256x128xf32> -> vector<256x128xf32>
    %c0_52 = arith.constant 0 : index
    %c0_53 = arith.constant 0 : index
    %c0_54 = arith.constant 0 : index
    %50 = vector.load %arg5[%c0_52, %c0_53, %c0_54] : memref<1x256x128xf32, #tpu.memory_space<vmem>>, vector<1x256x128xf32>
    %51 = vector.shape_cast %50 : vector<1x256x128xf32> to vector<256x128xf32>
    %52 = vector.shape_cast %49 : vector<256x128xf32> to vector<1x256x128xf32>
    tpu.vector_store %arg5[%c0_52, %c0_53, %c0_54], %52 {strides = array<i32>} : memref<1x256x128xf32, #tpu.memory_space<vmem>>, vector<1x256x128xf32>,
    %cst_55 = arith.constant dense<0.000000e+00> : vector<128xf32>
    %53 = vector.multi_reduction <add>, %49, %cst_55 [0] : vector<256x128xf32> to vector<128xf32>
    %54 = vector.shape_cast %53 : vector<128xf32> to vector<1x128xf32>
    %55 = arith.mulf %49, %49 : vector<256x128xf32>
    %cst_56 = arith.constant dense<0.000000e+00> : vector<128xf32>
    %56 = vector.multi_reduction <add>, %55, %cst_56 [0] : vector<256x128xf32> to vector<128xf32>
    %57 = vector.shape_cast %56 : vector<128xf32> to vector<1x128xf32>
    %cst_57 = arith.constant 0.000000e+00 : f32
    %58 = vector.broadcast %cst_57 : f32 to vector<6x128xf32>
    %59 = tpu.concatenate %54, %57, %58 in 0 : vector<1x128xf32>, vector<1x128xf32>, vector<6x128xf32> -> vector<8x128xf32>
    %c0_58 = arith.constant 0 : index
    %c0_59 = arith.constant 0 : index
    %c0_60 = arith.constant 0 : index
    %60 = vector.load %arg6[%c0_58, %c0_59, %c0_60] : memref<1x8x128xf32, #tpu.memory_space<vmem>>, vector<1x8x128xf32>
    %61 = vector.shape_cast %60 : vector<1x8x128xf32> to vector<8x128xf32>
    %62 = vector.shape_cast %59 : vector<8x128xf32> to vector<1x8x128xf32>
    tpu.vector_store %arg6[%c0_58, %c0_59, %c0_60], %62 {strides = array<i32>} : memref<1x8x128xf32, #tpu.memory_space<vmem>>, vector<1x8x128xf32>,
    return
  }
  func.func @transform_0(%arg0: i32) -> (i32, i32, i32) {
    %c0_i32 = arith.constant 0 : i32
    %c0_i32_0 = arith.constant 0 : i32
    %c0_i32_1 = arith.constant 0 : i32
    return %arg0, %c0_i32, %c0_i32_0 : i32, i32, i32
  }
  func.func @transform_1(%arg0: i32) -> (i32, i32) {
    %c0_i32 = arith.constant 0 : i32
    %c0_i32_0 = arith.constant 0 : i32
    %c0_i32_1 = arith.constant 0 : i32
    return %c0_i32, %c0_i32_0 : i32, i32
  }
  func.func @transform_2(%arg0: i32) -> (i32, i32) {
    %c0_i32 = arith.constant 0 : i32
    %c0_i32_0 = arith.constant 0 : i32
    %c0_i32_1 = arith.constant 0 : i32
    return %c0_i32, %c0_i32_0 : i32, i32
  }
  func.func @transform_3(%arg0: i32) -> (i32, i32) {
    %c0_i32 = arith.constant 0 : i32
    %c0_i32_0 = arith.constant 0 : i32
    %c0_i32_1 = arith.constant 0 : i32
    return %c0_i32, %c0_i32_0 : i32, i32
  }
  func.func @transform_4(%arg0: i32) -> (i32, i32, i32) {
    %c0_i32 = arith.constant 0 : i32
    %c0_i32_0 = arith.constant 0 : i32
    %c0_i32_1 = arith.constant 0 : i32
    return %arg0, %c0_i32, %c0_i32_0 : i32, i32, i32
  }
  func.func @transform_5(%arg0: i32) -> (i32, i32, i32) {
    %c0_i32 = arith.constant 0 : i32
    %c0_i32_0 = arith.constant 0 : i32
    %c0_i32_1 = arith.constant 0 : i32
    return %arg0, %c0_i32, %c0_i32_0 : i32, i32, i32
  }
}

module attributes {stable_mosaic.version = 11 : i64} {
  func.func @_k3_conv3(%arg0: i32, %arg1: memref<1x256x128xf32, #tpu.memory_space<vmem>>, %arg2: memref<1x128xf32, #tpu.memory_space<vmem>>, %arg3: memref<1x128xf32, #tpu.memory_space<vmem>>, %arg4: memref<128x128xbf16, #tpu.memory_space<vmem>>, %arg5: memref<1x256x128xf32, #tpu.memory_space<vmem>>, %arg6: memref<1x8x128xf32, #tpu.memory_space<vmem>>) attributes {dimension_semantics = [#tpu.dimension_semantics<parallel>], iteration_bounds = array<i64: 2>, scalar_prefetch = 0 : i64, scratch_operands = 0 : i64, tpu.core_type = #tpu.core_type<tc>, window_params = [{transform_indices = @transform_0, window_bounds = array<i64: 1, 256, 128>}, {pipeline_mode = #tpu.pipeline_mode<synchronous>, transform_indices = @transform_1, window_bounds = array<i64: 1, 128>}, {pipeline_mode = #tpu.pipeline_mode<synchronous>, transform_indices = @transform_2, window_bounds = array<i64: 1, 128>}, {pipeline_mode = #tpu.pipeline_mode<synchronous>, transform_indices = @transform_3, window_bounds = array<i64: 128, 128>}, {transform_indices = @transform_4, window_bounds = array<i64: 1, 256, 128>}, {transform_indices = @transform_5, window_bounds = array<i64: 1, 8, 128>}]} {
    %c0 = arith.constant 0 : index
    %c0_0 = arith.constant 0 : index
    %c0_1 = arith.constant 0 : index
    %0 = vector.load %arg1[%c0, %c0_0, %c0_1] : memref<1x256x128xf32, #tpu.memory_space<vmem>>, vector<1x256x128xf32>
    %1 = vector.shape_cast %0 : vector<1x256x128xf32> to vector<256x128xf32>
    %c0_2 = arith.constant 0 : index
    %c0_3 = arith.constant 0 : index
    %2 = vector.load %arg2[%c0_2, %c0_3] : memref<1x128xf32, #tpu.memory_space<vmem>>, vector<1x128xf32>
    %3 = vector.broadcast %2 : vector<1x128xf32> to vector<256x128xf32>
    %4 = arith.mulf %1, %3 : vector<256x128xf32>
    %c0_4 = arith.constant 0 : index
    %c0_5 = arith.constant 0 : index
    %5 = vector.load %arg3[%c0_4, %c0_5] : memref<1x128xf32, #tpu.memory_space<vmem>>, vector<1x128xf32>
    %6 = vector.broadcast %5 : vector<1x128xf32> to vector<256x128xf32>
    %7 = arith.addf %4, %6 : vector<256x128xf32>
    %cst = arith.constant 0.000000e+00 : f32
    %8 = vector.broadcast %cst : f32 to vector<256x128xf32>
    %9 = arith.maximumf %7, %8 : vector<256x128xf32>
    %10 = arith.truncf %9 : vector<256x128xf32> to vector<256x128xbf16>
    %c0_6 = arith.constant 0 : index
    %c0_7 = arith.constant 0 : index
    %11 = vector.load %arg4[%c0_6, %c0_7] : memref<128x128xbf16, #tpu.memory_space<vmem>>, vector<128x128xbf16>
    %cst_8 = arith.constant dense<0.000000e+00> : vector<256x128xf32>
    %12 = tpu.matmul %10, %11, %cst_8 {dimension_numbers = #tpu.dot_dimension_numbers<[1], [0], [0], [1], [0, 0, 1, 1], [], []>} : vector<256x128xbf16>, vector<128x128xbf16>, vector<256x128xf32> -> vector<256x128xf32>
    %c0_9 = arith.constant 0 : index
    %c0_10 = arith.constant 0 : index
    %c0_11 = arith.constant 0 : index
    %13 = vector.load %arg5[%c0_9, %c0_10, %c0_11] : memref<1x256x128xf32, #tpu.memory_space<vmem>>, vector<1x256x128xf32>
    %14 = vector.shape_cast %13 : vector<1x256x128xf32> to vector<256x128xf32>
    %15 = vector.shape_cast %12 : vector<256x128xf32> to vector<1x256x128xf32>
    tpu.vector_store %arg5[%c0_9, %c0_10, %c0_11], %15 {strides = array<i32>} : memref<1x256x128xf32, #tpu.memory_space<vmem>>, vector<1x256x128xf32>,
    %cst_12 = arith.constant dense<0.000000e+00> : vector<128xf32>
    %16 = vector.multi_reduction <add>, %12, %cst_12 [0] : vector<256x128xf32> to vector<128xf32>
    %17 = vector.shape_cast %16 : vector<128xf32> to vector<1x128xf32>
    %18 = arith.mulf %12, %12 : vector<256x128xf32>
    %cst_13 = arith.constant dense<0.000000e+00> : vector<128xf32>
    %19 = vector.multi_reduction <add>, %18, %cst_13 [0] : vector<256x128xf32> to vector<128xf32>
    %20 = vector.shape_cast %19 : vector<128xf32> to vector<1x128xf32>
    %cst_14 = arith.constant 0.000000e+00 : f32
    %21 = vector.broadcast %cst_14 : f32 to vector<6x128xf32>
    %22 = tpu.concatenate %17, %20, %21 in 0 : vector<1x128xf32>, vector<1x128xf32>, vector<6x128xf32> -> vector<8x128xf32>
    %c0_15 = arith.constant 0 : index
    %c0_16 = arith.constant 0 : index
    %c0_17 = arith.constant 0 : index
    %23 = vector.load %arg6[%c0_15, %c0_16, %c0_17] : memref<1x8x128xf32, #tpu.memory_space<vmem>>, vector<1x8x128xf32>
    %24 = vector.shape_cast %23 : vector<1x8x128xf32> to vector<8x128xf32>
    %25 = vector.shape_cast %22 : vector<8x128xf32> to vector<1x8x128xf32>
    tpu.vector_store %arg6[%c0_15, %c0_16, %c0_17], %25 {strides = array<i32>} : memref<1x8x128xf32, #tpu.memory_space<vmem>>, vector<1x8x128xf32>,
    return
  }
  func.func @transform_0(%arg0: i32) -> (i32, i32, i32) {
    %c0_i32 = arith.constant 0 : i32
    %c0_i32_0 = arith.constant 0 : i32
    %c0_i32_1 = arith.constant 0 : i32
    return %arg0, %c0_i32, %c0_i32_0 : i32, i32, i32
  }
  func.func @transform_1(%arg0: i32) -> (i32, i32) {
    %c0_i32 = arith.constant 0 : i32
    %c0_i32_0 = arith.constant 0 : i32
    %c0_i32_1 = arith.constant 0 : i32
    return %c0_i32, %c0_i32_0 : i32, i32
  }
  func.func @transform_2(%arg0: i32) -> (i32, i32) {
    %c0_i32 = arith.constant 0 : i32
    %c0_i32_0 = arith.constant 0 : i32
    %c0_i32_1 = arith.constant 0 : i32
    return %c0_i32, %c0_i32_0 : i32, i32
  }
  func.func @transform_3(%arg0: i32) -> (i32, i32) {
    %c0_i32 = arith.constant 0 : i32
    %c0_i32_0 = arith.constant 0 : i32
    %c0_i32_1 = arith.constant 0 : i32
    return %c0_i32, %c0_i32_0 : i32, i32
  }
  func.func @transform_4(%arg0: i32) -> (i32, i32, i32) {
    %c0_i32 = arith.constant 0 : i32
    %c0_i32_0 = arith.constant 0 : i32
    %c0_i32_1 = arith.constant 0 : i32
    return %arg0, %c0_i32, %c0_i32_0 : i32, i32, i32
  }
  func.func @transform_5(%arg0: i32) -> (i32, i32, i32) {
    %c0_i32 = arith.constant 0 : i32
    %c0_i32_0 = arith.constant 0 : i32
    %c0_i32_1 = arith.constant 0 : i32
    return %arg0, %c0_i32, %c0_i32_0 : i32, i32, i32
  }
}

module attributes {stable_mosaic.version = 11 : i64} {
  func.func @_k4_residual(%arg0: i32, %arg1: memref<1x256x128xf32, #tpu.memory_space<vmem>>, %arg2: memref<1x256x128xf32, #tpu.memory_space<vmem>>, %arg3: memref<1x128xf32, #tpu.memory_space<vmem>>, %arg4: memref<1x128xf32, #tpu.memory_space<vmem>>, %arg5: memref<1x128xf32, #tpu.memory_space<vmem>>, %arg6: memref<1x128xf32, #tpu.memory_space<vmem>>, %arg7: memref<1x18x18x128xf32, #tpu.memory_space<vmem>>) attributes {dimension_semantics = [#tpu.dimension_semantics<parallel>], iteration_bounds = array<i64: 2>, scalar_prefetch = 0 : i64, scratch_operands = 0 : i64, tpu.core_type = #tpu.core_type<tc>, window_params = [{transform_indices = @transform_0, window_bounds = array<i64: 1, 256, 128>}, {transform_indices = @transform_1, window_bounds = array<i64: 1, 256, 128>}, {pipeline_mode = #tpu.pipeline_mode<synchronous>, transform_indices = @transform_2, window_bounds = array<i64: 1, 128>}, {pipeline_mode = #tpu.pipeline_mode<synchronous>, transform_indices = @transform_3, window_bounds = array<i64: 1, 128>}, {pipeline_mode = #tpu.pipeline_mode<synchronous>, transform_indices = @transform_4, window_bounds = array<i64: 1, 128>}, {pipeline_mode = #tpu.pipeline_mode<synchronous>, transform_indices = @transform_5, window_bounds = array<i64: 1, 128>}, {transform_indices = @transform_6, window_bounds = array<i64: 1, 18, 18, 128>}]} {
    %c0 = arith.constant 0 : index
    %c0_0 = arith.constant 0 : index
    %c0_1 = arith.constant 0 : index
    %0 = vector.load %arg1[%c0, %c0_0, %c0_1] : memref<1x256x128xf32, #tpu.memory_space<vmem>>, vector<1x256x128xf32>
    %1 = vector.shape_cast %0 : vector<1x256x128xf32> to vector<256x128xf32>
    %c0_2 = arith.constant 0 : index
    %c0_3 = arith.constant 0 : index
    %2 = vector.load %arg3[%c0_2, %c0_3] : memref<1x128xf32, #tpu.memory_space<vmem>>, vector<1x128xf32>
    %3 = vector.broadcast %2 : vector<1x128xf32> to vector<256x128xf32>
    %4 = arith.mulf %1, %3 : vector<256x128xf32>
    %c0_4 = arith.constant 0 : index
    %c0_5 = arith.constant 0 : index
    %5 = vector.load %arg4[%c0_4, %c0_5] : memref<1x128xf32, #tpu.memory_space<vmem>>, vector<1x128xf32>
    %6 = vector.broadcast %5 : vector<1x128xf32> to vector<256x128xf32>
    %7 = arith.addf %4, %6 : vector<256x128xf32>
    %c0_6 = arith.constant 0 : index
    %c0_7 = arith.constant 0 : index
    %c0_8 = arith.constant 0 : index
    %8 = vector.load %arg2[%c0_6, %c0_7, %c0_8] : memref<1x256x128xf32, #tpu.memory_space<vmem>>, vector<1x256x128xf32>
    %9 = vector.shape_cast %8 : vector<1x256x128xf32> to vector<256x128xf32>
    %c0_9 = arith.constant 0 : index
    %c0_10 = arith.constant 0 : index
    %10 = vector.load %arg5[%c0_9, %c0_10] : memref<1x128xf32, #tpu.memory_space<vmem>>, vector<1x128xf32>
    %11 = vector.broadcast %10 : vector<1x128xf32> to vector<256x128xf32>
    %12 = arith.mulf %9, %11 : vector<256x128xf32>
    %c0_11 = arith.constant 0 : index
    %c0_12 = arith.constant 0 : index
    %13 = vector.load %arg6[%c0_11, %c0_12] : memref<1x128xf32, #tpu.memory_space<vmem>>, vector<1x128xf32>
    %14 = vector.broadcast %13 : vector<1x128xf32> to vector<256x128xf32>
    %15 = arith.addf %12, %14 : vector<256x128xf32>
    %16 = arith.addf %7, %15 : vector<256x128xf32>
    %cst = arith.constant 0.000000e+00 : f32
    %17 = vector.broadcast %cst : f32 to vector<256x128xf32>
    %18 = arith.maximumf %16, %17 : vector<256x128xf32>
    %19 = vector.shape_cast %18 : vector<256x128xf32> to vector<1x16x16x128xf32>
    %c0_13 = arith.constant 0 : index
    %c0_14 = arith.constant 0 : index
    %20 = vector.load %arg4[%c0_13, %c0_14] : memref<1x128xf32, #tpu.memory_space<vmem>>, vector<1x128xf32>
    %c0_15 = arith.constant 0 : index
    %c0_16 = arith.constant 0 : index
    %21 = vector.load %arg6[%c0_15, %c0_16] : memref<1x128xf32, #tpu.memory_space<vmem>>, vector<1x128xf32>
    %22 = arith.addf %20, %21 : vector<1x128xf32>
    %cst_17 = arith.constant 0.000000e+00 : f32
    %23 = vector.broadcast %cst_17 : f32 to vector<1x128xf32>
    %24 = arith.maximumf %22, %23 : vector<1x128xf32>
    %25 = vector.shape_cast %24 : vector<1x128xf32> to vector<1x1x1x128xf32>
    %26 = vector.shape_cast %25 : vector<1x1x1x128xf32> to vector<1x1x1x128xf32>
    %27 = vector.broadcast %26 : vector<1x1x1x128xf32> to vector<1x1x18x128xf32>
    %c0_18 = arith.constant 0 : index
    %c0_19 = arith.constant 0 : index
    %c0_20 = arith.constant 0 : index
    %c0_21 = arith.constant 0 : index
    %28 = vector.load %arg7[%c0_18, %c0_19, %c0_20, %c0_21] : memref<1x18x18x128xf32, #tpu.memory_space<vmem>>, vector<1x1x18x128xf32>
    tpu.vector_store %arg7[%c0_18, %c0_19, %c0_20, %c0_21], %27 {strides = array<i32>} : memref<1x18x18x128xf32, #tpu.memory_space<vmem>>, vector<1x1x18x128xf32>,
    %29 = vector.shape_cast %25 : vector<1x1x1x128xf32> to vector<1x1x1x128xf32>
    %30 = vector.broadcast %29 : vector<1x1x1x128xf32> to vector<1x1x18x128xf32>
    %c0_22 = arith.constant 0 : index
    %c17 = arith.constant 17 : index
    %c0_23 = arith.constant 0 : index
    %c0_24 = arith.constant 0 : index
    %31 = vector.load %arg7[%c0_22, %c17, %c0_23, %c0_24] : memref<1x18x18x128xf32, #tpu.memory_space<vmem>>, vector<1x1x18x128xf32>
    tpu.vector_store %arg7[%c0_22, %c17, %c0_23, %c0_24], %30 {strides = array<i32>} : memref<1x18x18x128xf32, #tpu.memory_space<vmem>>, vector<1x1x18x128xf32>,
    %32 = vector.shape_cast %25 : vector<1x1x1x128xf32> to vector<1x1x1x128xf32>
    %33 = vector.broadcast %32 : vector<1x1x1x128xf32> to vector<1x18x1x128xf32>
    %c0_25 = arith.constant 0 : index
    %c0_26 = arith.constant 0 : index
    %c0_27 = arith.constant 0 : index
    %c0_28 = arith.constant 0 : index
    %34 = vector.load %arg7[%c0_25, %c0_26, %c0_27, %c0_28] : memref<1x18x18x128xf32, #tpu.memory_space<vmem>>, vector<1x18x1x128xf32>
    tpu.vector_store %arg7[%c0_25, %c0_26, %c0_27, %c0_28], %33 {strides = array<i32>} : memref<1x18x18x128xf32, #tpu.memory_space<vmem>>, vector<1x18x1x128xf32>,
    %35 = vector.shape_cast %25 : vector<1x1x1x128xf32> to vector<1x1x1x128xf32>
    %36 = vector.broadcast %35 : vector<1x1x1x128xf32> to vector<1x18x1x128xf32>
    %c0_29 = arith.constant 0 : index
    %c0_30 = arith.constant 0 : index
    %c17_31 = arith.constant 17 : index
    %c0_32 = arith.constant 0 : index
    %37 = vector.load %arg7[%c0_29, %c0_30, %c17_31, %c0_32] : memref<1x18x18x128xf32, #tpu.memory_space<vmem>>, vector<1x18x1x128xf32>
    tpu.vector_store %arg7[%c0_29, %c0_30, %c17_31, %c0_32], %36 {strides = array<i32>} : memref<1x18x18x128xf32, #tpu.memory_space<vmem>>, vector<1x18x1x128xf32>,
    %c0_33 = arith.constant 0 : index
    %c1 = arith.constant 1 : index
    %c1_34 = arith.constant 1 : index
    %c0_35 = arith.constant 0 : index
    %38 = vector.load %arg7[%c0_33, %c1, %c1_34, %c0_35] : memref<1x18x18x128xf32, #tpu.memory_space<vmem>>, vector<1x16x16x128xf32>
    tpu.vector_store %arg7[%c0_33, %c1, %c1_34, %c0_35], %19 {strides = array<i32>} : memref<1x18x18x128xf32, #tpu.memory_space<vmem>>, vector<1x16x16x128xf32>,
    return
  }
  func.func @transform_0(%arg0: i32) -> (i32, i32, i32) {
    %c0_i32 = arith.constant 0 : i32
    %c0_i32_0 = arith.constant 0 : i32
    %c0_i32_1 = arith.constant 0 : i32
    return %arg0, %c0_i32, %c0_i32_0 : i32, i32, i32
  }
  func.func @transform_1(%arg0: i32) -> (i32, i32, i32) {
    %c0_i32 = arith.constant 0 : i32
    %c0_i32_0 = arith.constant 0 : i32
    %c0_i32_1 = arith.constant 0 : i32
    return %arg0, %c0_i32, %c0_i32_0 : i32, i32, i32
  }
  func.func @transform_2(%arg0: i32) -> (i32, i32) {
    %c0_i32 = arith.constant 0 : i32
    %c0_i32_0 = arith.constant 0 : i32
    %c0_i32_1 = arith.constant 0 : i32
    return %c0_i32, %c0_i32_0 : i32, i32
  }
  func.func @transform_3(%arg0: i32) -> (i32, i32) {
    %c0_i32 = arith.constant 0 : i32
    %c0_i32_0 = arith.constant 0 : i32
    %c0_i32_1 = arith.constant 0 : i32
    return %c0_i32, %c0_i32_0 : i32, i32
  }
  func.func @transform_4(%arg0: i32) -> (i32, i32) {
    %c0_i32 = arith.constant 0 : i32
    %c0_i32_0 = arith.constant 0 : i32
    %c0_i32_1 = arith.constant 0 : i32
    return %c0_i32, %c0_i32_0 : i32, i32
  }
  func.func @transform_5(%arg0: i32) -> (i32, i32) {
    %c0_i32 = arith.constant 0 : i32
    %c0_i32_0 = arith.constant 0 : i32
    %c0_i32_1 = arith.constant 0 : i32
    return %c0_i32, %c0_i32_0 : i32, i32
  }
  func.func @transform_6(%arg0: i32) -> (i32, i32, i32, i32) {
    %c0_i32 = arith.constant 0 : i32
    %c0_i32_0 = arith.constant 0 : i32
    %c0_i32_1 = arith.constant 0 : i32
    %c0_i32_2 = arith.constant 0 : i32
    return %arg0, %c0_i32, %c0_i32_0, %c0_i32_1 : i32, i32, i32, i32
  }
}

</mosaic_0001>

<bundles_post_ra>
// kernel: bottleneck_forward.6
= control target key start
LH: loop header
LB: loop body
LE: loop exit
PB: predicated region body
PF: predicated region fallthrough
CT: control target
= control target key end

     0   :  { %s1015_s18 = smov 0   ;;  %s1307_s0 = inlined_call_operand.vmem [shape: f32[2,256,128], index: 0, kind: input, shape index: {}]   ;;  %s1308_s1 = inlined_call_operand.vmem [shape: f32[1,128], index: 1, kind: input, shape index: {}]   ;;  %s1309_s2 = inlined_call_operand.vmem [shape: f32[1,128], index: 2, kind: input, shape index: {}]   ;;  %s1310_s3 = inlined_call_operand.vmem [shape: bf16[128,128], index: 3, kind: input, shape index: {}]   ;;  %s1311_s4 = inlined_call_operand.vmem [shape: f32[2,256,128], index: 4, kind: output, shape index: {0}]   ;;  %s1312_s5 = inlined_call_operand.vmem [shape: f32[2,8,128], index: 5, kind: output, shape index: {1}]  }
   0x1 LB: > { %s849_s19 = sadd.s32 4294967295, %s983_s18   ;;  %p853_p0 = scmp.ge.s32.totalorder %s983_s18, 1  ;;  %s983_s18 = sphi %s1015_s18, %s16_s18  }
   0x2   : > { %p190_p1 = scmp.lt.s32.totalorder %s983_s18, 3 }
   0x4   : > { %p191_p2 = pnand %p853_p0, %p190_p1 }
   0x5   : > { %v969_v0 = vld [vmem:[%s1310_s3] sm:$0xff] (!%p191_p2)   ;;  %p222_p3 = scmp.lt.s32.totalorder (!%p191_p2), %s849_s19, 1  ;;  %v970_v1 = vld [vmem:[%s1310_s3 + $0x8] sm:$0xff] (!%p191_p2)   ;;  %v971_v2 = vld [vmem:[%s1310_s3 + $0x10] sm:$0xff] (!%p191_p2)   ;;  %vm758_vm0 = vcmask (!%p191_p2), 1040384   ;;  %vm760_vm1 = vcmask (!%p191_p2), 1041408  }
   0x6   : > { %194 = sbr.rel (%p191_p2) target bundleno = 332 (0x14c), region = 36  ;;  %897 = vmatprep.subr.bf16.mxu0 (!%p191_p2), %v969_v0  ;;  %945 = vmatprep.subr.bf16.mxu1 (!%p191_p2), %v969_v0  ;;  %v972_v3 = vld [vmem:[%s1310_s3 + $0x18] sm:$0xff] (!%p191_p2)   ;;  %v1050_v6 = vld [vmem:[%s1308_s1] ss:$0 sm:$0xff] (!%p191_p2)  ;;  %v974_v27 = vld [vmem:[%s1310_s3 + $0x28] sm:$0xff] (!%p191_p2)  }
   0x7   : > { %898 = vmatpush3.bf16.msra.mxu0 (!%p191_p2), %v969_v0  ;;  %953 = vmatpush3.bf16.msra.mxu1 (!%p191_p2), %v969_v0  ;;  %v1057_v9 = vld [vmem:[%s1309_s2] ss:$0 sm:$0xff] (!%p191_p2)  ;;  %v975_v35 = vld [vmem:[%s1310_s3 + $0x30] sm:$0xff] (!%p191_p2)   ;;  %v976_v52 = vld [vmem:[%s1310_s3 + $0x38] sm:$0xff] (!%p191_p2)  }
   0x8   : > { %899 = vmatprep.subr.bf16.mxu0 (!%p191_p2), %v970_v1  ;;  %946 = vmatprep.subr.bf16.mxu1 (!%p191_p2), %v970_v1  ;;  %v973_v17 = vld [vmem:[%s1310_s3 + $0x20] sm:$0xff] (!%p191_p2)  }
   0xb   : > { %900 = vmatpush3.bf16.msra.mxu0 (!%p191_p2), %v970_v1  ;;  %954 = vmatpush3.bf16.msra.mxu1 (!%p191_p2), %v970_v1 }
   0xc   : > { %901 = vmatprep.subr.bf16.mxu0 (!%p191_p2), %v971_v2  ;;  %947 = vmatprep.subr.bf16.mxu1 (!%p191_p2), %v971_v2 }
   0xd   : > { %s1314_s19 = smov (!%p222_p3, %s849_s19), 1 }
   0xe   : > { %s871_s26 = sshll.u32 %s1314_s19, 8  ;;  %s858_s24 = sshll.u32 %s1314_s19, 3 }
   0xf   : > { %s1040_s29 = scalar_lea.vmem %s1307_s0, %s871_s26  ;;  %902 = vmatpush3.bf16.msra.mxu0 %v971_v2  ;;  %955 = vmatpush3.bf16.msra.mxu1 %v971_v2  ;;  %s1188_s23 = scalar_lea.vmem %s1311_s4, %s871_s26 }
  0x10   : > { %v237_v4 = vld [vmem:[%s1040_s29] sm:$0xff]  ;;  %v238_v5 = vld [vmem:[%s1040_s29 + $0x8] sm:$0xff]  ;;  %v239_v10 = vld [vmem:[%s1040_s29 + $0x10] sm:$0xff]  ;;  %903 = vmatprep.subr.bf16.mxu0 %v972_v3  ;;  %948 = vmatprep.subr.bf16.mxu1 %v972_v3  ;;  %s235_s27 = scalar_lea.vmem %s1312_s5, %s858_s24 }
  0x11   : > { %v276_v7 = vmul.f32 %v1050_v6, %v237_v4  ;;  %v277_v8 = vmul.f32 %v1050_v6, %v238_v5  ;;  %v240_v11 = vld [vmem:[%s1040_s29 + $0x18] sm:$0xff]  ;;  %v278_v12 = vmul.f32 %v1050_v6, %v239_v10  ;;  %v241_v16 = vld [vmem:[%s1040_s29 + $0x20] sm:$0xff]  ;;  %v242_v20 = vld [vmem:[%s1040_s29 + $0x28] sm:$0xff] }
  0x12   : > { %v279_v15 = vmul.f32 %v1050_v6, %v240_v11  ;;  %v280_v21 = vmul.f32 %v1050_v6, %v241_v16  ;;  %v243_v22 = vld [vmem:[%s1040_s29 + $0x30] sm:$0xff]  ;;  %v244_v26 = vld [vmem:[%s1040_s29 + $0x38] sm:$0xff]  ;;  %v281_v28 = vmul.f32 %v1050_v6, %v242_v20  ;;  %v253_v31 = vld [vmem:[%s1040_s29 + $0x80] sm:$0xff] }
  0x13   : > { %v315_v13 = vadd.f32 %v1057_v9, %v276_v7  ;;  %v316_v14 = vadd.f32 %v1057_v9, %v277_v8  ;;  %904 = vmatpush3.bf16.msra.mxu0 %v972_v3  ;;  %v317_v24 = vadd.f32 %v1057_v9, %v278_v12  ;;  %956 = vmatpush3.bf16.msra.mxu1 %v972_v3  ;;  %v245_v37 = vld [vmem:[%s1040_s29 + $0x40] sm:$0xff]  ;;  %v254_v38 = vld [vmem:[%s1040_s29 + $0x88] sm:$0xff]  ;;  %v255_v42 = vld [vmem:[%s1040_s29 + $0x90] sm:$0xff] }
  0x14   : > { %v318_v25 = vadd.f32 %v1057_v9, %v279_v15  ;;  %905 = vmatprep.subr.bf16.mxu0 %v973_v17  ;;  %949 = vmatprep.subr.bf16.mxu1 %v973_v17  ;;  %v282_v29 = vmul.f32 %v1050_v6, %v243_v22  ;;  %v283_v30 = vmul.f32 %v1050_v6, %v244_v26  ;;  %v246_v40 = vld [vmem:[%s1040_s29 + $0x48] sm:$0xff]  ;;  %v256_v44 = vld [vmem:[%s1040_s29 + $0x98] sm:$0xff]  ;;  %v257_v45 = vld [vmem:[%s1040_s29 + $0xa0] sm:$0xff] }
  0x15   : > { %v347_v18 = vmax.f32 %v315_v13, 0.0  ;;  %v348_v19 = vmax.f32 %v316_v14, 0.0  ;;  %v349_v32 = vmax.f32 %v317_v24, 0.0  ;;  %v1083_v34 = vadd.f32 %v1057_v9, %v280_v21  ;;  %v258_v50 = vld [vmem:[%s1040_s29 + $0xa8] sm:$0xff]  ;;  %v259_v51 = vld [vmem:[%s1040_s29 + $0xb0] sm:$0xff]  ;;  %v260_v61 = vld [vmem:[%s1040_s29 + $0xb8] sm:$0xff] }
  0x16   : > { %v350_v33 = vmax.f32 %v318_v25, 0.0  ;;  %v1089_v36 = vadd.f32 %v1057_v9, %v281_v28  ;;  %v1094_v39 = vadd.f32 %v1057_v9, %v282_v29  ;;  %v292_v41 = vmul.f32 %v1050_v6, %v253_v31  ;;  %v261_v2 = vld [vmem:[%s1040_s29 + $0xc0] sm:$0xff]  ;;  %v262_v8 = vld [vmem:[%s1040_s29 + $0xc8] sm:$0xff]  ;;  %v247_v14 = vld [vmem:[%s1040_s29 + $0x50] sm:$0xff] }
  0x17   : > { %v379_v23 = vpack.c.bf16 %v348_v19, %v347_v18  ;;  %906 = vmatpush3.bf16.msra.mxu0 %v973_v17  ;;  %957 = vmatpush3.bf16.msra.mxu1 %v973_v17  ;;  %v1100_v43 = vadd.f32 %v1057_v9, %v283_v30  ;;  %v351_v47 = vmax.f32 %v1083_v34, 0.0  ;;  %v284_v48 = vmul.f32 %v1050_v6, %v245_v37  ;;  %v248_v15 = vld [vmem:[%s1040_s29 + $0x58] sm:$0xff]  ;;  %v249_v20 = vld [vmem:[%s1040_s29 + $0x60] sm:$0xff]  ;;  %v250_v21 = vld [vmem:[%s1040_s29 + $0x68] sm:$0xff] }
  0x18   : > { %907 = vmatprep.subr.bf16.mxu0 %v974_v27  ;;  %950 = vmatprep.subr.bf16.mxu1 %v974_v27  ;;  %v1104_v46 = vpack.c.bf16 %v350_v33, %v349_v32  ;;  %v293_v49 = vmul.f32 %v1050_v6, %v254_v38  ;;  %v352_v53 = vmax.f32 %v1089_v36, 0.0  ;;  %v285_v54 = vmul.f32 %v1050_v6, %v246_v40  ;;  %v263_v30 = vld [vmem:[%s1040_s29 + $0xd0] sm:$0xff]  ;;  %v264_v31 = vld [vmem:[%s1040_s29 + $0xd8] sm:$0xff]  ;;  %v265_v36 = vld [vmem:[%s1040_s29 + $0xe0] sm:$0xff] }
  0x19   : > { %913 = vmatprep.mubr.bf16.mxu0 %v379_v23  ;;  %v331_v55 = vadd.f32 %v1057_v9, %v292_v41  ;;  %v294_v56 = vmul.f32 %v1050_v6, %v255_v42  ;;  %v353_v57 = vmax.f32 %v1094_v39, 0.0  ;;  %v295_v59 = vmul.f32 %v1050_v6, %v256_v44  ;;  %v266_v37 = vld [vmem:[%s1040_s29 + $0xe8] sm:$0xff] }
  0x1a   : > { %v332_v58 = vadd.f32 %v1057_v9, %v293_v49  ;;  %v296_v60 = vmul.f32 %v1050_v6, %v257_v45  ;;  %v297_v0 = vmul.f32 %v1050_v6, %v258_v50  ;;  %v298_v1 = vmul.f32 %v1050_v6, %v259_v51 }
  0x1b   : > { %908 = vmatpush3.bf16.msra.mxu0 %v974_v27  ;;  %958 = vmatpush3.bf16.msra.mxu1 %v974_v27  ;;  %v363_v62 = vmax.f32 %v331_v55, 0.0  ;;  %v333_v63 = vadd.f32 %v1057_v9, %v294_v56  ;;  %v1128_v3 = vadd.f32 %v1057_v9, %v284_v48  ;;  %v334_v5 = vadd.f32 %v1057_v9, %v295_v59  ;;  %v251_v56 = vld [vmem:[%s1040_s29 + $0x70] sm:$0xff] }
  0x1c   : > { %909 = vmatprep.subr.bf16.mxu0 %v975_v35  ;;  %951 = vmatprep.subr.bf16.mxu1 %v975_v35  ;;  %v364_v4 = vmax.f32 %v332_v58, 0.0  ;;  %v335_v7 = vadd.f32 %v1057_v9, %v296_v60  ;;  %v324_v10 = vadd.f32 %v1057_v9, %v285_v54  ;;  %v336_v12 = vadd.f32 %v1057_v9, %v297_v0  ;;  %v252_v58 = vld [vmem:[%s1040_s29 + $0x78] sm:$0xff]  ;;  %v267_v0 = vld [vmem:[%s1040_s29 + $0xf0] sm:$0xff] }
  0x1d   : > { %v365_v11 = vmax.f32 %v333_v63, 0.0  ;;  %v299_v13 = vmul.f32 %v1050_v6, %v260_v61  ;;  %v366_v17 = vmax.f32 %v334_v5, 0.0  ;;  %v300_v19 = vmul.f32 %v1050_v6, %v261_v2 }
  0x1e   : > { %v387_v16 = vpack.c.bf16 %v364_v4, %v363_v62  ;;  %v367_v18 = vmax.f32 %v335_v7, 0.0  ;;  %v368_v22 = vmax.f32 %v336_v12, 0.0  ;;  %v337_v23 = vadd.f32 %v1057_v9, %v298_v1  ;;  %v268_v1 = vld [vmem:[%s1040_s29 + $0xf8] sm:$0xff] }
  0x1f   : > { %910 = vmatpush3.bf16.msra.mxu0 %v975_v35  ;;  %959 = vmatpush3.bf16.msra.mxu1 %v975_v35  ;;  %v338_v24 = vadd.f32 %v1057_v9, %v299_v13  ;;  %v301_v25 = vmul.f32 %v1050_v6, %v262_v8  ;;  %v381_v26 = vpack.c.bf16 %v352_v53, %v351_v47  ;;  %v354_v27 = vmax.f32 %v1100_v43, 0.0 }
  0x20   : > { %911 = vmatprep.subr.bf16.mxu0 %v976_v52  ;;  %952 = vmatprep.subr.bf16.mxu1 %v976_v52  ;;  %v388_v28 = vpack.c.bf16 %v366_v17, %v365_v11  ;;  %v339_v29 = vadd.f32 %v1057_v9, %v300_v19  ;;  %v286_v32 = vmul.f32 %v1050_v6, %v247_v14  ;;  %v355_v38 = vmax.f32 %v1128_v3, 0.0 }
  0x21   : > { %v287_v33 = vmul.f32 %v1050_v6, %v248_v15  ;;  %929 = vmatprep.mubr.bf16.mxu1 %v387_v16  ;;  %v389_v34 = vpack.c.bf16 %v368_v22, %v367_v18  ;;  %v340_v35 = vadd.f32 %v1057_v9, %v301_v25  ;;  %v356_v40 = vmax.f32 %v324_v10, 0.0 }
  0x22   : > { %v288_v41 = vmul.f32 %v1050_v6, %v249_v20  ;;  %v289_v42 = vmul.f32 %v1050_v6, %v250_v21  ;;  %v369_v43 = vmax.f32 %v337_v23, 0.0  ;;  %v370_v44 = vmax.f32 %v338_v24, 0.0 }
  0x23   : > { %912 = vmatpush3.bf16.msra.mxu0 %v976_v52  ;;  %960 = vmatpush3.bf16.msra.mxu1 %v976_v52  ;;  %v302_v45 = vmul.f32 %v1050_v6, %v263_v30  ;;  %v303_v47 = vmul.f32 %v1050_v6, %v264_v31  ;;  %v371_v48 = vmax.f32 %v339_v29, 0.0  ;;  %v372_v49 = vmax.f32 %v340_v35, 0.0 }
  0x24   : > { %v304_v50 = vmul.f32 %v1050_v6, %v265_v36  ;;  %v305_v51 = vmul.f32 %v1050_v6, %v266_v37  ;;  %v325_v52 = vadd.f32 %v1057_v9, %v286_v32  ;;  %v326_v53 = vadd.f32 %v1057_v9, %v287_v33 }
  0x25   : > { %v327_v54 = vadd.f32 %v1057_v9, %v288_v41  ;;  %v328_v55 = vadd.f32 %v1057_v9, %v289_v42  ;;  %v390_v59 = vpack.c.bf16 %v370_v44, %v369_v43  ;;  %v341_v60 = vadd.f32 %v1057_v9, %v302_v45 }
  0x26   : > { %914 = vmatmul.mubr.bf16.vlgmr.msra.gmra.mrb[0].mxu0 %v1104_v46  ;;  %930 = vmatmul.mubr.bf16.vlgmr.msra.gmra.mrb[0].mxu1 %v388_v28  ;;  %v382_v46 = vpack.c.bf16 %v354_v27, %v353_v57  ;;  %v342_v61 = vadd.f32 %v1057_v9, %v303_v47  ;;  %v383_v62 = vpack.c.bf16 %v356_v40, %v355_v38  ;;  %v357_v2 = vmax.f32 %v325_v52, 0.0 }
  0x27   : > { %917 = vmatprep.mubr.bf16.mxu0 %v381_v26  ;;  %933 = vmatprep.mubr.bf16.mxu1 %v389_v34  ;;  %v391_v63 = vpack.c.bf16 %v372_v49, %v371_v48  ;;  %v343_v39 = vadd.f32 %v1057_v9, %v304_v50  ;;  %v344_v57 = vadd.f32 %v1057_v9, %v305_v51  ;;  %v358_v3 = vmax.f32 %v326_v53, 0.0 }
  0x28   : > { %v290_v4 = vmul.f32 %v1050_v6, %v251_v56  ;;  %v291_v5 = vmul.f32 %v1050_v6, %v252_v58  ;;  %v373_v7 = vmax.f32 %v341_v60, 0.0  ;;  %v374_v8 = vmax.f32 %v342_v61, 0.0 }
  0x29   : > { %v306_v10 = vmul.f32 %v1050_v6, %v267_v0  ;;  %v307_v11 = vmul.f32 %v1050_v6, %v268_v1  ;;  %v359_v12 = vmax.f32 %v327_v54, 0.0  ;;  %v360_v13 = vmax.f32 %v328_v55, 0.0 }
  0x2a   : > { %v375_v14 = vmax.f32 %v343_v39, 0.0  ;;  %v376_v15 = vmax.f32 %v344_v57, 0.0  ;;  %v384_v16 = vpack.c.bf16 %v358_v3, %v357_v2  ;;  %v329_v17 = vadd.f32 %v1057_v9, %v290_v4 }
  0x2b   : > { %v330_v18 = vadd.f32 %v1057_v9, %v291_v5  ;;  %v392_v19 = vpack.c.bf16 %v374_v8, %v373_v7  ;;  %v345_v20 = vadd.f32 %v1057_v9, %v306_v10  ;;  %v346_v21 = vadd.f32 %v1057_v9, %v307_v11 }
  0x2c   : > { %v385_v22 = vpack.c.bf16 %v360_v13, %v359_v12  ;;  %v393_v23 = vpack.c.bf16 %v376_v15, %v375_v14  ;;  %v361_v6 = vmax.f32 %v329_v17, 0.0 }
  0x2d   : > { %v362_v24 = vmax.f32 %v330_v18, 0.0  ;;  %v377_v25 = vmax.f32 %v345_v20, 0.0  ;;  %v378_v26 = vmax.f32 %v346_v21, 0.0 }
  0x2e   : > { %918 = vmatmul.mubr.bf16.gmra.mrb[4].mxu0 %v382_v46  ;;  %934 = vmatmul.mubr.bf16.gmra.mrb[4].mxu1 %v390_v59 }
  0x2f   : > { %921 = vmatprep.mubr.bf16.mxu0 %v383_v62  ;;  %937 = vmatprep.mubr.bf16.mxu1 %v391_v63  ;;  %v386_v27 = vpack.c.bf16 %v362_v24, %v361_v6  ;;  %v394_v28 = vpack.c.bf16 %v378_v26, %v377_v25 }
  0x36   : > { %922 = vmatmul.mubr.bf16.gmra.mrb[8].mxu0 %v384_v16  ;;  %938 = vmatmul.mubr.bf16.gmra.mrb[8].mxu1 %v392_v19 }
  0x37   : > { %925 = vmatprep.mubr.bf16.mxu0 %v385_v22  ;;  %941 = vmatprep.mubr.bf16.mxu1 %v393_v23 }
  0x3e   : > { %926 = vmatmul.mubr.bf16.gmra.mrb[12].mxu0 %v386_v27  ;;  %942 = vmatmul.mubr.bf16.gmra.mrb[12].mxu1 %v394_v28 }
  0xf9   : > { %v915_v9 = vpop.f32.mrb[0].mxu0  ;;  %v1190_v29 = vpop.f32.mrb[0].mxu1 }
  0xfa   : > { %622 = vst [vmem:[%s1188_s23 + $0x10] sm:$0xff] %v915_v9  ;;  %v493_v30 = vpop.f32.mrb[1].mxu0  ;;  %638 = vst [vmem:[%s1188_s23 + $0x90] sm:$0xff] %v1190_v29  ;;  %v1195_v31 = vpop.f32.mrb[1].mxu1  ;;  %v691_v40 = vmul.f32 %v915_v9, %v915_v9 }
  0xfb   : > { %620 = vst [vmem:[%s1188_s23] sm:$0xff] %v493_v30  ;;  %v916_v32 = vpop.f32.mrb[2].mxu0  ;;  %636 = vst [vmem:[%s1188_s23 + $0x80] sm:$0xff] %v1195_v31  ;;  %v1200_v33 = vpop.f32.mrb[2].mxu1  ;;  %v689_v36 = vmul.f32 %v493_v30, %v493_v30 }
  0xfc   : > { %623 = vst [vmem:[%s1188_s23 + $0x18] sm:$0xff] %v916_v32  ;;  %v496_v34 = vpop.f32.mrb[3].mxu0  ;;  %639 = vst [vmem:[%s1188_s23 + $0x98] sm:$0xff] %v1200_v33  ;;  %v1205_v35 = vpop.f32.mrb[3].mxu1  ;;  %v692_v43 = vmul.f32 %v916_v32, %v916_v32 }
  0xfd   : > { %621 = vst [vmem:[%s1188_s23 + $0x8] sm:$0xff] %v496_v34  ;;  %v652_v37 = vadd.f32 %v496_v34, %v493_v30  ;;  %v690_v38 = vmul.f32 %v496_v34, %v496_v34  ;;  %637 = vst [vmem:[%s1188_s23 + $0x88] sm:$0xff] %v1205_v35 }
  0xff   : > { %v653_v41 = vadd.f32 %v915_v9, %v652_v37  ;;  %v721_v42 = vadd.f32 %v690_v38, %v689_v36 }
 0x101   : > { %v722_v44 = vadd.f32 %v721_v42, %v691_v40  ;;  %v919_v45 = vpop.f32.mrb[4].mxu0  ;;  %v654_v47 = vadd.f32 %v916_v32, %v653_v41  ;;  %v1210_v48 = vpop.f32.mrb[4].mxu1 }
 0x102   : > { %626 = vst [vmem:[%s1188_s23 + $0x30] sm:$0xff] %v919_v45  ;;  %v509_v49 = vpop.f32.mrb[5].mxu0  ;;  %642 = vst [vmem:[%s1188_s23 + $0xb0] sm:$0xff] %v1210_v48  ;;  %v1215_v50 = vpop.f32.mrb[5].mxu1  ;;  %v695_v61 = vmul.f32 %v919_v45, %v919_v45 }
 0x103   : > { %624 = vst [vmem:[%s1188_s23 + $0x20] sm:$0xff] %v509_v49  ;;  %v655_v51 = vadd.f32 %v654_v47, %v509_v49  ;;  %v693_v46 = vmul.f32 %v509_v49, %v509_v49  ;;  %v723_v52 = vadd.f32 %v722_v44, %v692_v43  ;;  %v920_v53 = vpop.f32.mrb[6].mxu0  ;;  %640 = vst [vmem:[%s1188_s23 + $0xa0] sm:$0xff] %v1215_v50  ;;  %v1220_v54 = vpop.f32.mrb[6].mxu1 }
 0x104   : > { %627 = vst [vmem:[%s1188_s23 + $0x38] sm:$0xff] %v920_v53  ;;  %v512_v55 = vpop.f32.mrb[7].mxu0  ;;  %643 = vst [vmem:[%s1188_s23 + $0xb8] sm:$0xff] %v1220_v54  ;;  %v1225_v56 = vpop.f32.mrb[7].mxu1  ;;  %v696_v39 = vmul.f32 %v920_v53, %v920_v53  ;;  %v705_v47 = vmul.f32 %v1195_v31, %v1195_v31 }
 0x105   : > { %v724_v58 = vadd.f32 %v723_v52, %v693_v46  ;;  %625 = vst [vmem:[%s1188_s23 + $0x28] sm:$0xff] %v512_v55  ;;  %v656_v59 = vadd.f32 %v655_v51, %v512_v55  ;;  %v694_v60 = vmul.f32 %v512_v55, %v512_v55  ;;  %641 = vst [vmem:[%s1188_s23 + $0xa8] sm:$0xff] %v1225_v56 }
 0x106   : > { %v707_v55 = vmul.f32 %v1190_v29, %v1190_v29 }
 0x107   : > { %v657_v62 = vadd.f32 %v919_v45, %v656_v59  ;;  %v725_v63 = vadd.f32 %v724_v58, %v694_v60  ;;  %v708_v60 = vmul.f32 %v1200_v33, %v1200_v33 }
 0x109   : > { %v726_v57 = vadd.f32 %v725_v63, %v695_v61  ;;  %v923_v0 = vpop.f32.mrb[8].mxu0  ;;  %v658_v1 = vadd.f32 %v920_v53, %v657_v62  ;;  %v1230_v2 = vpop.f32.mrb[8].mxu1  ;;  %v706_v53 = vmul.f32 %v1205_v35, %v1205_v35 }
 0x10a   : > { %630 = vst [vmem:[%s1188_s23 + $0x50] sm:$0xff] %v923_v0  ;;  %v525_v3 = vpop.f32.mrb[9].mxu0  ;;  %646 = vst [vmem:[%s1188_s23 + $0xd0] sm:$0xff] %v1230_v2  ;;  %v1235_v4 = vpop.f32.mrb[9].mxu1  ;;  %v699_v17 = vmul.f32 %v923_v0, %v923_v0 }
 0x10b   : > { %628 = vst [vmem:[%s1188_s23 + $0x40] sm:$0xff] %v525_v3  ;;  %v659_v5 = vadd.f32 %v658_v1, %v525_v3  ;;  %v697_v7 = vmul.f32 %v525_v3, %v525_v3  ;;  %v727_v8 = vadd.f32 %v726_v57, %v696_v39  ;;  %v924_v10 = vpop.f32.mrb[10].mxu0  ;;  %644 = vst [vmem:[%s1188_s23 + $0xc0] sm:$0xff] %v1235_v4  ;;  %v1240_v11 = vpop.f32.mrb[10].mxu1 }
 0x10c   : > { %631 = vst [vmem:[%s1188_s23 + $0x58] sm:$0xff] %v924_v10  ;;  %v528_v12 = vpop.f32.mrb[11].mxu0  ;;  %647 = vst [vmem:[%s1188_s23 + $0xd8] sm:$0xff] %v1240_v11  ;;  %v1245_v13 = vpop.f32.mrb[11].mxu1  ;;  %v700_v20 = vmul.f32 %v924_v10, %v924_v10 }
 0x10d   : > { %v728_v14 = vadd.f32 %v727_v8, %v697_v7  ;;  %629 = vst [vmem:[%s1188_s23 + $0x48] sm:$0xff] %v528_v12  ;;  %v660_v15 = vadd.f32 %v659_v5, %v528_v12  ;;  %v698_v16 = vmul.f32 %v528_v12, %v528_v12  ;;  %645 = vst [vmem:[%s1188_s23 + $0xc8] sm:$0xff] %v1245_v13 }
 0x10f   : > { %v661_v18 = vadd.f32 %v923_v0, %v660_v15  ;;  %v729_v19 = vadd.f32 %v728_v14, %v698_v16  ;;  %v710_v0 = vmul.f32 %v1225_v56, %v1225_v56  ;;  %v714_v14 = vmul.f32 %v1245_v13, %v1245_v13 }
 0x111   : > { %v730_v21 = vadd.f32 %v729_v19, %v699_v17  ;;  %v927_v22 = vpop.f32.mrb[12].mxu0  ;;  %v662_v23 = vadd.f32 %v924_v10, %v661_v18  ;;  %v1250_v6 = vpop.f32.mrb[12].mxu1 }
 0x112   : > { %634 = vst [vmem:[%s1188_s23 + $0x70] sm:$0xff] %v927_v22  ;;  %v541_v24 = vpop.f32.mrb[13].mxu0  ;;  %650 = vst [vmem:[%s1188_s23 + $0xf0] sm:$0xff] %v1250_v6  ;;  %v605_v25 = vpop.f32.mrb[13].mxu1  ;;  %v703_v40 = vmul.f32 %v927_v22, %v927_v22 }
 0x113   : > { %632 = vst [vmem:[%s1188_s23 + $0x60] sm:$0xff] %v541_v24  ;;  %v663_v26 = vadd.f32 %v662_v23, %v541_v24  ;;  %v701_v27 = vmul.f32 %v541_v24, %v541_v24  ;;  %v731_v28 = vadd.f32 %v730_v21, %v700_v20  ;;  %v928_v9 = vpop.f32.mrb[14].mxu0  ;;  %648 = vst [vmem:[%s1188_s23 + $0xe0] sm:$0xff] %v605_v25  ;;  %v944_v30 = vpop.f32.mrb[14].mxu1 }
 0x114   : > { %635 = vst [vmem:[%s1188_s23 + $0x78] sm:$0xff] %v928_v9  ;;  %v544_v32 = vpop.f32.mrb[15].mxu0  ;;  %651 = vst [vmem:[%s1188_s23 + $0xf8] sm:$0xff] %v944_v30  ;;  %v608_v34 = vpop.f32.mrb[15].mxu1  ;;  %v704_v43 = vmul.f32 %v928_v9, %v928_v9 }
 0x115   : > { %v732_v36 = vadd.f32 %v731_v28, %v701_v27  ;;  %633 = vst [vmem:[%s1188_s23 + $0x68] sm:$0xff] %v544_v32  ;;  %v664_v37 = vadd.f32 %v663_v26, %v544_v32  ;;  %v702_v38 = vmul.f32 %v544_v32, %v544_v32  ;;  %649 = vst [vmem:[%s1188_s23 + $0xe8] sm:$0xff] %v608_v34 }
 0x116   : > { %v718_v23 = vmul.f32 %v608_v34, %v608_v34  ;;  %v720_v26 = vmul.f32 %v944_v30, %v944_v30 }
 0x117   : > { %v665_v41 = vadd.f32 %v927_v22, %v664_v37  ;;  %v733_v42 = vadd.f32 %v732_v36, %v702_v38 }
 0x119   : > { %v734_v44 = vadd.f32 %v733_v42, %v703_v40  ;;  %v666_v45 = vadd.f32 %v928_v9, %v665_v41 }
 0x11b   : > { %v667_v49 = vadd.f32 %v666_v45, %v1195_v31  ;;  %v735_v51 = vadd.f32 %v734_v44, %v704_v43  ;;  %v709_v31 = vmul.f32 %v1215_v50, %v1215_v50 }
 0x11d   : > { %v736_v46 = vadd.f32 %v735_v51, %v705_v47  ;;  %v668_v52 = vadd.f32 %v667_v49, %v1205_v35 }
 0x11f   : > { %v669_v58 = vadd.f32 %v1190_v29, %v668_v52  ;;  %v737_v59 = vadd.f32 %v736_v46, %v706_v53  ;;  %v711_v29 = vmul.f32 %v1210_v48, %v1210_v48 }
 0x121   : > { %v738_v61 = vadd.f32 %v737_v59, %v707_v55  ;;  %v670_v62 = vadd.f32 %v1200_v33, %v669_v58  ;;  %v712_v33 = vmul.f32 %v1220_v54, %v1220_v54 }
 0x123   : > { %v671_v63 = vadd.f32 %v670_v62, %v1215_v50  ;;  %v739_v39 = vadd.f32 %v738_v61, %v708_v60  ;;  %v713_v50 = vmul.f32 %v1235_v4, %v1235_v4 }
 0x125   : > { %v740_v57 = vadd.f32 %v739_v39, %v709_v31  ;;  %v672_v35 = vadd.f32 %v671_v63, %v1225_v56 }
 0x127   : > { %v673_v1 = vadd.f32 %v1210_v48, %v672_v35  ;;  %v741_v3 = vadd.f32 %v740_v57, %v710_v0  ;;  %v715_v48 = vmul.f32 %v1230_v2, %v1230_v2 }
 0x129   : > { %v742_v5 = vadd.f32 %v741_v3, %v711_v29  ;;  %v674_v7 = vadd.f32 %v1220_v54, %v673_v1  ;;  %v716_v54 = vmul.f32 %v1240_v11, %v1240_v11 }
 0x12b   : > { %v675_v8 = vadd.f32 %v674_v7, %v1235_v4  ;;  %v743_v10 = vadd.f32 %v742_v5, %v712_v33  ;;  %v717_v4 = vmul.f32 %v605_v25, %v605_v25 }
 0x12d   : > { %v744_v12 = vadd.f32 %v743_v10, %v713_v50  ;;  %v676_v56 = vadd.f32 %v675_v8, %v1245_v13  ;;  %v719_v13 = vmul.f32 %v1250_v6, %v1250_v6 }
 0x12f   : > { %v677_v15 = vadd.f32 %v1230_v2, %v676_v56  ;;  %v745_v16 = vadd.f32 %v744_v12, %v714_v14 }
 0x131   : > { %v746_v17 = vadd.f32 %v745_v16, %v715_v48  ;;  %v678_v18 = vadd.f32 %v1240_v11, %v677_v15 }
 0x133   : > { %v679_v19 = vadd.f32 %v678_v18, %v605_v25  ;;  %v747_v20 = vadd.f32 %v746_v17, %v716_v54 }
 0x135   : > { %v748_v21 = vadd.f32 %v747_v20, %v717_v4  ;;  %v680_v22 = vadd.f32 %v679_v19, %v608_v34 }
 0x137   : > { %v681_v24 = vadd.f32 %v1250_v6, %v680_v22  ;;  %v749_v2 = vadd.f32 %v748_v21, %v718_v23 }
 0x139   : > { %v682_v27 = vadd.f32 %v944_v30, %v681_v24  ;;  %v750_v28 = vadd.f32 %v749_v2, %v719_v13 }
 0x13b   : > { %v683_v9 = vrot.slane %v682_v27, 4  ;;  %v751_v32 = vadd.f32 %v750_v28, %v720_v26 }
 0x13d   : > { %v684_v36 = vadd.f32 %v683_v9, %v682_v27  ;;  %v752_v11 = vrot.slane %v751_v32, 4 }
 0x13f   : > { %v685_v37 = vrot.slane %v684_v36, 2  ;;  %v753_v25 = vadd.f32 %v752_v11, %v751_v32 }
 0x141   : > { %v686_v38 = vadd.f32 %v685_v37, %v684_v36  ;;  %v754_v40 = vrot.slane %v753_v25, 2 }
 0x143   : > { %v687_v41 = vrot.slane %v686_v38, 1  ;;  %v755_v34 = vadd.f32 %v754_v40, %v753_v25 }
 0x145   : > { %v756_v42 = vrot.slane %v755_v34, 1  ;;  %v688_v43 = vadd.f32 %v687_v41, %v686_v38 }
 0x147   : > { %v757_v44 = vadd.f32 %v756_v42, %v755_v34 }
 0x149   : > { %v759_v6 = vsel %vm758_vm0, %v688_v43, %v757_v44 }
 0x14a   : > { %v761_v30 = vsel %vm760_vm1, %v759_v6, 0.0 }
 0x14b   : > { %762 = vst [vmem:[%s235_s27] sm:$0xff] %v761_v30 }
 0x14c PF: > { %s16_s18 = sadd.s32 1, %s983_s18  }
 0x14d   : > { %p13_p4 = scmp.ge.s32.totalorder %s16_s18, 4  }
 0x14f   :  { %15 = sbr.rel (!%p13_p4) target bundleno = 1 (0x1), region = 78 }

// kernel: bottleneck_forward.7
= control target key start
LH: loop header
LB: loop body
LE: loop exit
PB: predicated region body
PF: predicated region fallthrough
CT: control target
= control target key end

     0   :  { %s810_s21 = smov 0   ;;  %s1161_s0 = inlined_call_operand.vmem [shape: f32[2,256,128], index: 0, kind: input, shape index: {}]   ;;  %s1162_s1 = inlined_call_operand.vmem [shape: f32[2,256,128], index: 1, kind: input, shape index: {}]   ;;  %s1163_s2 = inlined_call_operand.vmem [shape: f32[1,128], index: 2, kind: input, shape index: {}]   ;;  %s1164_s3 = inlined_call_operand.vmem [shape: f32[1,128], index: 3, kind: input, shape index: {}]   ;;  %s1165_s4 = inlined_call_operand.vmem [shape: f32[1,128], index: 4, kind: input, shape index: {}]   ;;  %s1166_s5 = inlined_call_operand.vmem [shape: f32[1,128], index: 5, kind: input, shape index: {}]   ;;  %s1167_s6 = inlined_call_operand.vmem [shape: f32[2,18,18,128], index: 6, kind: output, shape index: {}]  }
   0x1 LB: > { %s707_s22 = sadd.s32 4294967295, %s773_s21   ;;  %p711_p0 = scmp.ge.s32.totalorder %s773_s21, 1  ;;  %s773_s21 = sphi %s810_s21, %s16_s21  }
   0x2   : > { %p222_p1 = scmp.lt.s32.totalorder %s773_s21, 3 }
   0x4   : > { %p223_p2 = pnand %p711_p0, %p222_p1 }
   0x5   : > { %p257_p3 = scmp.lt.s32.totalorder (!%p223_p2), %s707_s22, 1  ;;  %v343_v0 = vld [vmem:[%s1164_s3] sm:$0x1] (!%p223_p2)  ;;  %v345_v1 = vlaneseq (!%p223_p2) }
   0x6   : > { %226 = sbr.rel (%p223_p2) target bundleno = 75 (0x4b), region = 44  ;;  %v453_v2 = vld [vmem:[%s1166_s5] sm:$0x1] (!%p223_p2) }
   0x7   : > { %v556_v3 = vadd.f32 (!%p223_p2), %v453_v2, %v343_v0  ;;  %v346_v4 = vshrl.u32 (!%p223_p2), %v345_v1, 7  ;;  %v829_v6 = vld [vmem:[%s1163_s2] ss:$0 sm:$0xff] (!%p223_p2) }
   0x8   : > { %v834_v8 = vld [vmem:[%s1165_s4] ss:$0 sm:$0xff] (!%p223_p2) }
   0x9   : > { %v824_v5 = vmax.f32 (!%p223_p2), %v556_v3, 0.0  ;;  %v347_v7 = vsub.s32 (!%p223_p2), 0, %v346_v4 }
   0xb   : > { %v851_v9 = vrot.slane (!%p223_p2), %v343_v0, %v347_v7  ;;  %v853_v10 = vrot.slane (!%p223_p2), %v453_v2, %v347_v7  ;;  %v562_v11 = vrot.slane (!%p223_p2), %v824_v5, %v347_v7 }
   0xd   : > { %s1169_s22 = smov (!%p257_p3, %s707_s22), 1 }
   0xe   : > { %s758_s29 = smul.u32 432, %s1169_s22  ;;  %s756_s30 = sshll.u32 %s1169_s22, 8 }
   0xf   : > { %s839_s11 = scalar_lea.vmem %s1161_s0, %s756_s30  ;;  %s844_s14 = scalar_lea.vmem %s1162_s1, %s756_s30 }
  0x10   : > { %s849_s17 = scalar_lea.vmem %s1167_s6, %s758_s29  ;;  %v272_v12 = vld [vmem:[%s839_s11] sm:$0xff]  ;;  %v273_v14 = vld [vmem:[%s839_s11 + $0x8] sm:$0xff]  ;;  %v274_v19 = vld [vmem:[%s839_s11 + $0x10] sm:$0xff] }
  0x11   : > { %v382_v13 = vld [vmem:[%s844_s14] sm:$0xff]  ;;  %572 = vst [vmem:[%s849_s17 + $0x18] sm:$0x1] %v824_v5  ;;  %573 = vst [vmem:[%s849_s17 + $0x30] sm:$0x1] %v824_v5  ;;  %v311_v15 = vmul.f32 %v829_v6, %v272_v12  ;;  %v312_v17 = vmul.f32 %v829_v6, %v273_v14  ;;  %v383_v18 = vld [vmem:[%s844_s14 + $0x8] sm:$0xff]  ;;  %v313_v22 = vmul.f32 %v829_v6, %v274_v19 }
  0x12   : > { %574 = vst [vmem:[%s849_s17 + $0x48] sm:$0x1] %v824_v5  ;;  %575 = vst [vmem:[%s849_s17 + $0x60] sm:$0x1] %v824_v5  ;;  %v421_v16 = vmul.f32 %v834_v8, %v382_v13  ;;  %v384_v20 = vld [vmem:[%s844_s14 + $0x10] sm:$0xff]  ;;  %v422_v21 = vmul.f32 %v834_v8, %v383_v18  ;;  %v275_v24 = vld [vmem:[%s839_s11 + $0x18] sm:$0xff] }
  0x13   : > { %576 = vst [vmem:[%s849_s17 + $0x78] sm:$0x1] %v824_v5  ;;  %577 = vst [vmem:[%s849_s17 + $0x90] sm:$0x1] %v824_v5  ;;  %v423_v23 = vmul.f32 %v834_v8, %v384_v20  ;;  %v385_v25 = vld [vmem:[%s844_s14 + $0x18] sm:$0xff]  ;;  %v276_v26 = vld [vmem:[%s839_s11 + $0x20] sm:$0xff]  ;;  %v350_v27 = vadd.f32 %v851_v9, %v311_v15  ;;  %v351_v29 = vadd.f32 %v851_v9, %v312_v17 }
  0x14   : > { %578 = vst [vmem:[%s849_s17 + $0xa8] sm:$0x1] %v824_v5  ;;  %579 = vst [vmem:[%s849_s17 + $0xc0] sm:$0x1] %v824_v5  ;;  %v460_v28 = vadd.f32 %v853_v10, %v421_v16  ;;  %v314_v30 = vmul.f32 %v829_v6, %v275_v24  ;;  %v386_v31 = vld [vmem:[%s844_s14 + $0x20] sm:$0xff]  ;;  %v277_v32 = vld [vmem:[%s839_s11 + $0x28] sm:$0xff]  ;;  %v461_v33 = vadd.f32 %v853_v10, %v422_v21 }
  0x15   : > { %580 = vst [vmem:[%s849_s17 + $0xd8] sm:$0x1] %v824_v5  ;;  %581 = vst [vmem:[%s849_s17 + $0xf0] sm:$0x1] %v824_v5  ;;  %v352_v34 = vadd.f32 %v851_v9, %v313_v22  ;;  %v462_v35 = vadd.f32 %v853_v10, %v423_v23  ;;  %v424_v36 = vmul.f32 %v834_v8, %v385_v25  ;;  %v387_v37 = vld [vmem:[%s844_s14 + $0x28] sm:$0xff]  ;;  %v278_v46 = vld [vmem:[%s839_s11 + $0x30] sm:$0xff] }
  0x16   : > { %582 = vst [vmem:[%s849_s17 + $0x108] sm:$0x1] %v824_v5  ;;  %583 = vst [vmem:[%s849_s17 + $0x120] sm:$0x1] %v824_v5  ;;  %v492_v38 = vadd.f32 %v460_v28, %v350_v27  ;;  %v353_v39 = vadd.f32 %v851_v9, %v314_v30  ;;  %v315_v40 = vmul.f32 %v829_v6, %v276_v26  ;;  %v388_v47 = vld [vmem:[%s844_s14 + $0x30] sm:$0xff]  ;;  %v279_v52 = vld [vmem:[%s839_s11 + $0x38] sm:$0xff] }
  0x17   : > { %584 = vst [vmem:[%s849_s17 + $0x138] sm:$0x1] %v824_v5  ;;  %585 = vst [vmem:[%s849_s17 + $0x150] sm:$0x1] %v824_v5  ;;  %v425_v41 = vmul.f32 %v834_v8, %v386_v31  ;;  %v493_v42 = vadd.f32 %v461_v33, %v351_v29  ;;  %v494_v43 = vadd.f32 %v462_v35, %v352_v34  ;;  %v389_v53 = vld [vmem:[%s844_s14 + $0x38] sm:$0xff]  ;;  %v280_v54 = vld [vmem:[%s839_s11 + $0x40] sm:$0xff] }
  0x18   : > { %586 = vst [vmem:[%s849_s17 + $0x168] sm:$0x1] %v824_v5  ;;  %587 = vst [vmem:[%s849_s17 + $0x180] sm:$0x1] %v824_v5  ;;  %v463_v44 = vadd.f32 %v853_v10, %v424_v36  ;;  %v316_v45 = vmul.f32 %v829_v6, %v277_v32  ;;  %v524_v48 = vmax.f32 %v492_v38, 0.0  ;;  %v354_v49 = vadd.f32 %v851_v9, %v315_v40  ;;  %v390_v63 = vld [vmem:[%s844_s14 + $0x40] sm:$0xff] }
  0x19   : > { %590 = vst [vmem:[%s849_s17 + $0x29] sm:$0x1] %v824_v5  ;;  %591 = vst [vmem:[%s849_s17 + $0x41] sm:$0x1] %v824_v5  ;;  %v464_v50 = vadd.f32 %v853_v10, %v425_v41  ;;  %v426_v51 = vmul.f32 %v834_v8, %v387_v37  ;;  %v525_v55 = vmax.f32 %v493_v42, 0.0  ;;  %v526_v56 = vmax.f32 %v494_v43, 0.0 }
  0x1a   : > { %592 = vst [vmem:[%s849_s17 + $0x59] sm:$0x1] %v824_v5  ;;  %593 = vst [vmem:[%s849_s17 + $0x71] sm:$0x1] %v824_v5  ;;  %v495_v57 = vadd.f32 %v463_v44, %v353_v39  ;;  %v355_v58 = vadd.f32 %v851_v9, %v316_v45  ;;  %v317_v61 = vmul.f32 %v829_v6, %v278_v46  ;;  %v281_v4 = vld [vmem:[%s839_s11 + $0x48] sm:$0xff]  ;;  %v282_v14 = vld [vmem:[%s839_s11 + $0x50] sm:$0xff] }
  0x1b   : > { %594 = vst [vmem:[%s849_s17 + $0x89] sm:$0x1] %v824_v5  ;;  %595 = vst [vmem:[%s849_s17 + $0xa1] sm:$0x1] %v824_v5  ;;  %v496_v59 = vadd.f32 %v464_v50, %v354_v49  ;;  %v465_v60 = vadd.f32 %v853_v10, %v426_v51  ;;  %v427_v62 = vmul.f32 %v834_v8, %v388_v47  ;;  %v392_v15 = vld [vmem:[%s844_s14 + $0x50] sm:$0xff]  ;;  %v283_v20 = vld [vmem:[%s839_s11 + $0x58] sm:$0xff] }
  0x1c   : > { %596 = vst [vmem:[%s849_s17 + $0xb9] sm:$0x1] %v824_v5  ;;  %597 = vst [vmem:[%s849_s17 + $0xd1] sm:$0x1] %v824_v5  ;;  %v527_v0 = vmax.f32 %v495_v57, 0.0  ;;  %v318_v1 = vmul.f32 %v829_v6, %v279_v52  ;;  %v428_v2 = vmul.f32 %v834_v8, %v389_v53  ;;  %v319_v3 = vmul.f32 %v829_v6, %v280_v54  ;;  %v393_v29 = vld [vmem:[%s844_s14 + $0x58] sm:$0xff] }
  0x1d   : > { %598 = vst [vmem:[%s849_s17 + $0xe9] sm:$0x1] %v824_v5  ;;  %599 = vst [vmem:[%s849_s17 + $0x101] sm:$0x1] %v824_v5  ;;  %v528_v7 = vmax.f32 %v496_v59, 0.0  ;;  %v356_v12 = vadd.f32 %v851_v9, %v317_v61  ;;  %v466_v13 = vadd.f32 %v853_v10, %v427_v62  ;;  %v429_v19 = vmul.f32 %v834_v8, %v390_v63  ;;  %v284_v30 = vld [vmem:[%s839_s11 + $0x60] sm:$0xff] }
  0x1e   : > { %600 = vst [vmem:[%s849_s17 + $0x119] sm:$0x1] %v824_v5  ;;  %601 = vst [vmem:[%s849_s17 + $0x131] sm:$0x1] %v824_v5  ;;  %v357_v16 = vadd.f32 %v851_v9, %v318_v1  ;;  %v467_v17 = vadd.f32 %v853_v10, %v428_v2  ;;  %v358_v18 = vadd.f32 %v851_v9, %v319_v3  ;;  %v394_v35 = vld [vmem:[%s844_s14 + $0x60] sm:$0xff]  ;;  %v285_v36 = vld [vmem:[%s839_s11 + $0x68] sm:$0xff] }
  0x1f   : > { %602 = vst [vmem:[%s849_s17 + $0x149] sm:$0x1] %v824_v5  ;;  %603 = vst [vmem:[%s849_s17 + $0x161] sm:$0x1] %v824_v5  ;;  %v498_v22 = vadd.f32 %v466_v13, %v356_v12  ;;  %v320_v23 = vmul.f32 %v829_v6, %v281_v4  ;;  %v468_v26 = vadd.f32 %v853_v10, %v429_v19  ;;  %v395_v41 = vld [vmem:[%s844_s14 + $0x68] sm:$0xff]  ;;  %v286_v46 = vld [vmem:[%s839_s11 + $0x70] sm:$0xff] }
  0x20   : > { %604 = vst [vmem:[%s849_s17 + $0x179] sm:$0x1] %v824_v5  ;;  %605 = vst [vmem:[%s849_s17 + $0x191] sm:$0x1] %v824_v5  ;;  %v499_v25 = vadd.f32 %v467_v17, %v357_v16  ;;  %v321_v27 = vmul.f32 %v829_v6, %v282_v14  ;;  %v431_v28 = vmul.f32 %v834_v8, %v392_v15  ;;  %v396_v51 = vld [vmem:[%s844_s14 + $0x70] sm:$0xff]  ;;  %v287_v52 = vld [vmem:[%s839_s11 + $0x78] sm:$0xff] }
  0x21   : > { %564 = vst [vmem:[%s849_s17] sm:$0xff] %v562_v11  ;;  %565 = vst [vmem:[%s849_s17 + $0x8] sm:$0xff] %v562_v11  ;;  %v530_v31 = vmax.f32 %v498_v22, 0.0  ;;  %v359_v32 = vadd.f32 %v851_v9, %v320_v23  ;;  %v322_v34 = vmul.f32 %v829_v6, %v283_v20  ;;  %v500_v38 = vadd.f32 %v468_v26, %v358_v18  ;;  %v397_v57 = vld [vmem:[%s844_s14 + $0x78] sm:$0xff]  ;;  %v398_v3 = vld [vmem:[%s844_s14 + $0x80] sm:$0xff] }
  0x22   : > { %566 = vst [vmem:[%s849_s17 + $0x10] sm:$0x3] %v562_v11  ;;  %719 = vst [vmem:[%s849_s17 + $0x198] sm:$0xff] %v562_v11  ;;  %v531_v37 = vmax.f32 %v499_v25, 0.0  ;;  %v360_v39 = vadd.f32 %v851_v9, %v321_v27  ;;  %v470_v40 = vadd.f32 %v853_v10, %v431_v28  ;;  %v432_v44 = vmul.f32 %v834_v8, %v393_v29  ;;  %v289_v12 = vld [vmem:[%s839_s11 + $0x88] sm:$0xff]  ;;  %v290_v18 = vld [vmem:[%s839_s11 + $0x90] sm:$0xff] }
  0x23   : > { %720 = vst [vmem:[%s849_s17 + $0x1a0] sm:$0xff] %v562_v11  ;;  %721 = vst [vmem:[%s849_s17 + $0x1a8] sm:$0x3] %v562_v11  ;;  %v497_v11 = vadd.f32 %v465_v60, %v355_v58  ;;  %v361_v43 = vadd.f32 %v851_v9, %v322_v34  ;;  %v323_v45 = vmul.f32 %v829_v6, %v284_v30  ;;  %v532_v47 = vmax.f32 %v500_v38, 0.0  ;;  %v288_v58 = vld [vmem:[%s839_s11 + $0x80] sm:$0xff]  ;;  %v399_v13 = vld [vmem:[%s844_s14 + $0x88] sm:$0xff] }
  0x24   : > { %571 = vst [vmem:[%s849_s17] sm:$0x1] %v824_v5  ;;  %588 = vst [vmem:[%s849_s17 + $0x198] sm:$0x1] %v824_v5  ;;  %v433_v49 = vmul.f32 %v834_v8, %v394_v35  ;;  %v324_v50 = vmul.f32 %v829_v6, %v285_v36  ;;  %v471_v54 = vadd.f32 %v853_v10, %v432_v44  ;;  %v400_v19 = vld [vmem:[%s844_s14 + $0x90] sm:$0xff]  ;;  %v292_v34 = vld [vmem:[%s839_s11 + $0xa0] sm:$0xff] }
  0x25   : > { %589 = vst [vmem:[%s849_s17 + $0x11] sm:$0x1] %v824_v5  ;;  %606 = vst [vmem:[%s849_s17 + $0x1a9] sm:$0x1] %v824_v5  ;;  %v391_v5 = vld [vmem:[%s844_s14 + $0x48] sm:$0xff]  ;;  %v529_v21 = vmax.f32 %v497_v11, 0.0  ;;  %v325_v62 = vmul.f32 %v829_v6, %v286_v46  ;;  %v435_v1 = vmul.f32 %v834_v8, %v396_v51  ;;  %v326_v2 = vmul.f32 %v829_v6, %v287_v52 }
  0x26   : > { %722 = vst [vmem:[%s849_s17 + $0x19] sm:$0xff] %v524_v48  ;;  %723 = vst [vmem:[%s849_s17 + $0x21] sm:$0xff] %v525_v55  ;;  %v430_v24 = vmul.f32 %v834_v8, %v391_v5  ;;  %v502_v48 = vadd.f32 %v470_v40, %v360_v39  ;;  %v362_v55 = vadd.f32 %v851_v9, %v323_v45  ;;  %v402_v39 = vld [vmem:[%s844_s14 + $0xa0] sm:$0xff]  ;;  %v293_v40 = vld [vmem:[%s839_s11 + $0xa8] sm:$0xff] }
  0x27   : > { %724 = vst [vmem:[%s849_s17 + $0x31] sm:$0xff] %v526_v56  ;;  %725 = vst [vmem:[%s849_s17 + $0x39] sm:$0xff] %v527_v0  ;;  %v434_v56 = vmul.f32 %v834_v8, %v395_v41  ;;  %v472_v60 = vadd.f32 %v853_v10, %v433_v49  ;;  %v363_v61 = vadd.f32 %v851_v9, %v324_v50  ;;  %v403_v45 = vld [vmem:[%s844_s14 + $0xa8] sm:$0xff]  ;;  %v294_v50 = vld [vmem:[%s839_s11 + $0xb0] sm:$0xff] }
  0x28   : > { %726 = vst [vmem:[%s849_s17 + $0x49] sm:$0xff] %v528_v7  ;;  %727 = vst [vmem:[%s849_s17 + $0x51] sm:$0xff] %v529_v21  ;;  %v469_v33 = vadd.f32 %v853_v10, %v430_v24  ;;  %v534_v59 = vmax.f32 %v502_v48, 0.0  ;;  %v503_v63 = vadd.f32 %v471_v54, %v361_v43  ;;  %v364_v5 = vadd.f32 %v851_v9, %v325_v62  ;;  %v291_v24 = vld [vmem:[%s839_s11 + $0x98] sm:$0xff]  ;;  %v296_v62 = vld [vmem:[%s839_s11 + $0xc0] sm:$0xff] }
  0x29   : > { %728 = vst [vmem:[%s849_s17 + $0x61] sm:$0xff] %v530_v31  ;;  %729 = vst [vmem:[%s849_s17 + $0x69] sm:$0xff] %v531_v37  ;;  %v473_v0 = vadd.f32 %v853_v10, %v434_v56  ;;  %v504_v4 = vadd.f32 %v472_v60, %v362_v55  ;;  %v436_v7 = vmul.f32 %v834_v8, %v397_v57  ;;  %v404_v55 = vld [vmem:[%s844_s14 + $0xb0] sm:$0xff]  ;;  %v295_v56 = vld [vmem:[%s839_s11 + $0xb8] sm:$0xff] }
  0x2a   : > { %v501_v42 = vadd.f32 %v469_v33, %v359_v32  ;;  %730 = vst [vmem:[%s849_s17 + $0x79] sm:$0xff] %v532_v47  ;;  %732 = vst [vmem:[%s849_s17 + $0x91] sm:$0xff] %v534_v59  ;;  %v327_v11 = vmul.f32 %v829_v6, %v288_v58  ;;  %v535_v14 = vmax.f32 %v503_v63, 0.0  ;;  %v474_v16 = vadd.f32 %v853_v10, %v435_v1  ;;  %v401_v33 = vld [vmem:[%s844_s14 + $0x98] sm:$0xff] }
  0x2b   : > { %v505_v15 = vadd.f32 %v473_v0, %v363_v61  ;;  %v365_v17 = vadd.f32 %v851_v9, %v326_v2  ;;  %v536_v20 = vmax.f32 %v504_v4, 0.0  ;;  %v475_v21 = vadd.f32 %v853_v10, %v436_v7  ;;  %v405_v61 = vld [vmem:[%s844_s14 + $0xb8] sm:$0xff] }
  0x2c   : > { %v533_v53 = vmax.f32 %v501_v42, 0.0  ;;  %v366_v22 = vadd.f32 %v851_v9, %v327_v11  ;;  %v437_v23 = vmul.f32 %v834_v8, %v398_v3  ;;  %733 = vst [vmem:[%s849_s17 + $0x99] sm:$0xff] %v535_v14  ;;  %v506_v26 = vadd.f32 %v474_v16, %v364_v5  ;;  %v406_v11 = vld [vmem:[%s844_s14 + $0xc0] sm:$0xff]  ;;  %v297_v16 = vld [vmem:[%s839_s11 + $0xc8] sm:$0xff] }
  0x2d   : > { %v537_v25 = vmax.f32 %v505_v15, 0.0  ;;  %v328_v27 = vmul.f32 %v829_v6, %v289_v12  ;;  %v438_v28 = vmul.f32 %v834_v8, %v399_v13  ;;  %734 = vst [vmem:[%s849_s17 + $0xa9] sm:$0xff] %v536_v20  ;;  %v507_v29 = vadd.f32 %v475_v21, %v365_v17  ;;  %v407_v17 = vld [vmem:[%s844_s14 + $0xc8] sm:$0xff] }
  0x2e   : > { %731 = vst [vmem:[%s849_s17 + $0x81] sm:$0xff] %v533_v53  ;;  %v476_v30 = vadd.f32 %v853_v10, %v437_v23  ;;  %v329_v31 = vmul.f32 %v829_v6, %v290_v18  ;;  %v439_v32 = vmul.f32 %v834_v8, %v400_v19  ;;  %v538_v35 = vmax.f32 %v506_v26, 0.0  ;;  %v408_v23 = vld [vmem:[%s844_s14 + $0xd0] sm:$0xff] }
  0x2f   : > { %735 = vst [vmem:[%s849_s17 + $0xb1] sm:$0xff] %v537_v25  ;;  %v367_v36 = vadd.f32 %v851_v9, %v328_v27  ;;  %v477_v37 = vadd.f32 %v853_v10, %v438_v28  ;;  %v330_v38 = vmul.f32 %v829_v6, %v291_v24  ;;  %v539_v41 = vmax.f32 %v507_v29, 0.0  ;;  %v299_v28 = vld [vmem:[%s839_s11 + $0xd8] sm:$0xff] }
  0x30   : > { %v508_v42 = vadd.f32 %v476_v30, %v366_v22  ;;  %v368_v43 = vadd.f32 %v851_v9, %v329_v31  ;;  %v478_v44 = vadd.f32 %v853_v10, %v439_v32  ;;  %736 = vst [vmem:[%s849_s17 + $0xc1] sm:$0xff] %v538_v35  ;;  %v440_v48 = vmul.f32 %v834_v8, %v401_v33  ;;  %v298_v22 = vld [vmem:[%s839_s11 + $0xd0] sm:$0xff] }
  0x31   : > { %v509_v46 = vadd.f32 %v477_v37, %v367_v36  ;;  %v369_v47 = vadd.f32 %v851_v9, %v330_v38  ;;  %v331_v49 = vmul.f32 %v829_v6, %v292_v34  ;;  %737 = vst [vmem:[%s849_s17 + $0xc9] sm:$0xff] %v539_v41  ;;  %v441_v53 = vmul.f32 %v834_v8, %v402_v39  ;;  %v409_v37 = vld [vmem:[%s844_s14 + $0xd8] sm:$0xff]  ;;  %v300_v38 = vld [vmem:[%s839_s11 + $0xe0] sm:$0xff] }
  0x32   : > { %v540_v51 = vmax.f32 %v508_v42, 0.0  ;;  %v510_v52 = vadd.f32 %v478_v44, %v368_v43  ;;  %v332_v54 = vmul.f32 %v829_v6, %v293_v40  ;;  %v479_v58 = vadd.f32 %v853_v10, %v440_v48  ;;  %v410_v43 = vld [vmem:[%s844_s14 + $0xe0] sm:$0xff]  ;;  %v301_v44 = vld [vmem:[%s839_s11 + $0xe8] sm:$0xff] }
  0x33   : > { %v541_v57 = vmax.f32 %v509_v46, 0.0  ;;  %v370_v59 = vadd.f32 %v851_v9, %v331_v49  ;;  %v442_v60 = vmul.f32 %v834_v8, %v403_v45  ;;  %v480_v0 = vadd.f32 %v853_v10, %v441_v53  ;;  %v411_v49 = vld [vmem:[%s844_s14 + $0xe8] sm:$0xff] }
  0x34   : > { %738 = vst [vmem:[%s849_s17 + $0xd9] sm:$0xff] %v540_v51  ;;  %v542_v63 = vmax.f32 %v510_v52, 0.0  ;;  %v371_v1 = vadd.f32 %v851_v9, %v332_v54  ;;  %v333_v2 = vmul.f32 %v829_v6, %v294_v50  ;;  %v511_v3 = vadd.f32 %v479_v58, %v369_v47  ;;  %v302_v54 = vld [vmem:[%s839_s11 + $0xf0] sm:$0xff] }
  0x35   : > { %739 = vst [vmem:[%s849_s17 + $0xe1] sm:$0xff] %v541_v57  ;;  %v481_v4 = vadd.f32 %v853_v10, %v442_v60  ;;  %v443_v5 = vmul.f32 %v834_v8, %v404_v55  ;;  %v334_v7 = vmul.f32 %v829_v6, %v295_v56  ;;  %v512_v12 = vadd.f32 %v480_v0, %v370_v59  ;;  %v412_v59 = vld [vmem:[%s844_s14 + $0xf0] sm:$0xff]  ;;  %v303_v60 = vld [vmem:[%s839_s11 + $0xf8] sm:$0xff] }
  0x36   : > { %740 = vst [vmem:[%s849_s17 + $0xf1] sm:$0xff] %v542_v63  ;;  %v372_v13 = vadd.f32 %v851_v9, %v333_v2  ;;  %v444_v14 = vmul.f32 %v834_v8, %v405_v61  ;;  %v335_v15 = vmul.f32 %v829_v6, %v296_v62  ;;  %v543_v18 = vmax.f32 %v511_v3, 0.0 }
  0x37   : > { %v513_v19 = vadd.f32 %v481_v4, %v371_v1  ;;  %v482_v20 = vadd.f32 %v853_v10, %v443_v5  ;;  %v373_v21 = vadd.f32 %v851_v9, %v334_v7  ;;  %v544_v24 = vmax.f32 %v512_v12, 0.0  ;;  %v413_v1 = vld [vmem:[%s844_s14 + $0xf8] sm:$0xff] }
  0x38   : > { %v483_v25 = vadd.f32 %v853_v10, %v444_v14  ;;  %v374_v26 = vadd.f32 %v851_v9, %v335_v15  ;;  %v445_v27 = vmul.f32 %v834_v8, %v406_v11  ;;  %741 = vst [vmem:[%s849_s17 + $0xf9] sm:$0xff] %v543_v18  ;;  %v336_v31 = vmul.f32 %v829_v6, %v297_v16 }
  0x39   : > { %v545_v29 = vmax.f32 %v513_v19, 0.0  ;;  %v514_v30 = vadd.f32 %v482_v20, %v372_v13  ;;  %v446_v32 = vmul.f32 %v834_v8, %v407_v17  ;;  %742 = vst [vmem:[%s849_s17 + $0x109] sm:$0xff] %v544_v24  ;;  %v337_v35 = vmul.f32 %v829_v6, %v298_v22 }
  0x3a   : > { %v515_v33 = vadd.f32 %v483_v25, %v373_v21  ;;  %v484_v34 = vadd.f32 %v853_v10, %v445_v27  ;;  %v447_v36 = vmul.f32 %v834_v8, %v408_v23  ;;  %v375_v40 = vadd.f32 %v851_v9, %v336_v31 }
  0x3b   : > { %743 = vst [vmem:[%s849_s17 + $0x111] sm:$0xff] %v545_v29  ;;  %v546_v39 = vmax.f32 %v514_v30, 0.0  ;;  %v485_v41 = vadd.f32 %v853_v10, %v446_v32  ;;  %v338_v42 = vmul.f32 %v829_v6, %v299_v28  ;;  %v376_v47 = vadd.f32 %v851_v9, %v337_v35 }
  0x3c   : > { %v547_v45 = vmax.f32 %v515_v33, 0.0  ;;  %v516_v46 = vadd.f32 %v484_v34, %v374_v26  ;;  %v486_v48 = vadd.f32 %v853_v10, %v447_v36  ;;  %v448_v52 = vmul.f32 %v834_v8, %v409_v37 }
  0x3d   : > { %744 = vst [vmem:[%s849_s17 + $0x121] sm:$0xff] %v546_v39  ;;  %v517_v50 = vadd.f32 %v485_v41, %v375_v40  ;;  %v377_v51 = vadd.f32 %v851_v9, %v338_v42  ;;  %v339_v53 = vmul.f32 %v829_v6, %v300_v38  ;;  %v449_v57 = vmul.f32 %v834_v8, %v410_v43 }
  0x3e   : > { %745 = vst [vmem:[%s849_s17 + $0x129] sm:$0xff] %v547_v45  ;;  %v548_v55 = vmax.f32 %v516_v46, 0.0  ;;  %v518_v56 = vadd.f32 %v486_v48, %v376_v47  ;;  %v340_v58 = vmul.f32 %v829_v6, %v301_v44  ;;  %v487_v62 = vadd.f32 %v853_v10, %v448_v52 }
  0x3f   : > { %v549_v61 = vmax.f32 %v517_v50, 0.0  ;;  %v378_v63 = vadd.f32 %v851_v9, %v339_v53  ;;  %v450_v0 = vmul.f32 %v834_v8, %v411_v49  ;;  %v488_v3 = vadd.f32 %v853_v10, %v449_v57 }
  0x40   : > { %746 = vst [vmem:[%s849_s17 + $0x139] sm:$0xff] %v548_v55  ;;  %v550_v2 = vmax.f32 %v518_v56, 0.0  ;;  %v379_v4 = vadd.f32 %v851_v9, %v340_v58  ;;  %v341_v5 = vmul.f32 %v829_v6, %v302_v54  ;;  %v519_v7 = vadd.f32 %v487_v62, %v377_v51 }
  0x41   : > { %747 = vst [vmem:[%s849_s17 + $0x141] sm:$0xff] %v549_v61  ;;  %v489_v11 = vadd.f32 %v853_v10, %v450_v0  ;;  %v451_v12 = vmul.f32 %v834_v8, %v412_v59  ;;  %v342_v13 = vmul.f32 %v829_v6, %v303_v60  ;;  %v520_v14 = vadd.f32 %v488_v3, %v378_v63 }
  0x42   : > { %748 = vst [vmem:[%s849_s17 + $0x151] sm:$0xff] %v550_v2  ;;  %v380_v15 = vadd.f32 %v851_v9, %v341_v5  ;;  %v452_v16 = vmul.f32 %v834_v8, %v413_v1  ;;  %v551_v17 = vmax.f32 %v519_v7, 0.0 }
  0x43   : > { %v521_v18 = vadd.f32 %v489_v11, %v379_v4  ;;  %v490_v19 = vadd.f32 %v853_v10, %v451_v12  ;;  %v381_v20 = vadd.f32 %v851_v9, %v342_v13  ;;  %v552_v21 = vmax.f32 %v520_v14, 0.0 }
  0x44   : > { %v491_v22 = vadd.f32 %v853_v10, %v452_v16  ;;  %749 = vst [vmem:[%s849_s17 + $0x159] sm:$0xff] %v551_v17 }
  0x45   : > { %v553_v6 = vmax.f32 %v521_v18, 0.0  ;;  %v522_v23 = vadd.f32 %v490_v19, %v380_v15  ;;  %750 = vst [vmem:[%s849_s17 + $0x169] sm:$0xff] %v552_v21 }
  0x46   : > { %v523_v24 = vadd.f32 %v491_v22, %v381_v20 }
  0x47   : > { %751 = vst [vmem:[%s849_s17 + $0x171] sm:$0xff] %v553_v6  ;;  %v554_v25 = vmax.f32 %v522_v23, 0.0 }
  0x48   : > { %v555_v26 = vmax.f32 %v523_v24, 0.0 }
  0x49   : > { %752 = vst [vmem:[%s849_s17 + $0x181] sm:$0xff] %v554_v25 }
  0x4a   : > { %753 = vst [vmem:[%s849_s17 + $0x189] sm:$0xff] %v555_v26 }
  0x4b PF: > { %s16_s21 = sadd.s32 1, %s773_s21  }
  0x4c   : > { %p13_p4 = scmp.ge.s32.totalorder %s16_s21, 4  }
  0x4e   :  { %15 = sbr.rel (!%p13_p4) target bundleno = 1 (0x1), region = 79 }

// kernel: bottleneck_forward.4
= control target key start
LH: loop header
LB: loop body
LE: loop exit
PB: predicated region body
PF: predicated region fallthrough
CT: control target
= control target key end

     0   :  { %s1267_s18 = smov 0   ;;  %s1644_s0 = inlined_call_operand.vmem [shape: bf16[512,128], index: 0, kind: input, shape index: {}]   ;;  %s1645_s1 = inlined_call_operand.vmem [shape: bf16[128,256], index: 1, kind: input, shape index: {}]   ;;  %s1646_s2 = inlined_call_operand.vmem [shape: f32[512,128], index: 2, kind: output, shape index: {0}]   ;;  %s1647_s3 = inlined_call_operand.vmem [shape: f32[512,128], index: 3, kind: output, shape index: {1}]   ;;  %s1648_s4 = inlined_call_operand.vmem [shape: f32[2,8,128], index: 4, kind: output, shape index: {2}]   ;;  %s1649_s5 = inlined_call_operand.vmem [shape: f32[2,8,128], index: 5, kind: output, shape index: {3}]  }
   0x1 LB: > { %s1273_s19 = sadd.s32 4294967295, %s1234_s18   ;;  %p1120_p0 = scmp.ge.s32.totalorder %s1234_s18, 1  ;;  %s1234_s18 = sphi %s1267_s18, %s16_s18  }
   0x2   : > { %p195_p1 = scmp.lt.s32.totalorder %s1234_s18, 3 }
   0x4   : > { %p196_p2 = pnand %p1120_p0, %p195_p1 }
   0x5   : > { %v1188_v0 = vld [vmem:[%s1645_s1 + $0x4] ss:$8 sps:$4 sm:$0xff] (!%p196_p2)   ;;  %s1121_s22 = sshll.u32 (!%p196_p2), %s1273_s19, 5  ;;  %v1190_v1 = vld [vmem:[%s1645_s1] ss:$8 sps:$4 sm:$0xff] (!%p196_p2)   ;;  %v1236_v2 = vmov (!%p196_p2), 0  }
   0x6   : > { %199 = sbr.rel (%p196_p2) target bundleno = 361 (0x169), region = 28  ;;  %519 = vmatprep.mubr.bf16.mxu0 (!%p196_p2), %v1236_v2  ;;  %p237_p3 = scmp.lt.s32.totalorder (!%p196_p2), %s1121_s22, 63  ;;  %599 = vmatprep.mubr.bf16.mxu1 (!%p196_p2), %v1236_v2  ;;  %v1191_v3 = vld [vmem:[%s1645_s1 + $0x14] ss:$8 sps:$4 sm:$0xff] (!%p196_p2)   ;;  %v1193_v4 = vld [vmem:[%s1645_s1 + $0x10] ss:$8 sps:$4 sm:$0xff] (!%p196_p2)  }
   0x7   : > { %487 = vmatprep.subr.bf16.mxu0 (!%p196_p2), %v1188_v0  ;;  %1163 = vmatprep.subr.bf16.mxu1 (!%p196_p2), %v1188_v0  ;;  %v1194_v5 = vld [vmem:[%s1645_s1 + $0x24] ss:$8 sps:$4 sm:$0xff] (!%p196_p2)   ;;  %v1196_v6 = vld [vmem:[%s1645_s1 + $0x20] ss:$8 sps:$4 sm:$0xff] (!%p196_p2)   ;;  %v1197_v7 = vld [vmem:[%s1645_s1 + $0x34] ss:$8 sps:$4 sm:$0xff] (!%p196_p2)  }
   0x8   : > { %488 = vmatpush1.bf16.msra.mxu0 (!%p196_p2), %v1190_v1  ;;  %1171 = vmatpush1.bf16.msra.mxu1 (!%p196_p2), %v1190_v1  ;;  %v1199_v8 = vld [vmem:[%s1645_s1 + $0x30] ss:$8 sps:$4 sm:$0xff] (!%p196_p2)   ;;  %v1200_v9 = vld [vmem:[%s1645_s1 + $0x44] ss:$8 sps:$4 sm:$0xff] (!%p196_p2)   ;;  %v1202_v10 = vld [vmem:[%s1645_s1 + $0x40] ss:$8 sps:$4 sm:$0xff] (!%p196_p2)  }
   0x9   : > { %489 = vmatprep.subr.bf16.mxu0 (!%p196_p2), %v1191_v3  ;;  %1164 = vmatprep.subr.bf16.mxu1 (!%p196_p2), %v1191_v3  ;;  %v1203_v11 = vld [vmem:[%s1645_s1 + $0x54] ss:$8 sps:$4 sm:$0xff] (!%p196_p2)   ;;  %v1205_v12 = vld [vmem:[%s1645_s1 + $0x50] ss:$8 sps:$4 sm:$0xff] (!%p196_p2)   ;;  %v1206_v13 = vld [vmem:[%s1645_s1 + $0x64] ss:$8 sps:$4 sm:$0xff] (!%p196_p2)  }
   0xa   : > { %v1208_v14 = vld [vmem:[%s1645_s1 + $0x60] ss:$8 sps:$4 sm:$0xff] (!%p196_p2)   ;;  %v1209_v15 = vld [vmem:[%s1645_s1 + $0x74] ss:$8 sps:$4 sm:$0xff] (!%p196_p2)   ;;  %v1211_v16 = vld [vmem:[%s1645_s1 + $0x70] ss:$8 sps:$4 sm:$0xff] (!%p196_p2)  }
   0xb   : > { %p254_p4 = scmp.lt.s32.totalorder (!%p196_p2), %s1273_s19, 1  ;;  %vm850_vm0 = vcmask (!%p196_p2), 1040384   ;;  %vm852_vm1 = vcmask (!%p196_p2), 1041408  }
   0xc   : > { %490 = vmatpush1.bf16.msra.mxu0 (!%p196_p2), %v1193_v4  ;;  %1172 = vmatpush1.bf16.msra.mxu1 (!%p196_p2), %v1193_v4 }
   0xd   : > { %s1651_s22 = smov (!%p237_p3, %s1121_s22), 63  ;;  %491 = vmatprep.subr.bf16.mxu0 %v1194_v5  ;;  %1165 = vmatprep.subr.bf16.mxu1 %v1194_v5  ;;  %s1653_s19 = smov (!%p254_p4, %s1273_s19), 1 }
   0xe   : > { %s1122_s6 = sshll.u32 %s1651_s22, 2  ;;  %s1124_s10 = sshll.u32 %s1651_s22, 3 }
   0xf   : > { %s1307_s13 = scalar_lea.vmem %s1644_s0, %s1122_s6  ;;  %s1370_s14 = scalar_lea.vmem %s1646_s2, %s1124_s10 }
  0x10   : > { %492 = vmatpush1.bf16.msra.mxu0 %v1196_v6  ;;  %1173 = vmatpush1.bf16.msra.mxu1 %v1196_v6  ;;  %v1212_v17 = vld [vmem:[%s1307_s13] sm:$0xff]   ;;  %v1213_v19 = vld [vmem:[%s1307_s13 + $0x8] sm:$0xff]   ;;  %v1214_v21 = vld [vmem:[%s1307_s13 + $0x10] sm:$0xff]   ;;  %s1375_s17 = scalar_lea.vmem %s1647_s3, %s1124_s10  ;;  %s1127_s22 = sshll.u32 %s1653_s19, 3 }
  0x11   : > { %493 = vmatprep.subr.bf16.mxu0 %v1197_v7  ;;  %1166 = vmatprep.subr.bf16.mxu1 %v1197_v7  ;;  %v1216_v18 = vld [vmem:[%s1307_s13 + $0x40] sm:$0xff]   ;;  %v1218_v20 = vld [vmem:[%s1307_s13 + $0x48] sm:$0xff]   ;;  %v1220_v22 = vld [vmem:[%s1307_s13 + $0x50] sm:$0xff]   ;;  %s257_s21 = scalar_lea.vmem %s1648_s4, %s1127_s22  ;;  %s261_s25 = scalar_lea.vmem %s1649_s5, %s1127_s22 }
  0x12   : > { %v1215_v23 = vld [vmem:[%s1307_s13 + $0x18] sm:$0xff]   ;;  %v1217_v25 = vld [vmem:[%s1307_s13 + $0x20] sm:$0xff]   ;;  %v1219_v27 = vld [vmem:[%s1307_s13 + $0x28] sm:$0xff]  }
  0x13   : > { %v1222_v24 = vld [vmem:[%s1307_s13 + $0x58] sm:$0xff]   ;;  %v1224_v26 = vld [vmem:[%s1307_s13 + $0x60] sm:$0xff]   ;;  %v1225_v28 = vld [vmem:[%s1307_s13 + $0x68] sm:$0xff]  }
  0x14   : > { %494 = vmatpush1.bf16.msra.mxu0 %v1199_v8  ;;  %1174 = vmatpush1.bf16.msra.mxu1 %v1199_v8  ;;  %v1221_v29 = vld [vmem:[%s1307_s13 + $0x30] sm:$0xff]   ;;  %v1223_v31 = vld [vmem:[%s1307_s13 + $0x38] sm:$0xff]  }
  0x15   : > { %495 = vmatprep.subr.bf16.mxu0 %v1200_v9  ;;  %1167 = vmatprep.subr.bf16.mxu1 %v1200_v9  ;;  %v1226_v30 = vld [vmem:[%s1307_s13 + $0x70] sm:$0xff]   ;;  %v1227_v32 = vld [vmem:[%s1307_s13 + $0x78] sm:$0xff]  }
  0x18   : > { %496 = vmatpush1.bf16.msra.mxu0 %v1202_v10  ;;  %1175 = vmatpush1.bf16.msra.mxu1 %v1202_v10 }
  0x19   : > { %497 = vmatprep.subr.bf16.mxu0 %v1203_v11  ;;  %1168 = vmatprep.subr.bf16.mxu1 %v1203_v11 }
  0x1c   : > { %498 = vmatpush1.bf16.msra.mxu0 %v1205_v12  ;;  %1176 = vmatpush1.bf16.msra.mxu1 %v1205_v12 }
  0x1d   : > { %499 = vmatprep.subr.bf16.mxu0 %v1206_v13  ;;  %1169 = vmatprep.subr.bf16.mxu1 %v1206_v13 }
  0x20   : > { %500 = vmatpush1.bf16.msra.mxu0 %v1208_v14  ;;  %1177 = vmatpush1.bf16.msra.mxu1 %v1208_v14 }
  0x21   : > { %501 = vmatprep.subr.bf16.mxu0 %v1209_v15  ;;  %1170 = vmatprep.subr.bf16.mxu1 %v1209_v15 }
  0x24   : > { %502 = vmatpush1.bf16.msra.mxu0 %v1211_v16  ;;  %1178 = vmatpush1.bf16.msra.mxu1 %v1211_v16 }
  0x27   : > { %520 = vmatmul.mubr.bf16.vlgmr.msra.gmra.mrb[0].mxu0 %v1212_v17  ;;  %600 = vmatmul.mubr.bf16.vlgmr.msra.gmra.mrb[0].mxu1 %v1216_v18 }
  0x28   : > { %529 = vmatprep.mubr.bf16.mxu0 %v1236_v2  ;;  %609 = vmatprep.mubr.bf16.mxu1 %v1236_v2 }
  0x2f   : > { %530 = vmatmul.mubr.bf16.gmra.mrb[4].mxu0 %v1213_v19  ;;  %610 = vmatmul.mubr.bf16.gmra.mrb[4].mxu1 %v1218_v20 }
  0x30   : > { %539 = vmatprep.mubr.bf16.mxu0 %v1236_v2  ;;  %619 = vmatprep.mubr.bf16.mxu1 %v1236_v2 }
  0x37   : > { %540 = vmatmul.mubr.bf16.gmra.mrb[8].mxu0 %v1214_v21  ;;  %620 = vmatmul.mubr.bf16.gmra.mrb[8].mxu1 %v1220_v22 }
  0x38   : > { %549 = vmatprep.mubr.bf16.mxu0 %v1236_v2  ;;  %629 = vmatprep.mubr.bf16.mxu1 %v1236_v2 }
  0x3f   : > { %550 = vmatmul.mubr.bf16.gmra.mrb[12].mxu0 %v1215_v23  ;;  %630 = vmatmul.mubr.bf16.gmra.mrb[12].mxu1 %v1222_v24 }
  0x40   : > { %559 = vmatprep.mubr.bf16.mxu0 %v1236_v2  ;;  %639 = vmatprep.mubr.bf16.mxu1 %v1236_v2 }
  0x47   : > { %560 = vmatmul.mubr.bf16.gmra.mrb[16].mxu0 %v1217_v25  ;;  %640 = vmatmul.mubr.bf16.gmra.mrb[16].mxu1 %v1224_v26 }
  0x48   : > { %569 = vmatprep.mubr.bf16.mxu0 %v1236_v2  ;;  %649 = vmatprep.mubr.bf16.mxu1 %v1236_v2 }
  0x4f   : > { %570 = vmatmul.mubr.bf16.gmra.mrb[20].mxu0 %v1219_v27  ;;  %650 = vmatmul.mubr.bf16.gmra.mrb[20].mxu1 %v1225_v28 }
  0x50   : > { %579 = vmatprep.mubr.bf16.mxu0 %v1236_v2  ;;  %659 = vmatprep.mubr.bf16.mxu1 %v1236_v2 }
  0x57   : > { %580 = vmatmul.mubr.bf16.gmra.mrb[24].mxu0 %v1221_v29  ;;  %660 = vmatmul.mubr.bf16.gmra.mrb[24].mxu1 %v1226_v30 }
  0x58   : > { %589 = vmatprep.mubr.bf16.mxu0 %v1236_v2  ;;  %669 = vmatprep.mubr.bf16.mxu1 %v1236_v2 }
  0x5f   : > { %590 = vmatmul.mubr.bf16.gmra.mrb[28].mxu0 %v1223_v31  ;;  %670 = vmatmul.mubr.bf16.gmra.mrb[28].mxu1 %v1227_v32 }
  0xfa   : > { %v521_v33 = vpop.f32.mrb[0].mxu0  ;;  %v1377_v34 = vpop.f32.mrb[0].mxu1 }
  0xfb   : > { %680 = vst [vmem:[%s1370_s14] sm:$0xff] %v521_v33  ;;  %v523_v35 = vpop.f32.mrb[1].mxu0  ;;  %696 = vst [vmem:[%s1370_s14 + $0x80] sm:$0xff] %v1377_v34  ;;  %v1382_v36 = vpop.f32.mrb[1].mxu1  ;;  %v781_v39 = vmul.f32 %v521_v33, %v521_v33 }
  0xfc   : > { %712 = vst [vmem:[%s1375_s17] sm:$0xff] %v523_v35  ;;  %v525_v37 = vpop.f32.mrb[2].mxu0  ;;  %728 = vst [vmem:[%s1375_s17 + $0x80] sm:$0xff] %v1382_v36  ;;  %v1387_v38 = vpop.f32.mrb[2].mxu1  ;;  %v892_v44 = vmul.f32 %v523_v35, %v523_v35 }
  0xfd   : > { %681 = vst [vmem:[%s1370_s14 + $0x8] sm:$0xff] %v525_v37  ;;  %v744_v40 = vadd.f32 %v525_v37, %v521_v33  ;;  %v782_v41 = vmul.f32 %v525_v37, %v525_v37  ;;  %v527_v42 = vpop.f32.mrb[3].mxu0  ;;  %697 = vst [vmem:[%s1370_s14 + $0x88] sm:$0xff] %v1387_v38  ;;  %v1392_v43 = vpop.f32.mrb[3].mxu1 }
  0xfe   : > { %713 = vst [vmem:[%s1375_s17 + $0x8] sm:$0xff] %v527_v42  ;;  %v855_v45 = vadd.f32 %v527_v42, %v523_v35  ;;  %v893_v46 = vmul.f32 %v527_v42, %v527_v42  ;;  %729 = vst [vmem:[%s1375_s17 + $0x88] sm:$0xff] %v1392_v43 }
  0xff   : > { %v813_v47 = vadd.f32 %v782_v41, %v781_v39 }
 0x100   : > { %v924_v48 = vadd.f32 %v893_v46, %v892_v44 }
 0x102   : > { %v531_v49 = vpop.f32.mrb[4].mxu0  ;;  %v1397_v50 = vpop.f32.mrb[4].mxu1 }
 0x103   : > { %682 = vst [vmem:[%s1370_s14 + $0x10] sm:$0xff] %v531_v49  ;;  %v745_v51 = vadd.f32 %v744_v40, %v531_v49  ;;  %v783_v52 = vmul.f32 %v531_v49, %v531_v49  ;;  %v533_v53 = vpop.f32.mrb[5].mxu0  ;;  %698 = vst [vmem:[%s1370_s14 + $0x90] sm:$0xff] %v1397_v50  ;;  %v1402_v54 = vpop.f32.mrb[5].mxu1 }
 0x104   : > { %714 = vst [vmem:[%s1375_s17 + $0x10] sm:$0xff] %v533_v53  ;;  %v856_v55 = vadd.f32 %v855_v45, %v533_v53  ;;  %v894_v56 = vmul.f32 %v533_v53, %v533_v53  ;;  %v535_v57 = vpop.f32.mrb[6].mxu0  ;;  %730 = vst [vmem:[%s1375_s17 + $0x90] sm:$0xff] %v1402_v54  ;;  %v1407_v58 = vpop.f32.mrb[6].mxu1 }
 0x105   : > { %v814_v59 = vadd.f32 %v813_v47, %v783_v52  ;;  %683 = vst [vmem:[%s1370_s14 + $0x18] sm:$0xff] %v535_v57  ;;  %v746_v60 = vadd.f32 %v745_v51, %v535_v57  ;;  %v784_v61 = vmul.f32 %v535_v57, %v535_v57  ;;  %v537_v62 = vpop.f32.mrb[7].mxu0  ;;  %699 = vst [vmem:[%s1370_s14 + $0x98] sm:$0xff] %v1407_v58  ;;  %v1412_v63 = vpop.f32.mrb[7].mxu1 }
 0x106   : > { %v925_v0 = vadd.f32 %v924_v48, %v894_v56  ;;  %715 = vst [vmem:[%s1375_s17 + $0x18] sm:$0xff] %v537_v62  ;;  %v857_v1 = vadd.f32 %v856_v55, %v537_v62  ;;  %v895_v2 = vmul.f32 %v537_v62, %v537_v62  ;;  %731 = vst [vmem:[%s1375_s17 + $0x98] sm:$0xff] %v1412_v63 }
 0x107   : > { %v815_v3 = vadd.f32 %v814_v59, %v784_v61 }
 0x108   : > { %v926_v4 = vadd.f32 %v925_v0, %v895_v2 }
 0x10a   : > { %v541_v5 = vpop.f32.mrb[8].mxu0  ;;  %v1417_v6 = vpop.f32.mrb[8].mxu1 }
 0x10b   : > { %684 = vst [vmem:[%s1370_s14 + $0x20] sm:$0xff] %v541_v5  ;;  %v747_v7 = vadd.f32 %v746_v60, %v541_v5  ;;  %v785_v8 = vmul.f32 %v541_v5, %v541_v5  ;;  %v543_v9 = vpop.f32.mrb[9].mxu0  ;;  %700 = vst [vmem:[%s1370_s14 + $0xa0] sm:$0xff] %v1417_v6  ;;  %v1422_v10 = vpop.f32.mrb[9].mxu1 }
 0x10c   : > { %716 = vst [vmem:[%s1375_s17 + $0x20] sm:$0xff] %v543_v9  ;;  %v858_v11 = vadd.f32 %v857_v1, %v543_v9  ;;  %v896_v12 = vmul.f32 %v543_v9, %v543_v9  ;;  %v545_v13 = vpop.f32.mrb[10].mxu0  ;;  %732 = vst [vmem:[%s1375_s17 + $0xa0] sm:$0xff] %v1422_v10  ;;  %v1427_v14 = vpop.f32.mrb[10].mxu1 }
 0x10d   : > { %v816_v15 = vadd.f32 %v815_v3, %v785_v8  ;;  %685 = vst [vmem:[%s1370_s14 + $0x28] sm:$0xff] %v545_v13  ;;  %v748_v16 = vadd.f32 %v747_v7, %v545_v13  ;;  %v786_v17 = vmul.f32 %v545_v13, %v545_v13  ;;  %v547_v18 = vpop.f32.mrb[11].mxu0  ;;  %701 = vst [vmem:[%s1370_s14 + $0xa8] sm:$0xff] %v1427_v14  ;;  %v1432_v19 = vpop.f32.mrb[11].mxu1 }
 0x10e   : > { %v927_v20 = vadd.f32 %v926_v4, %v896_v12  ;;  %717 = vst [vmem:[%s1375_s17 + $0x28] sm:$0xff] %v547_v18  ;;  %v859_v21 = vadd.f32 %v858_v11, %v547_v18  ;;  %v897_v22 = vmul.f32 %v547_v18, %v547_v18  ;;  %733 = vst [vmem:[%s1375_s17 + $0xa8] sm:$0xff] %v1432_v19 }
 0x10f   : > { %v817_v23 = vadd.f32 %v816_v15, %v786_v17 }
 0x110   : > { %v928_v24 = vadd.f32 %v927_v20, %v897_v22 }
 0x112   : > { %v551_v25 = vpop.f32.mrb[12].mxu0  ;;  %v1437_v26 = vpop.f32.mrb[12].mxu1 }
 0x113   : > { %686 = vst [vmem:[%s1370_s14 + $0x30] sm:$0xff] %v551_v25  ;;  %v749_v27 = vadd.f32 %v748_v16, %v551_v25  ;;  %v787_v28 = vmul.f32 %v551_v25, %v551_v25  ;;  %v553_v29 = vpop.f32.mrb[13].mxu0  ;;  %702 = vst [vmem:[%s1370_s14 + $0xb0] sm:$0xff] %v1437_v26  ;;  %v1442_v30 = vpop.f32.mrb[13].mxu1 }
 0x114   : > { %718 = vst [vmem:[%s1375_s17 + $0x30] sm:$0xff] %v553_v29  ;;  %v860_v31 = vadd.f32 %v859_v21, %v553_v29  ;;  %v898_v32 = vmul.f32 %v553_v29, %v553_v29  ;;  %v555_v33 = vpop.f32.mrb[14].mxu0  ;;  %734 = vst [vmem:[%s1375_s17 + $0xb0] sm:$0xff] %v1442_v30  ;;  %v1447_v35 = vpop.f32.mrb[14].mxu1 }
 0x115   : > { %v818_v37 = vadd.f32 %v817_v23, %v787_v28  ;;  %687 = vst [vmem:[%s1370_s14 + $0x38] sm:$0xff] %v555_v33  ;;  %v750_v39 = vadd.f32 %v749_v27, %v555_v33  ;;  %v788_v40 = vmul.f32 %v555_v33, %v555_v33  ;;  %v557_v41 = vpop.f32.mrb[15].mxu0  ;;  %703 = vst [vmem:[%s1370_s14 + $0xb8] sm:$0xff] %v1447_v35  ;;  %v1452_v42 = vpop.f32.mrb[15].mxu1 }
 0x116   : > { %v929_v44 = vadd.f32 %v928_v24, %v898_v32  ;;  %719 = vst [vmem:[%s1375_s17 + $0x38] sm:$0xff] %v557_v41  ;;  %v861_v45 = vadd.f32 %v860_v31, %v557_v41  ;;  %v899_v46 = vmul.f32 %v557_v41, %v557_v41  ;;  %735 = vst [vmem:[%s1375_s17 + $0xb8] sm:$0xff] %v1452_v42 }
 0x117   : > { %v819_v47 = vadd.f32 %v818_v37, %v788_v40 }
 0x118   : > { %v930_v48 = vadd.f32 %v929_v44, %v899_v46 }
 0x11a   : > { %v561_v49 = vpop.f32.mrb[16].mxu0  ;;  %v1457_v51 = vpop.f32.mrb[16].mxu1 }
 0x11b   : > { %688 = vst [vmem:[%s1370_s14 + $0x40] sm:$0xff] %v561_v49  ;;  %v751_v52 = vadd.f32 %v750_v39, %v561_v49  ;;  %v789_v53 = vmul.f32 %v561_v49, %v561_v49  ;;  %v563_v55 = vpop.f32.mrb[17].mxu0  ;;  %704 = vst [vmem:[%s1370_s14 + $0xc0] sm:$0xff] %v1457_v51  ;;  %v1462_v56 = vpop.f32.mrb[17].mxu1 }
 0x11c   : > { %720 = vst [vmem:[%s1375_s17 + $0x40] sm:$0xff] %v563_v55  ;;  %v862_v57 = vadd.f32 %v861_v45, %v563_v55  ;;  %v900_v59 = vmul.f32 %v563_v55, %v563_v55  ;;  %v565_v60 = vpop.f32.mrb[18].mxu0  ;;  %736 = vst [vmem:[%s1375_s17 + $0xc0] sm:$0xff] %v1462_v56  ;;  %v1467_v61 = vpop.f32.mrb[18].mxu1 }
 0x11d   : > { %v820_v62 = vadd.f32 %v819_v47, %v789_v53  ;;  %689 = vst [vmem:[%s1370_s14 + $0x48] sm:$0xff] %v565_v60  ;;  %v752_v0 = vadd.f32 %v751_v52, %v565_v60  ;;  %v790_v1 = vmul.f32 %v565_v60, %v565_v60  ;;  %v567_v2 = vpop.f32.mrb[19].mxu0  ;;  %705 = vst [vmem:[%s1370_s14 + $0xc8] sm:$0xff] %v1467_v61  ;;  %v1472_v3 = vpop.f32.mrb[19].mxu1 }
 0x11e   : > { %v931_v4 = vadd.f32 %v930_v48, %v900_v59  ;;  %721 = vst [vmem:[%s1375_s17 + $0x48] sm:$0xff] %v567_v2  ;;  %v863_v5 = vadd.f32 %v862_v57, %v567_v2  ;;  %v901_v7 = vmul.f32 %v567_v2, %v567_v2  ;;  %737 = vst [vmem:[%s1375_s17 + $0xc8] sm:$0xff] %v1472_v3 }
 0x11f   : > { %v821_v8 = vadd.f32 %v820_v62, %v790_v1 }
 0x120   : > { %v932_v9 = vadd.f32 %v931_v4, %v901_v7 }
 0x122   : > { %v571_v11 = vpop.f32.mrb[20].mxu0  ;;  %v1477_v12 = vpop.f32.mrb[20].mxu1 }
 0x123   : > { %690 = vst [vmem:[%s1370_s14 + $0x50] sm:$0xff] %v571_v11  ;;  %v753_v13 = vadd.f32 %v752_v0, %v571_v11  ;;  %v791_v15 = vmul.f32 %v571_v11, %v571_v11  ;;  %v573_v16 = vpop.f32.mrb[21].mxu0  ;;  %706 = vst [vmem:[%s1370_s14 + $0xd0] sm:$0xff] %v1477_v12  ;;  %v1482_v17 = vpop.f32.mrb[21].mxu1 }
 0x124   : > { %722 = vst [vmem:[%s1375_s17 + $0x50] sm:$0xff] %v573_v16  ;;  %v864_v18 = vadd.f32 %v863_v5, %v573_v16  ;;  %v902_v20 = vmul.f32 %v573_v16, %v573_v16  ;;  %v575_v21 = vpop.f32.mrb[22].mxu0  ;;  %738 = vst [vmem:[%s1375_s17 + $0xd0] sm:$0xff] %v1482_v17  ;;  %v1487_v22 = vpop.f32.mrb[22].mxu1 }
 0x125   : > { %v822_v23 = vadd.f32 %v821_v8, %v791_v15  ;;  %691 = vst [vmem:[%s1370_s14 + $0x58] sm:$0xff] %v575_v21  ;;  %v754_v24 = vadd.f32 %v753_v13, %v575_v21  ;;  %v792_v25 = vmul.f32 %v575_v21, %v575_v21  ;;  %v577_v27 = vpop.f32.mrb[23].mxu0  ;;  %707 = vst [vmem:[%s1370_s14 + $0xd8] sm:$0xff] %v1487_v22  ;;  %v1492_v28 = vpop.f32.mrb[23].mxu1 }
 0x126   : > { %v933_v29 = vadd.f32 %v932_v9, %v902_v20  ;;  %723 = vst [vmem:[%s1375_s17 + $0x58] sm:$0xff] %v577_v27  ;;  %v865_v31 = vadd.f32 %v864_v18, %v577_v27  ;;  %v903_v32 = vmul.f32 %v577_v27, %v577_v27  ;;  %739 = vst [vmem:[%s1375_s17 + $0xd8] sm:$0xff] %v1492_v28 }
 0x127   : > { %v823_v33 = vadd.f32 %v822_v23, %v792_v25 }
 0x128   : > { %v934_v37 = vadd.f32 %v933_v29, %v903_v32 }
 0x12a   : > { %v581_v39 = vpop.f32.mrb[24].mxu0  ;;  %v1497_v40 = vpop.f32.mrb[24].mxu1 }
 0x12b   : > { %692 = vst [vmem:[%s1370_s14 + $0x60] sm:$0xff] %v581_v39  ;;  %v755_v41 = vadd.f32 %v754_v24, %v581_v39  ;;  %v793_v44 = vmul.f32 %v581_v39, %v581_v39  ;;  %v583_v45 = vpop.f32.mrb[25].mxu0  ;;  %708 = vst [vmem:[%s1370_s14 + $0xe0] sm:$0xff] %v1497_v40  ;;  %v1502_v46 = vpop.f32.mrb[25].mxu1 }
 0x12c   : > { %724 = vst [vmem:[%s1375_s17 + $0x60] sm:$0xff] %v583_v45  ;;  %v866_v47 = vadd.f32 %v865_v31, %v583_v45  ;;  %v904_v48 = vmul.f32 %v583_v45, %v583_v45  ;;  %v585_v49 = vpop.f32.mrb[26].mxu0  ;;  %740 = vst [vmem:[%s1375_s17 + $0xe0] sm:$0xff] %v1502_v46  ;;  %v1507_v52 = vpop.f32.mrb[26].mxu1 }
 0x12d   : > { %v824_v53 = vadd.f32 %v823_v33, %v793_v44  ;;  %693 = vst [vmem:[%s1370_s14 + $0x68] sm:$0xff] %v585_v49  ;;  %v756_v55 = vadd.f32 %v755_v41, %v585_v49  ;;  %v794_v57 = vmul.f32 %v585_v49, %v585_v49  ;;  %v587_v59 = vpop.f32.mrb[27].mxu0  ;;  %709 = vst [vmem:[%s1370_s14 + $0xe8] sm:$0xff] %v1507_v52  ;;  %v1512_v60 = vpop.f32.mrb[27].mxu1 }
 0x12e   : > { %v935_v62 = vadd.f32 %v934_v37, %v904_v48  ;;  %725 = vst [vmem:[%s1375_s17 + $0x68] sm:$0xff] %v587_v59  ;;  %v867_v0 = vadd.f32 %v866_v47, %v587_v59  ;;  %v905_v1 = vmul.f32 %v587_v59, %v587_v59  ;;  %741 = vst [vmem:[%s1375_s17 + $0xe8] sm:$0xff] %v1512_v60 }
 0x12f   : > { %v825_v2 = vadd.f32 %v824_v53, %v794_v57  ;;  %v797_v33 = vmul.f32 %v1377_v34, %v1377_v34  ;;  %v908_v41 = vmul.f32 %v1382_v36, %v1382_v36  ;;  %v798_v47 = vmul.f32 %v1387_v38, %v1387_v38 }
 0x130   : > { %v936_v4 = vadd.f32 %v935_v62, %v905_v1  ;;  %v909_v53 = vmul.f32 %v1392_v43, %v1392_v43 }
 0x132   : > { %v591_v5 = vpop.f32.mrb[28].mxu0  ;;  %v1517_v7 = vpop.f32.mrb[28].mxu1 }
 0x133   : > { %694 = vst [vmem:[%s1370_s14 + $0x70] sm:$0xff] %v591_v5  ;;  %v757_v8 = vadd.f32 %v756_v55, %v591_v5  ;;  %v795_v9 = vmul.f32 %v591_v5, %v591_v5  ;;  %v593_v11 = vpop.f32.mrb[29].mxu0  ;;  %710 = vst [vmem:[%s1370_s14 + $0xf0] sm:$0xff] %v1517_v7  ;;  %v1522_v13 = vpop.f32.mrb[29].mxu1 }
 0x134   : > { %726 = vst [vmem:[%s1375_s17 + $0x70] sm:$0xff] %v593_v11  ;;  %v868_v15 = vadd.f32 %v867_v0, %v593_v11  ;;  %v906_v16 = vmul.f32 %v593_v11, %v593_v11  ;;  %v595_v18 = vpop.f32.mrb[30].mxu0  ;;  %742 = vst [vmem:[%s1375_s17 + $0xf0] sm:$0xff] %v1522_v13  ;;  %v1527_v20 = vpop.f32.mrb[30].mxu1 }
 0x135   : > { %v826_v21 = vadd.f32 %v825_v2, %v795_v9  ;;  %695 = vst [vmem:[%s1370_s14 + $0x78] sm:$0xff] %v595_v18  ;;  %v758_v23 = vadd.f32 %v757_v8, %v595_v18  ;;  %v796_v24 = vmul.f32 %v595_v18, %v595_v18  ;;  %v597_v25 = vpop.f32.mrb[31].mxu0  ;;  %711 = vst [vmem:[%s1370_s14 + $0xf8] sm:$0xff] %v1527_v20  ;;  %v1532_v27 = vpop.f32.mrb[31].mxu1 }
 0x136   : > { %v937_v29 = vadd.f32 %v936_v4, %v906_v16  ;;  %727 = vst [vmem:[%s1375_s17 + $0x78] sm:$0xff] %v597_v25  ;;  %v869_v31 = vadd.f32 %v868_v15, %v597_v25  ;;  %v907_v32 = vmul.f32 %v597_v25, %v597_v25  ;;  %743 = vst [vmem:[%s1375_s17 + $0xf8] sm:$0xff] %v1532_v27 }
 0x137   : > { %v759_v37 = vadd.f32 %v758_v23, %v1377_v34  ;;  %v827_v39 = vadd.f32 %v826_v21, %v796_v24  ;;  %v799_v34 = vmul.f32 %v1397_v50, %v1397_v50 }
 0x138   : > { %v870_v44 = vadd.f32 %v869_v31, %v1382_v36  ;;  %v938_v45 = vadd.f32 %v937_v29, %v907_v32  ;;  %v910_v36 = vmul.f32 %v1402_v54, %v1402_v54 }
 0x139   : > { %v760_v48 = vadd.f32 %v759_v37, %v1387_v38  ;;  %v828_v49 = vadd.f32 %v827_v39, %v797_v33  ;;  %v800_v38 = vmul.f32 %v1407_v58, %v1407_v58 }
 0x13a   : > { %v871_v55 = vadd.f32 %v870_v44, %v1392_v43  ;;  %v939_v57 = vadd.f32 %v938_v45, %v908_v41  ;;  %v911_v43 = vmul.f32 %v1412_v63, %v1412_v63  ;;  %v805_v44 = vmul.f32 %v1457_v51, %v1457_v51 }
 0x13b   : > { %v761_v59 = vadd.f32 %v760_v48, %v1397_v50  ;;  %v829_v62 = vadd.f32 %v828_v49, %v798_v47  ;;  %v801_v50 = vmul.f32 %v1417_v6, %v1417_v6  ;;  %v916_v47 = vmul.f32 %v1462_v56, %v1462_v56 }
 0x13c   : > { %v872_v0 = vadd.f32 %v871_v55, %v1402_v54  ;;  %v940_v1 = vadd.f32 %v939_v57, %v909_v53  ;;  %v912_v54 = vmul.f32 %v1422_v10, %v1422_v10  ;;  %v806_v53 = vmul.f32 %v1467_v61, %v1467_v61 }
 0x13d   : > { %v762_v2 = vadd.f32 %v761_v59, %v1407_v58  ;;  %v830_v4 = vadd.f32 %v829_v62, %v799_v34  ;;  %v802_v58 = vmul.f32 %v1427_v14, %v1427_v14  ;;  %v917_v57 = vmul.f32 %v1472_v3, %v1472_v3 }
 0x13e   : > { %v873_v5 = vadd.f32 %v872_v0, %v1412_v63  ;;  %v941_v8 = vadd.f32 %v940_v1, %v910_v36  ;;  %v913_v63 = vmul.f32 %v1432_v19, %v1432_v19  ;;  %v807_v59 = vmul.f32 %v1477_v12, %v1477_v12 }
 0x13f   : > { %v831_v9 = vadd.f32 %v830_v4, %v800_v38  ;;  %v763_v11 = vadd.f32 %v762_v2, %v1417_v6  ;;  %v803_v6 = vmul.f32 %v1437_v26, %v1437_v26  ;;  %v918_v36 = vmul.f32 %v1482_v17, %v1482_v17 }
 0x140   : > { %v942_v15 = vadd.f32 %v941_v8, %v911_v43  ;;  %v874_v16 = vadd.f32 %v873_v5, %v1422_v10  ;;  %v914_v10 = vmul.f32 %v1442_v30, %v1442_v30  ;;  %v808_v1 = vmul.f32 %v1487_v22, %v1487_v22 }
 0x141   : > { %v764_v18 = vadd.f32 %v763_v11, %v1427_v14  ;;  %v832_v21 = vadd.f32 %v831_v9, %v801_v50  ;;  %v804_v14 = vmul.f32 %v1447_v35, %v1447_v35  ;;  %v919_v2 = vmul.f32 %v1492_v28, %v1492_v28 }
 0x142   : > { %v875_v23 = vadd.f32 %v874_v16, %v1432_v19  ;;  %v943_v24 = vadd.f32 %v942_v15, %v912_v54  ;;  %v915_v19 = vmul.f32 %v1452_v42, %v1452_v42  ;;  %v809_v43 = vmul.f32 %v1497_v40, %v1497_v40 }
 0x143   : > { %v765_v25 = vadd.f32 %v764_v18, %v1437_v26  ;;  %v833_v29 = vadd.f32 %v832_v21, %v802_v58  ;;  %v920_v8 = vmul.f32 %v1502_v46, %v1502_v46  ;;  %v810_v9 = vmul.f32 %v1507_v52, %v1507_v52 }
 0x144   : > { %v876_v31 = vadd.f32 %v875_v23, %v1442_v30  ;;  %v944_v32 = vadd.f32 %v943_v24, %v913_v63  ;;  %v922_v15 = vmul.f32 %v1522_v13, %v1522_v13  ;;  %v812_v63 = vmul.f32 %v1527_v20, %v1527_v20 }
 0x145   : > { %v766_v33 = vadd.f32 %v765_v25, %v1447_v35  ;;  %v834_v37 = vadd.f32 %v833_v29, %v803_v6 }
 0x146   : > { %v877_v39 = vadd.f32 %v876_v31, %v1452_v42  ;;  %v945_v41 = vadd.f32 %v944_v32, %v914_v10 }
 0x147   : > { %v767_v26 = vadd.f32 %v766_v33, %v1457_v51  ;;  %v835_v45 = vadd.f32 %v834_v37, %v804_v14 }
 0x148   : > { %v878_v30 = vadd.f32 %v877_v39, %v1462_v56  ;;  %v946_v48 = vadd.f32 %v945_v41, %v915_v19 }
 0x149   : > { %v836_v35 = vadd.f32 %v835_v45, %v805_v44  ;;  %v768_v49 = vadd.f32 %v767_v26, %v1467_v61 }
 0x14a   : > { %v947_v42 = vadd.f32 %v946_v48, %v916_v47  ;;  %v879_v55 = vadd.f32 %v878_v30, %v1472_v3 }
 0x14b   : > { %v837_v51 = vadd.f32 %v836_v35, %v806_v53  ;;  %v769_v34 = vadd.f32 %v768_v49, %v1477_v12 }
 0x14c   : > { %v948_v56 = vadd.f32 %v947_v42, %v917_v57  ;;  %v880_v62 = vadd.f32 %v879_v55, %v1482_v17 }
 0x14d   : > { %v838_v0 = vadd.f32 %v837_v51, %v807_v59  ;;  %v770_v61 = vadd.f32 %v769_v34, %v1487_v22 }
 0x14e   : > { %v949_v38 = vadd.f32 %v948_v56, %v918_v36  ;;  %v881_v3 = vadd.f32 %v880_v62, %v1492_v28  ;;  %v811_v28 = vmul.f32 %v1517_v7, %v1517_v7 }
 0x14f   : > { %v839_v4 = vadd.f32 %v838_v0, %v808_v1  ;;  %v771_v12 = vadd.f32 %v770_v61, %v1497_v40  ;;  %v921_v40 = vmul.f32 %v1512_v60, %v1512_v60 }
 0x150   : > { %v950_v5 = vadd.f32 %v949_v38, %v919_v2  ;;  %v882_v17 = vadd.f32 %v881_v3, %v1502_v46 }
 0x151   : > { %v840_v50 = vadd.f32 %v839_v4, %v809_v43  ;;  %v772_v22 = vadd.f32 %v771_v12, %v1507_v52 }
 0x152   : > { %v951_v11 = vadd.f32 %v950_v5, %v920_v8  ;;  %v883_v54 = vadd.f32 %v882_v17, %v1512_v60  ;;  %v923_v60 = vmul.f32 %v1532_v27, %v1532_v27 }
 0x153   : > { %v841_v16 = vadd.f32 %v840_v50, %v810_v9  ;;  %v773_v46 = vadd.f32 %v772_v22, %v1517_v7 }
 0x154   : > { %v952_v58 = vadd.f32 %v951_v11, %v921_v40  ;;  %v884_v18 = vadd.f32 %v883_v54, %v1522_v13 }
 0x155   : > { %v842_v52 = vadd.f32 %v841_v16, %v811_v28  ;;  %v774_v21 = vadd.f32 %v773_v46, %v1527_v20 }
 0x156   : > { %v953_v23 = vadd.f32 %v952_v58, %v922_v15  ;;  %v885_v24 = vadd.f32 %v884_v18, %v1532_v27 }
 0x157   : > { %v775_v6 = vrot.slane %v774_v21, 4  ;;  %v843_v25 = vadd.f32 %v842_v52, %v812_v63 }
 0x158   : > { %v886_v29 = vrot.slane %v885_v24, 4  ;;  %v954_v7 = vadd.f32 %v953_v23, %v923_v60 }
 0x159   : > { %v776_v10 = vadd.f32 %v775_v6, %v774_v21  ;;  %v844_v31 = vrot.slane %v843_v25, 4 }
 0x15a   : > { %v887_v13 = vadd.f32 %v886_v29, %v885_v24  ;;  %v955_v32 = vrot.slane %v954_v7, 4 }
 0x15b   : > { %v777_v14 = vrot.slane %v776_v10, 2  ;;  %v845_v33 = vadd.f32 %v844_v31, %v843_v25 }
 0x15c   : > { %v888_v37 = vrot.slane %v887_v13, 2  ;;  %v956_v20 = vadd.f32 %v955_v32, %v954_v7 }
 0x15d   : > { %v778_v19 = vadd.f32 %v777_v14, %v776_v10  ;;  %v846_v39 = vrot.slane %v845_v33, 2 }
 0x15e   : > { %v889_v41 = vadd.f32 %v888_v37, %v887_v13  ;;  %v957_v26 = vrot.slane %v956_v20, 2 }
 0x15f   : > { %v779_v27 = vrot.slane %v778_v19, 1  ;;  %v847_v44 = vadd.f32 %v846_v39, %v845_v33 }
 0x160   : > { %v890_v45 = vrot.slane %v889_v41, 1  ;;  %v958_v30 = vadd.f32 %v957_v26, %v956_v20 }
 0x161   : > { %v848_v47 = vrot.slane %v847_v44, 1  ;;  %v780_v35 = vadd.f32 %v779_v27, %v778_v19 }
 0x162   : > { %v959_v48 = vrot.slane %v958_v30, 1  ;;  %v891_v53 = vadd.f32 %v890_v45, %v889_v41 }
 0x163   : > { %v849_v49 = vadd.f32 %v848_v47, %v847_v44 }
 0x164   : > { %v960_v42 = vadd.f32 %v959_v48, %v958_v30 }
 0x165   : > { %v851_v55 = vsel %vm850_vm0, %v780_v35, %v849_v49 }
 0x166   : > { %v853_v57 = vsel %vm852_vm1, %v851_v55, 0.0  ;;  %v961_v51 = vsel %vm850_vm0, %v891_v53, %v960_v42 }
 0x167   : > { %854 = vst [vmem:[%s257_s21] sm:$0xff] %v853_v57  ;;  %v962_v34 = vsel %vm852_vm1, %v961_v51, 0.0 }
 0x168   : > { %963 = vst [vmem:[%s261_s25] sm:$0xff] %v962_v34 }
 0x169 PF: > { %s16_s18 = sadd.s32 1, %s1234_s18  }
 0x16a   : > { %p13_p5 = scmp.ge.s32.totalorder %s16_s18, 4  }
 0x16c   :  { %15 = sbr.rel (!%p13_p5) target bundleno = 1 (0x1), region = 94 }

// kernel: bottleneck_forward.5
= control target key start
LH: loop header
LB: loop body
LE: loop exit
PB: predicated region body
PF: predicated region fallthrough
CT: control target
= control target key end

     0   :  { %s3243_s18 = smov 0   ;;  %s4321_s0 = inlined_call_operand.vmem [shape: f32[2,256,128], index: 0, kind: input, shape index: {}]   ;;  %s4322_s1 = inlined_call_operand.vmem [shape: f32[1,128], index: 1, kind: input, shape index: {}]   ;;  %s4323_s2 = inlined_call_operand.vmem [shape: f32[1,128], index: 2, kind: input, shape index: {}]   ;;  %s4324_s3 = inlined_call_operand.vmem [shape: bf16[1152,128], index: 3, kind: input, shape index: {}]   ;;  %s4325_s4 = inlined_call_operand.vmem [shape: f32[2,256,128], index: 4, kind: output, shape index: {0}]   ;;  %s4326_s5 = inlined_call_operand.vmem [shape: f32[2,8,128], index: 5, kind: output, shape index: {1}]  }
   0x1 LB: > { %s2498_s19 = sadd.s32 4294967295, %s3210_s18   ;;  %p2502_p0 = scmp.ge.s32.totalorder %s3210_s18, 1  ;;  %s3210_s18 = sphi %s3243_s18, %s16_s18  }
   0x2   : > { %p190_p1 = scmp.lt.s32.totalorder %s3210_s18, 3 }
   0x4   : > { %p191_p2 = pnand %p2502_p0, %p190_p1 }
   0x5   : > { %v3131_v0 = vld [vmem:[%s4324_s3 + $0x40] sm:$0xff] (!%p191_p2)   ;;  %v3212_v2 = vmov (!%p191_p2), 0.0   ;;  %v3133_v3 = vld [vmem:[%s4324_s3 + $0x48] sm:$0xff] (!%p191_p2)   ;;  %p222_p3 = scmp.lt.s32.totalorder (!%p191_p2), %s2498_s19, 1  ;;  %v3135_v5 = vld [vmem:[%s4324_s3 + $0x50] sm:$0xff] (!%p191_p2)   ;;  %vm2407_vm0 = vcmask (!%p191_p2), 1040384  }
   0x6   : > { %194 = sbr.rel (%p191_p2) target bundleno = 559 (0x22f), region = 36  ;;  %v3132_v1 = vld [vmem:[%s4324_s3] sm:$0xff] (!%p191_p2)   ;;  %379 = vst [vmem:[#allocation2] sm:$0xff] (!%p191_p2), %v3212_v2  ;;  %380 = vst [vmem:[#allocation2 + $0x8] sm:$0xff] (!%p191_p2), %v3212_v2  ;;  %2586 = vmatprep.subr.bf16.mxu0 (!%p191_p2), %v3131_v0  ;;  %3106 = vmatprep.subr.bf16.mxu1 (!%p191_p2), %v3131_v0  ;;  %v3134_v4 = vld [vmem:[%s4324_s3 + $0x8] sm:$0xff] (!%p191_p2)   ;;  %vm2409_vm1 = vcmask (!%p191_p2), 1041408  }
   0x7   : > { %381 = vst [vmem:[#allocation2 + $0x10] sm:$0x3] (!%p191_p2), %v3212_v2  ;;  %383 = vst [vmem:[#allocation2 + $0x198] sm:$0xff] (!%p191_p2), %v3212_v2  ;;  %2587 = vmatpush3.bf16.msra.mxu0 (!%p191_p2), %v3132_v1  ;;  %3114 = vmatpush3.bf16.msra.mxu1 (!%p191_p2), %v3132_v1  ;;  %v3136_v6 = vld [vmem:[%s4324_s3 + $0x10] sm:$0xff] (!%p191_p2)   ;;  %v3137_v7 = vld [vmem:[%s4324_s3 + $0x58] sm:$0xff] (!%p191_p2)  }
   0x8   : > { %384 = vst [vmem:[#allocation2 + $0x1a0] sm:$0xff] (!%p191_p2), %v3212_v2  ;;  %385 = vst [vmem:[#allocation2 + $0x1a8] sm:$0x3] (!%p191_p2), %v3212_v2  ;;  %2588 = vmatprep.subr.bf16.mxu0 (!%p191_p2), %v3133_v3  ;;  %3107 = vmatprep.subr.bf16.mxu1 (!%p191_p2), %v3133_v3  ;;  %v3138_v8 = vld [vmem:[%s4324_s3 + $0x18] sm:$0xff] (!%p191_p2)   ;;  %v3139_v9 = vld [vmem:[%s4324_s3 + $0x60] sm:$0xff] (!%p191_p2)  }
   0x9   : > { %387 = vst [vmem:[#allocation2 + $0x18] sm:$0x1] (!%p191_p2), %v3212_v2  ;;  %388 = vst [vmem:[#allocation2 + $0x30] sm:$0x1] (!%p191_p2), %v3212_v2  ;;  %v3140_v10 = vld [vmem:[%s4324_s3 + $0x20] sm:$0xff] (!%p191_p2)   ;;  %v3141_v11 = vld [vmem:[%s4324_s3 + $0x68] sm:$0xff] (!%p191_p2)  }
   0xa   : > { %389 = vst [vmem:[#allocation2 + $0x48] sm:$0x1] (!%p191_p2), %v3212_v2  ;;  %390 = vst [vmem:[#allocation2 + $0x60] sm:$0x1] (!%p191_p2), %v3212_v2  ;;  %v3345_v17 = vld [vmem:[%s4322_s1] ss:$0 sm:$0xff] (!%p191_p2) }
   0xb   : > { %391 = vst [vmem:[#allocation2 + $0x78] sm:$0x1] (!%p191_p2), %v3212_v2  ;;  %392 = vst [vmem:[#allocation2 + $0x90] sm:$0x1] (!%p191_p2), %v3212_v2  ;;  %2589 = vmatpush3.bf16.msra.mxu0 (!%p191_p2), %v3134_v4  ;;  %3115 = vmatpush3.bf16.msra.mxu1 (!%p191_p2), %v3134_v4  ;;  %v3350_v18 = vld [vmem:[%s4323_s2] ss:$0 sm:$0xff] (!%p191_p2) }
   0xc   : > { %393 = vst [vmem:[#allocation2 + $0xa8] sm:$0x1] (!%p191_p2), %v3212_v2  ;;  %394 = vst [vmem:[#allocation2 + $0xc0] sm:$0x1] (!%p191_p2), %v3212_v2  ;;  %2590 = vmatprep.subr.bf16.mxu0 (!%p191_p2), %v3135_v5  ;;  %3108 = vmatprep.subr.bf16.mxu1 (!%p191_p2), %v3135_v5  ;;  %v3142_v21 = vld [vmem:[%s4324_s3 + $0x28] sm:$0xff] (!%p191_p2)   ;;  %v3143_v22 = vld [vmem:[%s4324_s3 + $0x70] sm:$0xff] (!%p191_p2)  }
   0xd   : > { %395 = vst [vmem:[#allocation2 + $0xd8] sm:$0x1] %v3212_v2  ;;  %396 = vst [vmem:[#allocation2 + $0xf0] sm:$0x1] %v3212_v2  ;;  %s4328_s19 = smov (!%p222_p3, %s2498_s19), 1  ;;  %v503_v12 = vld [vmem:[#allocation2 + $0x1] sm:$0xff] }
   0xe   : > { %397 = vst [vmem:[#allocation2 + $0x108] sm:$0x1] %v3212_v2  ;;  %398 = vst [vmem:[#allocation2 + $0x120] sm:$0x1] %v3212_v2  ;;  %s2584_s9 = sshll.u32 %s4328_s19, 8  ;;  %v504_v13 = vld [vmem:[#allocation2 + $0x9] sm:$0xff] }
   0xf   : > { %399 = vst [vmem:[#allocation2 + $0x138] sm:$0x1] %v3212_v2  ;;  %400 = vst [vmem:[#allocation2 + $0x150] sm:$0x1] %v3212_v2  ;;  %2591 = vmatpush3.bf16.msra.mxu0 %v3136_v6  ;;  %3116 = vmatpush3.bf16.msra.mxu1 %v3136_v6  ;;  %s3332_s16 = scalar_lea.vmem %s4321_s0, %s2584_s9  ;;  %v535_v15 = vpack.c.bf16 %v504_v13, %v503_v12  ;;  %v3144_v25 = vld [vmem:[%s4324_s3 + $0x30] sm:$0xff]   ;;  %v3145_v28 = vld [vmem:[%s4324_s3 + $0x78] sm:$0xff]   ;;  %s4230_s24 = scalar_lea.vmem %s4325_s4, %s2584_s9 }
  0x10   : > { %401 = vst [vmem:[#allocation2 + $0x168] sm:$0x1] %v3212_v2  ;;  %402 = vst [vmem:[#allocation2 + $0x180] sm:$0x1] %v3212_v2  ;;  %2592 = vmatprep.subr.bf16.mxu0 %v3137_v7  ;;  %3109 = vmatprep.subr.bf16.mxu1 %v3137_v7  ;;  %v259_v14 = vld [vmem:[%s3332_s16 + $0xb0] sm:$0xff]  ;;  %v260_v16 = vld [vmem:[%s3332_s16 + $0xb8] sm:$0xff] }
  0x11   : > { %405 = vst [vmem:[#allocation2 + $0x29] sm:$0x1] %v3212_v2  ;;  %406 = vst [vmem:[#allocation2 + $0x41] sm:$0x1] %v3212_v2  ;;  %v298_v19 = vmul.f32 %v3345_v17, %v259_v14  ;;  %v299_v20 = vmul.f32 %v3345_v17, %v260_v16  ;;  %1496 = vmatprep.mubr.bf16.mxu0 %v535_v15  ;;  %v237_v30 = vld [vmem:[%s3332_s16] sm:$0xff]  ;;  %v238_v31 = vld [vmem:[%s3332_s16 + $0x8] sm:$0xff] }
  0x12   : > { %407 = vst [vmem:[#allocation2 + $0x59] sm:$0x1] %v3212_v2  ;;  %408 = vst [vmem:[#allocation2 + $0x71] sm:$0x1] %v3212_v2  ;;  %v3146_v32 = vld [vmem:[%s4324_s3 + $0x38] sm:$0xff]   ;;  %v276_v33 = vmul.f32 %v3345_v17, %v237_v30  ;;  %v277_v34 = vmul.f32 %v3345_v17, %v238_v31  ;;  %v261_v35 = vld [vmem:[%s3332_s16 + $0xc0] sm:$0xff] }
  0x13   : > { %409 = vst [vmem:[#allocation2 + $0x89] sm:$0x1] %v3212_v2  ;;  %410 = vst [vmem:[#allocation2 + $0xa1] sm:$0x1] %v3212_v2  ;;  %2593 = vmatpush3.bf16.msra.mxu0 %v3138_v8  ;;  %3117 = vmatpush3.bf16.msra.mxu1 %v3138_v8  ;;  %v337_v23 = vadd.f32 %v3350_v18, %v298_v19  ;;  %v338_v24 = vadd.f32 %v3350_v18, %v299_v20  ;;  %v262_v36 = vld [vmem:[%s3332_s16 + $0xc8] sm:$0xff]  ;;  %v3147_v40 = vld [vmem:[%s4324_s3 + $0xc0] sm:$0xff]  }
  0x14   : > { %411 = vst [vmem:[#allocation2 + $0xb9] sm:$0x1] %v3212_v2  ;;  %412 = vst [vmem:[#allocation2 + $0xd1] sm:$0x1] %v3212_v2  ;;  %2594 = vmatprep.subr.bf16.mxu0 %v3139_v9  ;;  %3110 = vmatprep.subr.bf16.mxu1 %v3139_v9  ;;  %v300_v38 = vmul.f32 %v3345_v17, %v261_v35  ;;  %v301_v39 = vmul.f32 %v3345_v17, %v262_v36  ;;  %v3148_v43 = vld [vmem:[%s4324_s3 + $0x140] sm:$0xff]   ;;  %v3151_v51 = vld [vmem:[%s4324_s3 + $0xc8] sm:$0xff]  }
  0x15   : > { %413 = vst [vmem:[#allocation2 + $0xe9] sm:$0x1] %v3212_v2  ;;  %414 = vst [vmem:[#allocation2 + $0x101] sm:$0x1] %v3212_v2  ;;  %v369_v26 = vmax.f32 %v337_v23, 0.0  ;;  %v370_v27 = vmax.f32 %v338_v24, 0.0  ;;  %v315_v41 = vadd.f32 %v3350_v18, %v276_v33  ;;  %v316_v42 = vadd.f32 %v3350_v18, %v277_v34 }
  0x16   : > { %415 = vst [vmem:[#allocation2 + $0x119] sm:$0x1] %v3212_v2  ;;  %416 = vst [vmem:[#allocation2 + $0x131] sm:$0x1] %v3212_v2  ;;  %v339_v44 = vadd.f32 %v3350_v18, %v300_v38  ;;  %v340_v45 = vadd.f32 %v3350_v18, %v301_v39  ;;  %v3149_v46 = vld [vmem:[%s4324_s3 + $0x80] sm:$0xff]   ;;  %v3156_v58 = vld [vmem:[%s4324_s3 + $0x148] sm:$0xff]  }
  0x17   : > { %417 = vst [vmem:[#allocation2 + $0x149] sm:$0x1] %v3212_v2  ;;  %418 = vst [vmem:[#allocation2 + $0x161] sm:$0x1] %v3212_v2  ;;  %2595 = vmatpush3.bf16.msra.mxu0 %v3140_v10  ;;  %3118 = vmatpush3.bf16.msra.mxu1 %v3140_v10  ;;  %v547_v29 = vpack.c.bf16 %v370_v27, %v369_v26  ;;  %v3150_v47 = vld [vmem:[%s4324_s3 + $0x100] sm:$0xff]   ;;  %v347_v48 = vmax.f32 %v315_v41, 0.0 }
  0x18   : > { %419 = vst [vmem:[#allocation2 + $0x179] sm:$0x1] %v3212_v2  ;;  %420 = vst [vmem:[#allocation2 + $0x191] sm:$0x1] %v3212_v2  ;;  %2596 = vmatprep.subr.bf16.mxu0 %v3141_v11  ;;  %3111 = vmatprep.subr.bf16.mxu1 %v3141_v11  ;;  %v348_v49 = vmax.f32 %v316_v42, 0.0  ;;  %v371_v52 = vmax.f32 %v339_v44, 0.0 }
  0x19   : > { %404 = vst [vmem:[#allocation2 + $0x11] sm:$0x1] %v3212_v2  ;;  %386 = vst [vmem:[#allocation2] sm:$0x1] %v3212_v2  ;;  %1592 = vmatprep.mubr.bf16.mxu1 %v547_v29  ;;  %v372_v53 = vmax.f32 %v340_v45, 0.0  ;;  %v239_v59 = vld [vmem:[%s3332_s16 + $0x10] sm:$0xff] }
  0x1a   : > { %403 = vst [vmem:[#allocation2 + $0x198] sm:$0x1] %v3212_v2  ;;  %421 = vst [vmem:[#allocation2 + $0x1a9] sm:$0x1] %v3212_v2  ;;  %v3399_v57 = vpack.c.bf16 %v348_v49, %v347_v48  ;;  %v240_v61 = vld [vmem:[%s3332_s16 + $0x18] sm:$0xff]  ;;  %v278_v62 = vmul.f32 %v3345_v17, %v239_v59  ;;  %v263_v63 = vld [vmem:[%s3332_s16 + $0xd0] sm:$0xff] }
  0x1b   : > { %2597 = vmatpush3.bf16.msra.mxu0 %v3142_v21  ;;  %3119 = vmatpush3.bf16.msra.mxu1 %v3142_v21  ;;  %445 = vst [vmem:[#allocation2 + $0x121] sm:$0xff] %v369_v26  ;;  %446 = vst [vmem:[#allocation2 + $0x129] sm:$0xff] %v370_v27  ;;  %v548_v60 = vpack.c.bf16 %v372_v53, %v371_v52  ;;  %v264_v0 = vld [vmem:[%s3332_s16 + $0xd8] sm:$0xff]  ;;  %v3152_v1 = vld [vmem:[%s4324_s3 + $0x88] sm:$0xff]   ;;  %v302_v3 = vmul.f32 %v3345_v17, %v263_v63  ;;  %s2507_s9 = sshll.u32 %s4328_s19, 3 }
  0x1c   : > { %2598 = vmatprep.subr.bf16.mxu0 %v3143_v22  ;;  %3112 = vmatprep.subr.bf16.mxu1 %v3143_v22  ;;  %423 = vst [vmem:[#allocation2 + $0x19] sm:$0xff] %v347_v48  ;;  %424 = vst [vmem:[#allocation2 + $0x21] sm:$0xff] %v348_v49  ;;  %v303_v4 = vmul.f32 %v3345_v17, %v264_v0  ;;  %v3158_v5 = vld [vmem:[%s4324_s3 + $0x108] sm:$0xff]   ;;  %v317_v6 = vadd.f32 %v3350_v18, %v278_v62  ;;  %v3153_v7 = vld [vmem:[%s4324_s3 + $0xd0] sm:$0xff]   ;;  %s235_s27 = scalar_lea.vmem %s4326_s5, %s2507_s9 }
  0x1d   : > { %447 = vst [vmem:[#allocation2 + $0x139] sm:$0xff] %v371_v52  ;;  %448 = vst [vmem:[#allocation2 + $0x141] sm:$0xff] %v372_v53  ;;  %v341_v9 = vadd.f32 %v3350_v18, %v302_v3  ;;  %v3154_v11 = vld [vmem:[%s4324_s3 + $0x90] sm:$0xff]   ;;  %v3155_v15 = vld [vmem:[%s4324_s3 + $0xd8] sm:$0xff]  }
  0x1e   : > { %v342_v10 = vadd.f32 %v3350_v18, %v303_v4  ;;  %v349_v12 = vmax.f32 %v317_v6, 0.0  ;;  %v241_v21 = vld [vmem:[%s3332_s16 + $0x20] sm:$0xff]  ;;  %v3157_v33 = vld [vmem:[%s4324_s3 + $0x98] sm:$0xff]   ;;  %v3164_v38 = vld [vmem:[%s4324_s3 + $0x150] sm:$0xff]  }
  0x1f   : > { %2599 = vmatpush3.bf16.msra.mxu0 %v3144_v25  ;;  %3120 = vmatpush3.bf16.msra.mxu1 %v3144_v25  ;;  %v373_v19 = vmax.f32 %v341_v9, 0.0  ;;  %v242_v25 = vld [vmem:[%s3332_s16 + $0x28] sm:$0xff]  ;;  %v280_v26 = vmul.f32 %v3345_v17, %v241_v21  ;;  %v265_v31 = vld [vmem:[%s3332_s16 + $0xe0] sm:$0xff]  ;;  %v3166_v44 = vld [vmem:[%s4324_s3 + $0x110] sm:$0xff]  }
  0x20   : > { %v455_v37 = vld [vmem:[#allocation2] sm:$0xff]  ;;  %2600 = vmatprep.subr.bf16.mxu0 %v3145_v28  ;;  %3113 = vmatprep.subr.bf16.mxu1 %v3145_v28  ;;  %v374_v20 = vmax.f32 %v342_v10, 0.0  ;;  %425 = vst [vmem:[#allocation2 + $0x31] sm:$0xff] %v349_v12  ;;  %v281_v30 = vmul.f32 %v3345_v17, %v242_v25  ;;  %v304_v35 = vmul.f32 %v3345_v17, %v265_v31  ;;  %v244_v59 = vld [vmem:[%s3332_s16 + $0x38] sm:$0xff]  ;;  %v3162_v62 = vld [vmem:[%s4324_s3 + $0xa8] sm:$0xff]  }
  0x21   : > { %v487_v50 = vpack.c.bf16 %v3212_v2, %v455_v37  ;;  %v279_v2 = vmul.f32 %v3345_v17, %v240_v61  ;;  %449 = vst [vmem:[#allocation2 + $0x151] sm:$0xff] %v373_v19  ;;  %v319_v34 = vadd.f32 %v3350_v18, %v280_v26  ;;  %v3159_v39 = vld [vmem:[%s4324_s3 + $0xe0] sm:$0xff]   ;;  %v283_v61 = vmul.f32 %v3345_v17, %v244_v59  ;;  %v3163_v63 = vld [vmem:[%s4324_s3 + $0xf0] sm:$0xff]   ;;  %v3171_v3 = vld [vmem:[%s4324_s3 + $0x158] sm:$0xff]  }
  0x22   : > { %v479_v54 = vld [vmem:[#allocation2 + $0x120] sm:$0xff]  ;;  %v480_v55 = vld [vmem:[#allocation2 + $0x128] sm:$0xff]  ;;  %450 = vst [vmem:[#allocation2 + $0x159] sm:$0xff] %v374_v20  ;;  %v549_v29 = vpack.c.bf16 %v374_v20, %v373_v19  ;;  %v320_v37 = vadd.f32 %v3350_v18, %v281_v30  ;;  %v343_v41 = vadd.f32 %v3350_v18, %v304_v35  ;;  %v3167_v19 = vld [vmem:[%s4324_s3 + $0xf8] sm:$0xff]  }
  0x23   : > { %2601 = vmatpush3.bf16.msra.mxu0 %v3146_v32  ;;  %3121 = vmatpush3.bf16.msra.mxu1 %v3146_v32  ;;  %v499_v56 = vpack.c.bf16 %v480_v55, %v479_v54  ;;  %v318_v8 = vadd.f32 %v3350_v18, %v279_v2  ;;  %v457_v13 = vld [vmem:[#allocation2 + $0x18] sm:$0xff]  ;;  %v458_v14 = vld [vmem:[#allocation2 + $0x20] sm:$0xff]  ;;  %v266_v32 = vld [vmem:[%s3332_s16 + $0xe8] sm:$0xff] }
  0x24   : > { %2698 = vmatprep.subr.bf16.mxu1 %v3147_v40  ;;  %2810 = vmatprep.subr.bf16.mxu0 %v3148_v43  ;;  %v3433_v22 = vpack.c.bf16 %v458_v14, %v457_v13  ;;  %v481_v23 = vld [vmem:[#allocation2 + $0x138] sm:$0xff]  ;;  %v482_v24 = vld [vmem:[#allocation2 + $0x140] sm:$0xff]  ;;  %v305_v36 = vmul.f32 %v3345_v17, %v266_v32  ;;  %v351_v40 = vmax.f32 %v319_v34, 0.0  ;;  %v352_v43 = vmax.f32 %v320_v37, 0.0  ;;  %v3161_v55 = vld [vmem:[%s4324_s3 + $0xe8] sm:$0xff]  }
  0x25   : > { %v350_v16 = vmax.f32 %v318_v8, 0.0  ;;  %v3437_v27 = vpack.c.bf16 %v482_v24, %v481_v23  ;;  %v3160_v45 = vld [vmem:[%s4324_s3 + $0xa0] sm:$0xff]   ;;  %v3165_v13 = vld [vmem:[%s4324_s3 + $0xb0] sm:$0xff]   ;;  %v248_v23 = vld [vmem:[%s3332_s16 + $0x58] sm:$0xff] }
  0x26   : > { %1497 = vmatmul.mubr.bf16.vlgmr.msra.gmra.mrb[0].mxu0 %v487_v50  ;;  %1593 = vmatmul.mubr.bf16.vlgmr.msra.gmra.mrb[0].mxu1 %v499_v56  ;;  %v344_v42 = vadd.f32 %v3350_v18, %v305_v36  ;;  %427 = vst [vmem:[#allocation2 + $0x49] sm:$0xff] %v351_v40  ;;  %428 = vst [vmem:[#allocation2 + $0x51] sm:$0xff] %v352_v43  ;;  %v3468_v52 = vpack.c.bf16 %v352_v43, %v351_v40  ;;  %v247_v21 = vld [vmem:[%s3332_s16 + $0x50] sm:$0xff]  ;;  %v3168_v24 = vld [vmem:[%s4324_s3 + $0xb8] sm:$0xff]  }
  0x27   : > { %2699 = vmatpush3.bf16.msra.mxu1 %v3149_v46  ;;  %2811 = vmatpush3.bf16.msra.mxu0 %v3150_v47  ;;  %426 = vst [vmem:[#allocation2 + $0x39] sm:$0xff] %v350_v16  ;;  %v3439_v28 = vpack.c.bf16 %v350_v16, %v349_v12  ;;  %v375_v46 = vmax.f32 %v343_v41, 0.0  ;;  %v459_v48 = vld [vmem:[#allocation2 + $0x30] sm:$0xff]  ;;  %v551_v25 = vld [vmem:[#allocation2 + $0x2] sm:$0xff]  ;;  %v286_v30 = vmul.f32 %v3345_v17, %v247_v21 }
  0x28   : > { %2700 = vmatprep.subr.bf16.mxu1 %v3151_v51  ;;  %1504 = vmatprep.mubr.bf16.mxu0 %v3399_v57  ;;  %v376_v47 = vmax.f32 %v344_v42, 0.0  ;;  %v483_v50 = vld [vmem:[#allocation2 + $0x150] sm:$0xff]  ;;  %v287_v31 = vmul.f32 %v3345_v17, %v248_v23  ;;  %v3169_v34 = vld [vmem:[%s4324_s3 + $0x1c0] sm:$0xff]   ;;  %v250_v43 = vld [vmem:[%s3332_s16 + $0x68] sm:$0xff] }
  0x29   : > { %1600 = vmatprep.mubr.bf16.mxu1 %v548_v60  ;;  %2812 = vmatprep.subr.bf16.mxu0 %v3156_v58  ;;  %v484_v51 = vld [vmem:[#allocation2 + $0x158] sm:$0xff]  ;;  %451 = vst [vmem:[#allocation2 + $0x169] sm:$0xff] %v375_v46  ;;  %v243_v58 = vld [vmem:[%s3332_s16 + $0x30] sm:$0xff]  ;;  %v3533_v36 = vadd.f32 %v3350_v18, %v286_v30  ;;  %v249_v42 = vld [vmem:[%s3332_s16 + $0x60] sm:$0xff] }
  0x2a   : > { %452 = vst [vmem:[#allocation2 + $0x171] sm:$0xff] %v376_v47  ;;  %v3472_v54 = vpack.c.bf16 %v484_v51, %v483_v50  ;;  %v550_v56 = vpack.c.bf16 %v376_v47, %v375_v46  ;;  %v282_v60 = vmul.f32 %v3345_v17, %v243_v58  ;;  %v552_v26 = vld [vmem:[#allocation2 + $0xa] sm:$0xff]  ;;  %v326_v37 = vadd.f32 %v3350_v18, %v287_v31  ;;  %v553_v51 = vld [vmem:[#allocation2 + $0x1a] sm:$0xff] }
  0x2b   : > { %2701 = vmatpush3.bf16.msra.mxu1 %v3152_v1  ;;  %2813 = vmatpush3.bf16.msra.mxu0 %v3158_v5  ;;  %v322_v1 = vadd.f32 %v3350_v18, %v283_v61  ;;  %v357_v40 = vmax.f32 %v3533_v36, 0.0  ;;  %v583_v46 = vpack.c.bf16 %v552_v26, %v551_v25  ;;  %v289_v47 = vmul.f32 %v3345_v17, %v250_v43  ;;  %v3177_v59 = vld [vmem:[%s4324_s3 + $0x168] sm:$0xff]   ;;  %v252_v61 = vld [vmem:[%s3332_s16 + $0x78] sm:$0xff]  ;;  %v3180_v23 = vld [vmem:[%s4324_s3 + $0x190] sm:$0xff]  }
  0x2c   : > { %2702 = vmatprep.subr.bf16.mxu1 %v3153_v7  ;;  %2814 = vmatprep.subr.bf16.mxu0 %v3164_v38  ;;  %v321_v0 = vadd.f32 %v3350_v18, %v282_v60  ;;  %v3172_v7 = vld [vmem:[%s4324_s3 + $0x118] sm:$0xff]   ;;  %v358_v41 = vmax.f32 %v326_v37, 0.0  ;;  %v251_v60 = vld [vmem:[%s3332_s16 + $0x70] sm:$0xff] }
  0x2d   : > { %v461_v2 = vld [vmem:[#allocation2 + $0x48] sm:$0xff]  ;;  %v462_v4 = vld [vmem:[#allocation2 + $0x50] sm:$0xff]  ;;  %v354_v6 = vmax.f32 %v322_v1, 0.0  ;;  %433 = vst [vmem:[#allocation2 + $0x91] sm:$0xff] %v357_v40  ;;  %v3559_v58 = vadd.f32 %v3350_v18, %v289_v47  ;;  %v3183_v43 = vld [vmem:[%s4324_s3 + $0x1d8] sm:$0xff]  }
  0x2e   : > { %1505 = vmatmul.mubr.bf16.gmra.mrb[4].mxu0 %v3433_v22  ;;  %1601 = vmatmul.mubr.bf16.gmra.mrb[4].mxu1 %v3437_v27  ;;  %v460_v49 = vld [vmem:[#allocation2 + $0x38] sm:$0xff]  ;;  %v353_v5 = vmax.f32 %v321_v0, 0.0  ;;  %v3498_v8 = vpack.c.bf16 %v462_v4, %v461_v2  ;;  %434 = vst [vmem:[#allocation2 + $0x99] sm:$0xff] %v358_v41  ;;  %v3178_v1 = vld [vmem:[%s4324_s3 + $0x128] sm:$0xff]   ;;  %v290_v2 = vmul.f32 %v3345_v17, %v251_v60  ;;  %v3181_v26 = vld [vmem:[%s4324_s3 + $0x170] sm:$0xff]  }
  0x2f   : > { %2703 = vmatpush3.bf16.msra.mxu1 %v3154_v11  ;;  %1512 = vmatprep.mubr.bf16.mxu0 %v3439_v28  ;;  %v3470_v53 = vpack.c.bf16 %v460_v49, %v459_v48  ;;  %v245_v11 = vld [vmem:[%s3332_s16 + $0x40] sm:$0xff]  ;;  %430 = vst [vmem:[#allocation2 + $0x69] sm:$0xff] %v354_v6  ;;  %v360_v0 = vmax.f32 %v3559_v58, 0.0  ;;  %v3176_v4 = vld [vmem:[%s4324_s3 + $0x188] sm:$0xff]   ;;  %v3601_v21 = vpack.c.bf16 %v358_v41, %v357_v40  ;;  %v3182_v30 = vld [vmem:[%s4324_s3 + $0x130] sm:$0xff]  }
  0x30   : > { %2704 = vmatprep.subr.bf16.mxu1 %v3155_v15  ;;  %1608 = vmatprep.mubr.bf16.mxu1 %v549_v29  ;;  %v485_v9 = vld [vmem:[#allocation2 + $0x168] sm:$0xff]  ;;  %429 = vst [vmem:[#allocation2 + $0x61] sm:$0xff] %v353_v5  ;;  %v3506_v14 = vpack.c.bf16 %v354_v6, %v353_v5  ;;  %v284_v16 = vmul.f32 %v3345_v17, %v245_v11  ;;  %v3170_v49 = vld [vmem:[%s4324_s3 + $0x180] sm:$0xff]   ;;  %v255_v31 = vld [vmem:[%s3332_s16 + $0x90] sm:$0xff] }
  0x31   : > { %2815 = vmatpush3.bf16.msra.mxu0 %v3166_v44  ;;  %v486_v10 = vld [vmem:[#allocation2 + $0x170] sm:$0xff]  ;;  %v246_v15 = vld [vmem:[%s3332_s16 + $0x48] sm:$0xff]  ;;  %436 = vst [vmem:[#allocation2 + $0xb1] sm:$0xff] %v360_v0  ;;  %v3584_v6 = vadd.f32 %v3350_v18, %v290_v2  ;;  %v253_v11 = vld [vmem:[%s3332_s16 + $0x80] sm:$0xff]  ;;  %v294_v36 = vmul.f32 %v3345_v17, %v255_v31 }
  0x32   : > { %2816 = vmatprep.subr.bf16.mxu0 %v3171_v3  ;;  %v3501_v12 = vpack.c.bf16 %v486_v10, %v485_v9  ;;  %v285_v20 = vmul.f32 %v3345_v17, %v246_v15  ;;  %v323_v29 = vadd.f32 %v3350_v18, %v284_v16  ;;  %v291_v3 = vmul.f32 %v3345_v17, %v252_v61  ;;  %v3179_v9 = vld [vmem:[%s4324_s3 + $0x1d0] sm:$0xff]   ;;  %v3185_v47 = vld [vmem:[%s4324_s3 + $0x178] sm:$0xff]  }
  0x33   : > { %2705 = vmatpush3.bf16.msra.mxu1 %v3157_v33  ;;  %v3173_v33 = vld [vmem:[%s4324_s3 + $0x160] sm:$0xff]   ;;  %v361_v16 = vmax.f32 %v3584_v6, 0.0  ;;  %v3636_v41 = vadd.f32 %v3350_v18, %v294_v36  ;;  %v557_v61 = vld [vmem:[#allocation2 + $0x4a] sm:$0xff] }
  0x34   : > { %2706 = vmatprep.subr.bf16.mxu1 %v3159_v39  ;;  %v324_v32 = vadd.f32 %v3350_v18, %v285_v20  ;;  %v355_v35 = vmax.f32 %v323_v29, 0.0  ;;  %v3175_v39 = vld [vmem:[%s4324_s3 + $0x120] sm:$0xff]   ;;  %v292_v20 = vmul.f32 %v3345_v17, %v253_v11 }
  0x35   : > { %2817 = vmatpush3.bf16.msra.mxu0 %v3172_v7  ;;  %v3587_v7 = vadd.f32 %v3350_v18, %v291_v3  ;;  %437 = vst [vmem:[#allocation2 + $0xc1] sm:$0xff] %v361_v16  ;;  %v3691_v3 = vld [vmem:[%s4324_s3 + $0x200] sm:$0xff]  }
  0x36   : > { %1513 = vmatmul.mubr.bf16.gmra.mrb[8].mxu0 %v3470_v53  ;;  %1609 = vmatmul.mubr.bf16.gmra.mrb[8].mxu1 %v3472_v54  ;;  %v356_v38 = vmax.f32 %v324_v32, 0.0  ;;  %431 = vst [vmem:[#allocation2 + $0x79] sm:$0xff] %v355_v35  ;;  %v3612_v25 = vadd.f32 %v3350_v18, %v292_v20  ;;  %v256_v32 = vld [vmem:[%s3332_s16 + $0x98] sm:$0xff]  ;;  %v3190_v20 = vld [vmem:[%s4324_s3 + $0x1e8] sm:$0xff]  }
  0x37   : > { %2707 = vmatpush3.bf16.msra.mxu1 %v3160_v45  ;;  %1520 = vmatprep.mubr.bf16.mxu0 %v3468_v52  ;;  %v463_v44 = vld [vmem:[#allocation2 + $0x60] sm:$0xff]  ;;  %v464_v45 = vld [vmem:[#allocation2 + $0x68] sm:$0xff]  ;;  %v295_v37 = vmul.f32 %v3345_v17, %v256_v32  ;;  %v3195_v32 = vld [vmem:[%s4324_s3 + $0x1b0] sm:$0xff]  }
  0x38   : > { %2708 = vmatprep.subr.bf16.mxu1 %v3161_v55  ;;  %1616 = vmatprep.mubr.bf16.mxu1 %v550_v56  ;;  %432 = vst [vmem:[#allocation2 + $0x81] sm:$0xff] %v356_v38  ;;  %v3545_v48 = vpack.c.bf16 %v464_v45, %v463_v44  ;;  %v3550_v50 = vpack.c.bf16 %v356_v38, %v355_v35  ;;  %v3174_v55 = vld [vmem:[%s4324_s3 + $0x1c8] sm:$0xff]   ;;  %v363_v35 = vmax.f32 %v3612_v25, 0.0  ;;  %v467_v38 = vld [vmem:[#allocation2 + $0x90] sm:$0xff]  ;;  %v3196_v25 = vld [vmem:[%s4324_s3 + $0x1f8] sm:$0xff]  }
  0x39   : > { %2818 = vmatprep.subr.bf16.mxu0 %v3173_v33  ;;  %v555_v33 = vld [vmem:[#allocation2 + $0x32] sm:$0xff]  ;;  %v559_v6 = vld [vmem:[#allocation2 + $0x62] sm:$0xff] }
  0x3a   : > { %2819 = vmatpush3.bf16.msra.mxu0 %v3175_v39  ;;  %v468_v39 = vld [vmem:[#allocation2 + $0x98] sm:$0xff]  ;;  %439 = vst [vmem:[#allocation2 + $0xd9] sm:$0xff] %v363_v35 }
  0x3b   : > { %2709 = vmatpush3.bf16.msra.mxu1 %v3162_v62  ;;  %v554_v62 = vld [vmem:[#allocation2 + $0x22] sm:$0xff]  ;;  %2820 = vmatprep.subr.bf16.mxu0 %v3177_v59  ;;  %v3649_v44 = vpack.c.bf16 %v468_v39, %v467_v38  ;;  %v268_v38 = vld [vmem:[%s3332_s16 + $0xf8] sm:$0xff] }
  0x3c   : > { %2710 = vmatprep.subr.bf16.mxu1 %v3163_v63  ;;  %v258_v59 = vld [vmem:[%s3332_s16 + $0xa8] sm:$0xff] }
  0x3d   : > { %v465_v5 = vld [vmem:[#allocation2 + $0x78] sm:$0xff]  ;;  %v297_v58 = vmul.f32 %v3345_v17, %v258_v59 }
  0x3e   : > { %1521 = vmatmul.mubr.bf16.gmra.mrb[12].mxu0 %v3498_v8  ;;  %1617 = vmatmul.mubr.bf16.gmra.mrb[12].mxu1 %v3501_v12 }
  0x3f   : > { %2711 = vmatpush3.bf16.msra.mxu1 %v3165_v13  ;;  %1528 = vmatprep.mubr.bf16.mxu0 %v3506_v14  ;;  %v466_v10 = vld [vmem:[#allocation2 + $0x80] sm:$0xff]  ;;  %v254_v13 = vld [vmem:[%s3332_s16 + $0x88] sm:$0xff]  ;;  %v3686_v2 = vadd.f32 %v3350_v18, %v297_v58 }
  0x40   : > { %2712 = vmatprep.subr.bf16.mxu1 %v3167_v19  ;;  %1657 = vmatprep.mubr.bf16.mxu1 %v3433_v22  ;;  %v288_v22 = vmul.f32 %v3345_v17, %v249_v42  ;;  %v3596_v15 = vpack.c.bf16 %v466_v10, %v465_v5  ;;  %v362_v19 = vmax.f32 %v3587_v7, 0.0  ;;  %v3639_v42 = vadd.f32 %v3350_v18, %v295_v37  ;;  %v3192_v7 = vld [vmem:[%s4324_s3 + $0x1a8] sm:$0xff]   ;;  %v267_v37 = vld [vmem:[%s3332_s16 + $0xf0] sm:$0xff] }
  0x41   : > { %2821 = vmatpush3.bf16.msra.mxu0 %v3178_v1  ;;  %v368_v5 = vmax.f32 %v3686_v2, 0.0  ;;  %v562_v36 = vld [vmem:[#allocation2 + $0x82] sm:$0xff]  ;;  %v306_v39 = vmul.f32 %v3345_v17, %v267_v37 }
  0x42   : > { %v3556_v56 = vadd.f32 %v3350_v18, %v288_v22  ;;  %438 = vst [vmem:[#allocation2 + $0xc9] sm:$0xff] %v362_v19  ;;  %2822 = vmatprep.subr.bf16.mxu0 %v3181_v26  ;;  %v366_v22 = vmax.f32 %v3639_v42, 0.0  ;;  %v564_v42 = vld [vmem:[#allocation2 + $0x9a] sm:$0xff] }
  0x43   : > { %2713 = vmatpush3.bf16.msra.mxu1 %v3168_v24  ;;  %v293_v24 = vmul.f32 %v3345_v17, %v254_v13  ;;  %v3707_v13 = vpack.c.bf16 %v362_v19, %v361_v16  ;;  %444 = vst [vmem:[#allocation2 + $0x111] sm:$0xff] %v368_v5  ;;  %v471_v16 = vld [vmem:[#allocation2 + $0xc0] sm:$0xff] }
  0x44   : > { %2922 = vmatprep.subr.bf16.mxu1 %v3169_v34  ;;  %v359_v63 = vmax.f32 %v3556_v56, 0.0  ;;  %v556_v34 = vld [vmem:[#allocation2 + $0x3a] sm:$0xff]  ;;  %442 = vst [vmem:[#allocation2 + $0xf9] sm:$0xff] %v366_v22 }
  0x45   : > { %v3618_v29 = vadd.f32 %v3350_v18, %v293_v24  ;;  %2823 = vmatpush3.bf16.msra.mxu0 %v3182_v30  ;;  %v3651_v45 = vpack.c.bf16 %v556_v34, %v555_v33  ;;  %v3193_v24 = vld [vmem:[%s4324_s3 + $0x1f0] sm:$0xff]   ;;  %v473_v33 = vld [vmem:[#allocation2 + $0xd8] sm:$0xff] }
  0x46   : > { %1529 = vmatmul.mubr.bf16.gmra.mrb[16].mxu0 %v3545_v48  ;;  %1658 = vmatmul.mubr.bf16.vlgmr.msra.gmra.mrb[16].mxu1 %v583_v46  ;;  %435 = vst [vmem:[#allocation2 + $0xa9] sm:$0xff] %v359_v63  ;;  %v365_v46 = vmax.f32 %v3636_v41, 0.0  ;;  %v561_v34 = vld [vmem:[#allocation2 + $0x7a] sm:$0xff] }
  0x47   : > { %2923 = vmatpush3.bf16.msra.mxu1 %v3170_v49  ;;  %1536 = vmatprep.mubr.bf16.mxu0 %v3550_v50  ;;  %v364_v40 = vmax.f32 %v3618_v29, 0.0  ;;  %v3186_v49 = vld [vmem:[%s4324_s3 + $0x138] sm:$0xff]  }
  0x48   : > { %1665 = vmatprep.mubr.bf16.mxu1 %v3470_v53  ;;  %2924 = vmatprep.subr.bf16.mxu1 %v3174_v55  ;;  %v3592_v53 = vpack.c.bf16 %v554_v62, %v553_v51  ;;  %v3665_v51 = vpack.c.bf16 %v360_v0, %v359_v63  ;;  %441 = vst [vmem:[#allocation2 + $0xf1] sm:$0xff] %v365_v46  ;;  %v257_v55 = vld [vmem:[%s3332_s16 + $0xa0] sm:$0xff]  ;;  %v558_v62 = vld [vmem:[#allocation2 + $0x52] sm:$0xff] }
  0x49   : > { %440 = vst [vmem:[#allocation2 + $0xe1] sm:$0xff] %v364_v40  ;;  %2824 = vmatprep.subr.bf16.mxu0 %v3185_v47  ;;  %v296_v56 = vmul.f32 %v3345_v17, %v257_v55  ;;  %v3187_v63 = vld [vmem:[%s4324_s3 + $0x1e0] sm:$0xff]   ;;  %v3700_v11 = vpack.c.bf16 %v558_v62, %v557_v61  ;;  %v472_v19 = vld [vmem:[#allocation2 + $0xc8] sm:$0xff]  ;;  %v3734_v31 = vpack.c.bf16 %v364_v40, %v363_v35  ;;  %v3198_v35 = vld [vmem:[%s4324_s3 + $0x1b8] sm:$0xff]  }
  0x4a   : > { %2825 = vmatpush3.bf16.msra.mxu0 %v3186_v49  ;;  %v3726_v26 = vpack.c.bf16 %v472_v19, %v471_v16  ;;  %v3761_v47 = vpack.c.bf16 %v366_v22, %v365_v46  ;;  %v345_v49 = vadd.f32 %v3350_v18, %v306_v39  ;;  %v567_v2 = vld [vmem:[#allocation2 + $0xc2] sm:$0xff] }
  0x4b   : > { %2925 = vmatpush3.bf16.msra.mxu1 %v3176_v4  ;;  %v3683_v1 = vadd.f32 %v3350_v18, %v296_v56  ;;  %3058 = vmatprep.subr.bf16.mxu0 %v3691_v3  ;;  %v621_v19 = vld [vmem:[#allocation2 + $0x120] sm:$0xff] }
  0x4c   : > { %2926 = vmatprep.subr.bf16.mxu1 %v3179_v9  ;;  %v3189_v9 = vld [vmem:[%s4324_s3 + $0x1a0] sm:$0xff]   ;;  %v377_v59 = vmax.f32 %v345_v49, 0.0 }
  0x4d   : > { %v469_v60 = vld [vmem:[#allocation2 + $0xa8] sm:$0xff]  ;;  %v470_v0 = vld [vmem:[#allocation2 + $0xb0] sm:$0xff]  ;;  %v367_v4 = vmax.f32 %v3683_v1, 0.0  ;;  %v580_v49 = vld [vmem:[#allocation2 + $0x15a] sm:$0xff] }
  0x4e   : > { %1537 = vmatmul.mubr.bf16.gmra.mrb[20].mxu0 %v3596_v15  ;;  %1666 = vmatmul.mubr.bf16.gmra.mrb[20].mxu1 %v3592_v53  ;;  %v3698_v10 = vpack.c.bf16 %v470_v0, %v469_v60  ;;  %v563_v60 = vld [vmem:[#allocation2 + $0x92] sm:$0xff]  ;;  %453 = vst [vmem:[#allocation2 + $0x181] sm:$0xff] %v377_v59  ;;  %v565_v62 = vld [vmem:[#allocation2 + $0xaa] sm:$0xff]  ;;  %v578_v39 = vld [vmem:[#allocation2 + $0x142] sm:$0xff] }
  0x4f   : > { %1544 = vmatprep.mubr.bf16.mxu0 %v3601_v21  ;;  %1673 = vmatprep.mubr.bf16.mxu1 %v3498_v8  ;;  %v3184_v8 = vld [vmem:[%s4324_s3 + $0x198] sm:$0xff]   ;;  %443 = vst [vmem:[#allocation2 + $0x109] sm:$0xff] %v367_v4  ;;  %v3771_v22 = vpack.c.bf16 %v564_v42, %v563_v60 }
  0x50   : > { %2927 = vmatpush3.bf16.msra.mxu1 %v3180_v23  ;;  %v560_v23 = vld [vmem:[#allocation2 + $0x6a] sm:$0xff]  ;;  %v474_v29 = vld [vmem:[#allocation2 + $0xe0] sm:$0xff]  ;;  %v476_v41 = vld [vmem:[#allocation2 + $0xf8] sm:$0xff] }
  0x51   : > { %2928 = vmatprep.subr.bf16.mxu1 %v3183_v43  ;;  %v3728_v30 = vpack.c.bf16 %v560_v23, %v559_v6  ;;  %v3752_v40 = vpack.c.bf16 %v474_v29, %v473_v33  ;;  %v3754_v43 = vpack.c.bf16 %v562_v36, %v561_v34  ;;  %v569_v6 = vld [vmem:[#allocation2 + $0xda] sm:$0xff]  ;;  %v622_v23 = vld [vmem:[#allocation2 + $0x128] sm:$0xff]  ;;  %v574_v34 = vld [vmem:[#allocation2 + $0x112] sm:$0xff] }
  0x52   : > { %v3820_v33 = vpack.c.bf16 %v622_v23, %v621_v19  ;;  %v3201_v36 = vld [vmem:[%s4324_s3 + $0x230] sm:$0xff]   ;;  %v575_v29 = vld [vmem:[#allocation2 + $0x122] sm:$0xff] }
  0x53   : > { %v672_v19 = vld [vmem:[#allocation2 + $0x141] sm:$0xff] }
  0x54   : > { %2929 = vmatpush3.bf16.msra.mxu1 %v3184_v8  ;;  %v307_v8 = vmul.f32 %v3345_v17, %v268_v38  ;;  %v475_v17 = vld [vmem:[#allocation2 + $0xf0] sm:$0xff]  ;;  %v577_v38 = vld [vmem:[#allocation2 + $0x13a] sm:$0xff] }
  0x55   : > { %2930 = vmatprep.subr.bf16.mxu1 %v3187_v63  ;;  %v3769_v46 = vpack.c.bf16 %v476_v41, %v475_v17  ;;  %v566_v63 = vld [vmem:[#allocation2 + $0xb2] sm:$0xff] }
  0x56   : > { %1545 = vmatmul.mubr.bf16.gmra.mrb[24].mxu0 %v3649_v44  ;;  %1674 = vmatmul.mubr.bf16.gmra.mrb[24].mxu1 %v3651_v45  ;;  %v346_v55 = vadd.f32 %v3350_v18, %v307_v8  ;;  %v3777_v18 = vpack.c.bf16 %v368_v5, %v367_v4  ;;  %v477_v56 = vld [vmem:[#allocation2 + $0x108] sm:$0xff]  ;;  %v478_v58 = vld [vmem:[#allocation2 + $0x110] sm:$0xff]  ;;  %v793_v41 = vld [vmem:[#allocation2 + $0x39] sm:$0xff] }
  0x57   : > { %1552 = vmatprep.mubr.bf16.mxu0 %v3665_v51  ;;  %1681 = vmatprep.mubr.bf16.mxu1 %v3545_v48  ;;  %v3783_v0 = vpack.c.bf16 %v478_v58, %v477_v56  ;;  %v568_v4 = vld [vmem:[#allocation2 + $0xca] sm:$0xff]  ;;  %v579_v8 = vld [vmem:[#allocation2 + $0x152] sm:$0xff] }
  0x58   : > { %2931 = vmatpush3.bf16.msra.mxu1 %v3189_v9  ;;  %v378_v61 = vmax.f32 %v346_v55, 0.0  ;;  %v3785_v9 = vpack.c.bf16 %v566_v63, %v565_v62  ;;  %v3793_v5 = vpack.c.bf16 %v568_v4, %v567_v2  ;;  %v629_v55 = vld [vmem:[#allocation2 + $0x180] sm:$0xff]  ;;  %v3853_v60 = vpack.c.bf16 %v580_v49, %v579_v8  ;;  %v792_v17 = vld [vmem:[#allocation2 + $0x31] sm:$0xff]  ;;  %v794_v63 = vld [vmem:[#allocation2 + $0x49] sm:$0xff] }
  0x59   : > { %2932 = vmatprep.subr.bf16.mxu1 %v3190_v20  ;;  %v3191_v20 = vld [vmem:[%s4324_s3 + $0x208] sm:$0xff]   ;;  %v824_v62 = vpack.c.bf16 %v793_v41, %v792_v17  ;;  %v744_v56 = vld [vmem:[#allocation2 + $0x30] sm:$0xff]  ;;  %v745_v58 = vld [vmem:[#allocation2 + $0x38] sm:$0xff] }
  0x5a   : > { %454 = vst [vmem:[#allocation2 + $0x189] sm:$0xff] %v378_v61  ;;  %v3787_v1 = vpack.c.bf16 %v378_v61, %v377_v59  ;;  %v581_v61 = vld [vmem:[#allocation2 + $0x16a] sm:$0xff]  ;;  %v776_v4 = vpack.c.bf16 %v745_v58, %v744_v56 }
  0x5b   : > { %v795_v2 = vld [vmem:[#allocation2 + $0x51] sm:$0xff] }
  0x5c   : > { %2933 = vmatpush3.bf16.msra.mxu1 %v3192_v7  ;;  %v570_v7 = vld [vmem:[#allocation2 + $0xe2] sm:$0xff] }
  0x5d   : > { %2934 = vmatprep.subr.bf16.mxu1 %v3193_v24  ;;  %v3806_v16 = vpack.c.bf16 %v570_v7, %v569_v6  ;;  %v3199_v24 = vld [vmem:[%s4324_s3 + $0x220] sm:$0xff]   ;;  %v746_v6 = vld [vmem:[#allocation2 + $0x48] sm:$0xff]  ;;  %v747_v7 = vld [vmem:[#allocation2 + $0x50] sm:$0xff] }
  0x5e   : > { %1553 = vmatmul.mubr.bf16.gmra.mrb[28].mxu0 %v3698_v10  ;;  %1682 = vmatmul.mubr.bf16.gmra.mrb[28].mxu1 %v3700_v11 }
  0x5f   : > { %1560 = vmatprep.mubr.bf16.mxu0 %v3707_v13  ;;  %1689 = vmatprep.mubr.bf16.mxu1 %v3596_v15 }
  0x60   : > { %2935 = vmatpush3.bf16.msra.mxu1 %v3195_v32 }
  0x61   : > { %2936 = vmatprep.subr.bf16.mxu1 %v3196_v25  ;;  %v630_v59 = vld [vmem:[#allocation2 + $0x188] sm:$0xff] }
  0x64   : > { %2937 = vmatpush3.bf16.msra.mxu1 %v3198_v35  ;;  %v576_v35 = vld [vmem:[#allocation2 + $0x12a] sm:$0xff] }
  0x65   : > { %v3841_v37 = vpack.c.bf16 %v576_v35, %v575_v29 }
  0x66   : > { %1561 = vmatmul.mubr.bf16.gmra.mrb[32].mxu0 %v3726_v26  ;;  %1690 = vmatmul.mubr.bf16.gmra.mrb[32].mxu1 %v3728_v30 }
  0x67   : > { %1568 = vmatprep.mubr.bf16.mxu0 %v3734_v31  ;;  %1697 = vmatprep.mubr.bf16.mxu1 %v3649_v44 }
  0x6e   : > { %1569 = vmatmul.mubr.bf16.gmra.mrb[36].mxu0 %v3752_v40  ;;  %1698 = vmatmul.mubr.bf16.gmra.mrb[36].mxu1 %v3754_v43 }
  0x6f   : > { %1576 = vmatprep.mubr.bf16.mxu0 %v3761_v47  ;;  %1705 = vmatprep.mubr.bf16.mxu1 %v3698_v10 }
  0x76   : > { %1577 = vmatmul.mubr.bf16.gmra.mrb[40].mxu0 %v3769_v46  ;;  %1706 = vmatmul.mubr.bf16.gmra.mrb[40].mxu1 %v3771_v22 }
  0x77   : > { %1584 = vmatprep.mubr.bf16.mxu0 %v3777_v18  ;;  %1713 = vmatprep.mubr.bf16.mxu1 %v3726_v26 }
  0x7e   : > { %1585 = vmatmul.mubr.bf16.gmra.mrb[44].mxu0 %v3783_v0  ;;  %1714 = vmatmul.mubr.bf16.gmra.mrb[44].mxu1 %v3785_v9 }
  0x7f   : > { %1721 = vmatprep.mubr.bf16.mxu1 %v3752_v40  ;;  %1818 = vmatprep.mubr.bf16.mxu0 %v3592_v53  ;;  %v3194_v53 = vld [vmem:[%s4324_s3 + $0x210] sm:$0xff]  }
  0x86   : > { %1722 = vmatmul.mubr.bf16.gmra.mrb[48].mxu1 %v3793_v5  ;;  %1819 = vmatmul.mubr.bf16.vlgmr.msra.gmra.mrb[48].mxu0 %v3399_v57  ;;  %v3197_v57 = vld [vmem:[%s4324_s3 + $0x218] sm:$0xff]  }
  0x87   : > { %3059 = vmatpush3.bf16.msra.mxu0 %v3691_v3  ;;  %1729 = vmatprep.mubr.bf16.mxu1 %v3769_v46  ;;  %v572_v3 = vld [vmem:[#allocation2 + $0xfa] sm:$0xff] }
  0x88   : > { %1826 = vmatprep.mubr.bf16.mxu0 %v3651_v45  ;;  %3060 = vmatprep.subr.bf16.mxu0 %v3191_v20  ;;  %v571_v45 = vld [vmem:[#allocation2 + $0xf2] sm:$0xff] }
  0x89   : > { %v3818_v32 = vpack.c.bf16 %v572_v3, %v571_v45  ;;  %v670_v45 = vld [vmem:[#allocation2 + $0x129] sm:$0xff] }
  0x8b   : > { %3061 = vmatpush3.bf16.msra.mxu0 %v3191_v20  ;;  %v825_v20 = vpack.c.bf16 %v795_v2, %v794_v63 }
  0x8c   : > { %3062 = vmatprep.subr.bf16.mxu0 %v3194_v53 }
  0x8e   : > { %1730 = vmatmul.mubr.bf16.gmra.mrb[52].mxu1 %v3806_v16  ;;  %1827 = vmatmul.mubr.bf16.gmra.mrb[52].mxu0 %v3439_v28  ;;  %v3200_v28 = vld [vmem:[%s4324_s3 + $0x228] sm:$0xff]  }
  0x8f   : > { %1737 = vmatprep.mubr.bf16.mxu1 %v3783_v0  ;;  %1834 = vmatprep.mubr.bf16.mxu0 %v3700_v11  ;;  %v573_v11 = vld [vmem:[#allocation2 + $0x10a] sm:$0xff] }
  0x90   : > { %3063 = vmatpush3.bf16.msra.mxu0 %v3194_v53  ;;  %v3832_v25 = vpack.c.bf16 %v574_v34, %v573_v11  ;;  %v777_v53 = vpack.c.bf16 %v747_v7, %v746_v6 }
  0x91   : > { %3064 = vmatprep.subr.bf16.mxu0 %v3197_v57 }
  0x94   : > { %3065 = vmatpush3.bf16.msra.mxu0 %v3197_v57  ;;  %v669_v57 = vld [vmem:[#allocation2 + $0x121] sm:$0xff] }
  0x95   : > { %3066 = vmatprep.subr.bf16.mxu0 %v3199_v24  ;;  %v3875_v3 = vpack.c.bf16 %v670_v45, %v669_v57 }
  0x96   : > { %1738 = vmatmul.mubr.bf16.gmra.mrb[56].mxu1 %v3818_v32  ;;  %1835 = vmatmul.mubr.bf16.gmra.mrb[56].mxu0 %v3468_v52  ;;  %v3202_v52 = vld [vmem:[%s4324_s3 + $0x238] sm:$0xff]  }
  0x97   : > { %1745 = vmatprep.mubr.bf16.mxu1 %v3820_v33  ;;  %1842 = vmatprep.mubr.bf16.mxu0 %v3728_v30 }
  0x98   : > { %3067 = vmatpush3.bf16.msra.mxu0 %v3199_v24 }
  0x99   : > { %3068 = vmatprep.subr.bf16.mxu0 %v3200_v28 }
  0x9c   : > { %3069 = vmatpush3.bf16.msra.mxu0 %v3200_v28  ;;  %v725_v28 = vld [vmem:[#allocation2 + $0x182] sm:$0xff] }
  0x9d   : > { %3070 = vmatprep.subr.bf16.mxu0 %v3201_v36 }
  0x9e   : > { %1746 = vmatmul.mubr.bf16.gmra.mrb[60].mxu1 %v3832_v25  ;;  %1843 = vmatmul.mubr.bf16.gmra.mrb[60].mxu0 %v3506_v14 }
  0x9f   : > { %1753 = vmatprep.mubr.bf16.mxu1 %v3437_v27  ;;  %1850 = vmatprep.mubr.bf16.mxu0 %v3754_v43  ;;  %v3847_v27 = vpack.c.bf16 %v578_v39, %v577_v38 }
  0xa0   : > { %3071 = vmatpush3.bf16.msra.mxu0 %v3201_v36 }
  0xa1   : > { %3072 = vmatprep.subr.bf16.mxu0 %v3202_v52 }
  0xa4   : > { %3073 = vmatpush3.bf16.msra.mxu0 %v3202_v52 }
  0xa6   : > { %1754 = vmatmul.mubr.bf16.gmra.mrb[64].mxu1 %v3841_v37  ;;  %1851 = vmatmul.mubr.bf16.gmra.mrb[64].mxu0 %v3550_v50 }
  0xa7   : > { %1761 = vmatprep.mubr.bf16.mxu1 %v3472_v54  ;;  %1858 = vmatprep.mubr.bf16.mxu0 %v3771_v22  ;;  %v3855_v54 = vpack.c.bf16 %v630_v59, %v629_v55 }
  0xae   : > { %1762 = vmatmul.mubr.bf16.gmra.mrb[68].mxu1 %v3847_v27  ;;  %1859 = vmatmul.mubr.bf16.gmra.mrb[68].mxu0 %v3601_v21 }
  0xaf   : > { %1769 = vmatprep.mubr.bf16.mxu1 %v3501_v12  ;;  %1866 = vmatprep.mubr.bf16.mxu0 %v3785_v9  ;;  %v582_v12 = vld [vmem:[#allocation2 + $0x172] sm:$0xff] }
  0xb0   : > { %v3861_v42 = vpack.c.bf16 %v582_v12, %v581_v61  ;;  %v843_v12 = vld [vmem:[#allocation2 + $0x52] sm:$0xff] }
  0xb6   : > { %1770 = vmatmul.mubr.bf16.gmra.mrb[72].mxu1 %v3853_v60  ;;  %1867 = vmatmul.mubr.bf16.gmra.mrb[72].mxu0 %v3665_v51 }
  0xb7   : > { %1777 = vmatprep.mubr.bf16.mxu1 %v3855_v54  ;;  %1874 = vmatprep.mubr.bf16.mxu0 %v3793_v5 }
  0xbe   : > { %1778 = vmatmul.mubr.bf16.gmra.mrb[76].mxu1 %v3861_v42  ;;  %1875 = vmatmul.mubr.bf16.gmra.mrb[76].mxu0 %v3707_v13 }
  0xbf   : > { %1882 = vmatprep.mubr.bf16.mxu0 %v3806_v16  ;;  %1979 = vmatprep.mubr.bf16.mxu1 %v824_v62 }
  0xc6   : > { %1883 = vmatmul.mubr.bf16.gmra.mrb[80].mxu0 %v3734_v31  ;;  %1980 = vmatmul.mubr.bf16.vlgmr.msra.gmra.mrb[80].mxu1 %v776_v4 }
  0xc7   : > { %1890 = vmatprep.mubr.bf16.mxu0 %v3818_v32  ;;  %1987 = vmatprep.mubr.bf16.mxu1 %v825_v20 }
  0xce   : > { %1891 = vmatmul.mubr.bf16.gmra.mrb[84].mxu0 %v3761_v47  ;;  %1988 = vmatmul.mubr.bf16.gmra.mrb[84].mxu1 %v777_v53 }
  0xcf   : > { %1898 = vmatprep.mubr.bf16.mxu0 %v3832_v25  ;;  %1995 = vmatprep.mubr.bf16.mxu1 %v3506_v14  ;;  %v671_v14 = vld [vmem:[#allocation2 + $0x139] sm:$0xff] }
  0xd0   : > { %v3881_v23 = vpack.c.bf16 %v672_v19, %v671_v14 }
  0xd6   : > { %1899 = vmatmul.mubr.bf16.gmra.mrb[88].mxu0 %v3777_v18  ;;  %1996 = vmatmul.mubr.bf16.gmra.mrb[88].mxu1 %v3545_v48  ;;  %v673_v48 = vld [vmem:[#allocation2 + $0x151] sm:$0xff] }
  0xd7   : > { %1906 = vmatprep.mubr.bf16.mxu0 %v3841_v37  ;;  %2003 = vmatprep.mubr.bf16.mxu1 %v3550_v50  ;;  %v674_v50 = vld [vmem:[#allocation2 + $0x159] sm:$0xff] }
  0xd8   : > { %v3887_v24 = vpack.c.bf16 %v674_v50, %v673_v48 }
  0xde   : > { %1907 = vmatmul.mubr.bf16.gmra.mrb[92].mxu0 %v3875_v3  ;;  %2004 = vmatmul.mubr.bf16.gmra.mrb[92].mxu1 %v3596_v15  ;;  %v675_v15 = vld [vmem:[#allocation2 + $0x169] sm:$0xff] }
  0xdf   : > { %1914 = vmatprep.mubr.bf16.mxu0 %v3847_v27  ;;  %2011 = vmatprep.mubr.bf16.mxu1 %v3601_v21  ;;  %v676_v21 = vld [vmem:[#allocation2 + $0x171] sm:$0xff] }
  0xe0   : > { %v3893_v11 = vpack.c.bf16 %v676_v21, %v675_v15 }
  0xe6   : > { %1915 = vmatmul.mubr.bf16.gmra.mrb[96].mxu0 %v3881_v23  ;;  %2012 = vmatmul.mubr.bf16.gmra.mrb[96].mxu1 %v3649_v44  ;;  %v726_v44 = vld [vmem:[#allocation2 + $0x18a] sm:$0xff] }
  0xe7   : > { %1922 = vmatprep.mubr.bf16.mxu0 %v3853_v60  ;;  %2019 = vmatprep.mubr.bf16.mxu1 %v3665_v51  ;;  %v3895_v34 = vpack.c.bf16 %v726_v44, %v725_v28  ;;  %v840_v51 = vld [vmem:[#allocation2 + $0x32] sm:$0xff] }
  0xee   : > { %1923 = vmatmul.mubr.bf16.gmra.mrb[100].mxu0 %v3887_v24  ;;  %2020 = vmatmul.mubr.bf16.gmra.mrb[100].mxu1 %v3698_v10  ;;  %v841_v10 = vld [vmem:[#allocation2 + $0x3a] sm:$0xff] }
  0xef   : > { %1930 = vmatprep.mubr.bf16.mxu0 %v3861_v42  ;;  %2027 = vmatprep.mubr.bf16.mxu1 %v3707_v13  ;;  %v872_v49 = vpack.c.bf16 %v841_v10, %v840_v51 }
  0xf6   : > { %1931 = vmatmul.mubr.bf16.gmra.mrb[104].mxu0 %v3893_v11  ;;  %2028 = vmatmul.mubr.bf16.gmra.mrb[104].mxu1 %v3726_v26 }
  0xf7   : > { %1938 = vmatprep.mubr.bf16.mxu0 %v3895_v34  ;;  %2035 = vmatprep.mubr.bf16.mxu1 %v3734_v31  ;;  %v842_v31 = vld [vmem:[#allocation2 + $0x4a] sm:$0xff] }
  0xf8   : > { %v873_v58 = vpack.c.bf16 %v843_v12, %v842_v31 }
  0xf9   : > { %v2602_v36 = vpop.f32.mrb[0].mxu0  ;;  %v2674_v13 = vpop.f32.mrb[0].mxu1 }
  0xfa   : > { %v2603_v52 = vpop.f32.mrb[1].mxu0  ;;  %v2675_v29 = vpop.f32.mrb[1].mxu1 }
  0xfb   : > { %v3901_v35 = vadd.f32 %v2603_v52, %v2602_v36  ;;  %v3903_v38 = vadd.f32 %v2675_v29, %v2674_v13  ;;  %v2605_v39 = vpop.f32.mrb[2].mxu0  ;;  %v2677_v8 = vpop.f32.mrb[2].mxu1 }
  0xfc   : > { %v2606_v55 = vpop.f32.mrb[3].mxu0  ;;  %v2678_v59 = vpop.f32.mrb[3].mxu1 }
  0xfd   : > { %v3905_v26 = vadd.f32 %v2606_v55, %v2605_v39  ;;  %v3907_v61 = vadd.f32 %v2678_v59, %v2677_v8 }
  0xfe   : > { %1939 = vmatmul.mubr.bf16.gmra.mrb[108].mxu0 %v3787_v1  ;;  %2036 = vmatmul.mubr.bf16.gmra.mrb[108].mxu1 %v3752_v40 }
  0xff   : > { %2043 = vmatprep.mubr.bf16.mxu1 %v3761_v47  ;;  %3074 = vmatprep.mubr.bf16.mxu0 %v872_v49 }
 0x101   : > { %v2608_v17 = vpop.f32.mrb[4].mxu0  ;;  %v2680_v41 = vpop.f32.mrb[4].mxu1 }
 0x102   : > { %v2609_v62 = vpop.f32.mrb[5].mxu0  ;;  %v2681_v56 = vpop.f32.mrb[5].mxu1 }
 0x103   : > { %v3912_v63 = vadd.f32 %v2609_v62, %v2608_v17  ;;  %v3914_v2 = vadd.f32 %v2681_v56, %v2680_v41  ;;  %v2611_v4 = vpop.f32.mrb[6].mxu0  ;;  %v2683_v20 = vpop.f32.mrb[6].mxu1 }
 0x104   : > { %v2612_v6 = vpop.f32.mrb[7].mxu0  ;;  %v2684_v7 = vpop.f32.mrb[7].mxu1 }
 0x105   : > { %v3916_v53 = vadd.f32 %v2612_v6, %v2611_v4  ;;  %v3918_v40 = vadd.f32 %v2684_v7, %v2683_v20  ;;  %v768_v20 = vld [vmem:[#allocation2 + $0x150] sm:$0xff]  ;;  %v769_v6 = vld [vmem:[#allocation2 + $0x158] sm:$0xff] }
 0x106   : > { %2044 = vmatmul.mubr.bf16.gmra.mrb[112].mxu1 %v3769_v46  ;;  %3075 = vmatmul.mubr.bf16.vlgmr.msra.gmra.mrb[112].mxu0 %v873_v58 }
 0x107   : > { %2051 = vmatprep.mubr.bf16.mxu1 %v3777_v18  ;;  %3078 = vmatprep.mubr.bf16.mxu0 %v3728_v30 }
 0x109   : > { %v2614_v47 = vpop.f32.mrb[8].mxu0  ;;  %v2686_v57 = vpop.f32.mrb[8].mxu1 }
 0x10a   : > { %v2615_v45 = vpop.f32.mrb[9].mxu0  ;;  %v2687_v14 = vpop.f32.mrb[9].mxu1 }
 0x10b   : > { %v3923_v19 = vadd.f32 %v2615_v45, %v2614_v47  ;;  %v3925_v48 = vadd.f32 %v2687_v14, %v2686_v57  ;;  %v2617_v50 = vpop.f32.mrb[10].mxu0  ;;  %v2689_v15 = vpop.f32.mrb[10].mxu1  ;;  %v788_v45 = vpack.c.bf16 %v769_v6, %v768_v20 }
 0x10c   : > { %v2618_v21 = vpop.f32.mrb[11].mxu0  ;;  %v2690_v28 = vpop.f32.mrb[11].mxu1 }
 0x10d   : > { %v3927_v44 = vadd.f32 %v2618_v21, %v2617_v50  ;;  %v3929_v46 = vadd.f32 %v2690_v28, %v2689_v15 }
 0x10e   : > { %2052 = vmatmul.mubr.bf16.gmra.mrb[116].mxu1 %v3783_v0  ;;  %3079 = vmatmul.mubr.bf16.gmra.mrb[116].mxu0 %v3754_v43  ;;  %v766_v43 = vld [vmem:[#allocation2 + $0x138] sm:$0xff] }
 0x10f   : > { %2059 = vmatprep.mubr.bf16.mxu1 %v3875_v3  ;;  %3082 = vmatprep.mubr.bf16.mxu0 %v3771_v22  ;;  %v767_v22 = vld [vmem:[#allocation2 + $0x140] sm:$0xff] }
 0x110   : > { %v787_v12 = vpack.c.bf16 %v767_v22, %v766_v43 }
 0x111   : > { %v2620_v30 = vpop.f32.mrb[12].mxu0  ;;  %v2692_v18 = vpop.f32.mrb[12].mxu1 }
 0x112   : > { %v2621_v51 = vpop.f32.mrb[13].mxu0  ;;  %v2693_v10 = vpop.f32.mrb[13].mxu1 }
 0x113   : > { %v3935_v36 = vadd.f32 %v2621_v51, %v2620_v30  ;;  %v3937_v13 = vadd.f32 %v2693_v10, %v2692_v18  ;;  %v2623_v52 = vpop.f32.mrb[14].mxu0  ;;  %v2695_v29 = vpop.f32.mrb[14].mxu1  ;;  %v770_v18 = vld [vmem:[#allocation2 + $0x168] sm:$0xff]  ;;  %v771_v51 = vld [vmem:[#allocation2 + $0x170] sm:$0xff] }
 0x114   : > { %v2624_v39 = vpop.f32.mrb[15].mxu0  ;;  %v2696_v8 = vpop.f32.mrb[15].mxu1 }
 0x115   : > { %v3939_v49 = vadd.f32 %v2624_v39, %v2623_v52  ;;  %v3941_v0 = vadd.f32 %v2696_v8, %v2695_v29  ;;  %v789_v39 = vpack.c.bf16 %v771_v51, %v770_v18 }
 0x116   : > { %2060 = vmatmul.mubr.bf16.gmra.mrb[120].mxu1 %v3820_v33  ;;  %3083 = vmatmul.mubr.bf16.gmra.mrb[120].mxu0 %v3785_v9 }
 0x117   : > { %2067 = vmatprep.mubr.bf16.mxu1 %v3881_v23  ;;  %3086 = vmatprep.mubr.bf16.mxu0 %v3793_v5 }
 0x119   : > { %v2626_v3 = vpop.f32.mrb[16].mxu0  ;;  %v2714_v55 = vpop.f32.mrb[16].mxu1 }
 0x11a   : > { %v2627_v59 = vpop.f32.mrb[17].mxu0  ;;  %v2715_v31 = vpop.f32.mrb[17].mxu1 }
 0x11b   : > { %v3947_v17 = vadd.f32 %v2627_v59, %v2626_v3  ;;  %v2716_v41 = vadd.f32 %v2715_v31, %v2714_v55  ;;  %v2629_v62 = vpop.f32.mrb[18].mxu0  ;;  %v2717_v56 = vpop.f32.mrb[18].mxu1  ;;  %v822_v31 = vld [vmem:[#allocation2 + $0x199] sm:$0xff] }
 0x11c   : > { %v2630_v58 = vpop.f32.mrb[19].mxu0  ;;  %v2718_v33 = vpop.f32.mrb[19].mxu1 }
 0x11d   : > { %v3950_v9 = vadd.f32 %v2716_v41, %v3901_v35  ;;  %v3952_v23 = vadd.f32 %v2630_v58, %v2629_v62  ;;  %v2719_v5 = vadd.f32 %v2718_v33, %v2717_v56 }
 0x11e   : > { %2068 = vmatmul.mubr.bf16.gmra.mrb[124].mxu1 %v787_v12  ;;  %3087 = vmatmul.mubr.bf16.gmra.mrb[124].mxu0 %v3806_v16  ;;  %v823_v12 = vld [vmem:[#allocation2 + $0x1a1] sm:$0xff] }
 0x11f   : > { %v3956_v4 = vadd.f32 %v2719_v5, %v3905_v26  ;;  %2075 = vmatprep.mubr.bf16.mxu1 %v3887_v24  ;;  %3090 = vmatprep.mubr.bf16.mxu0 %v3818_v32  ;;  %v839_v6 = vpack.c.bf16 %v823_v12, %v822_v31 }
 0x121   : > { %v2632_v7 = vpop.f32.mrb[20].mxu0  ;;  %v2720_v47 = vpop.f32.mrb[20].mxu1 }
 0x122   : > { %v2633_v57 = vpop.f32.mrb[21].mxu0  ;;  %v2721_v35 = vpop.f32.mrb[21].mxu1 }
 0x123   : > { %v3960_v14 = vadd.f32 %v2633_v57, %v2632_v7  ;;  %v2722_v50 = vadd.f32 %v2721_v35, %v2720_v47  ;;  %v2635_v15 = vpop.f32.mrb[22].mxu0  ;;  %v2723_v21 = vpop.f32.mrb[22].mxu1  ;;  %v774_v57 = vld [vmem:[#allocation2 + $0x198] sm:$0xff] }
 0x124   : > { %v2636_v16 = vpop.f32.mrb[23].mxu0  ;;  %v2724_v28 = vpop.f32.mrb[23].mxu1  ;;  %v870_v35 = vld [vmem:[#allocation2 + $0x19a] sm:$0xff] }
 0x125   : > { %v3963_v26 = vadd.f32 %v2722_v50, %v3912_v63  ;;  %v3965_v24 = vadd.f32 %v2636_v16, %v2635_v15  ;;  %v2725_v32 = vadd.f32 %v2724_v28, %v2723_v21  ;;  %v3203_v16 = vld [vmem:[#allocation2 + $0x8] sm:$0xff] }
 0x126   : > { %2076 = vmatmul.mubr.bf16.gmra.mrb[128].mxu1 %v788_v45  ;;  %3091 = vmatmul.mubr.bf16.gmra.mrb[128].mxu0 %v3832_v25  ;;  %v871_v45 = vld [vmem:[#allocation2 + $0x1a2] sm:$0xff]  ;;  %v791_v28 = vpack.c.bf16 %v3203_v16, %v774_v57 }
 0x127   : > { %v3969_v30 = vadd.f32 %v2725_v32, %v3916_v53  ;;  %2083 = vmatprep.mubr.bf16.mxu1 %v3893_v11  ;;  %3094 = vmatprep.mubr.bf16.mxu0 %v3841_v37  ;;  %v887_v32 = vpack.c.bf16 %v871_v45, %v870_v35 }
 0x129   : > { %v2638_v10 = vpop.f32.mrb[24].mxu0  ;;  %v2726_v52 = vpop.f32.mrb[24].mxu1 }
 0x12a   : > { %v2639_v29 = vpop.f32.mrb[25].mxu0  ;;  %v2727_v63 = vpop.f32.mrb[25].mxu1 }
 0x12b   : > { %v3973_v8 = vadd.f32 %v2639_v29, %v2638_v10  ;;  %v2728_v43 = vadd.f32 %v2727_v63, %v2726_v52  ;;  %v2641_v22 = vpop.f32.mrb[26].mxu0  ;;  %v2729_v3 = vpop.f32.mrb[26].mxu1 }
 0x12c   : > { %v2642_v25 = vpop.f32.mrb[27].mxu0  ;;  %v2730_v55 = vpop.f32.mrb[27].mxu1 }
 0x12d   : > { %v3976_v53 = vadd.f32 %v2728_v43, %v3923_v19  ;;  %v3978_v11 = vadd.f32 %v2642_v25, %v2641_v22  ;;  %v2731_v37 = vadd.f32 %v2730_v55, %v2729_v3 }
 0x12e   : > { %2084 = vmatmul.mubr.bf16.gmra.mrb[132].mxu1 %v789_v39  ;;  %3095 = vmatmul.mubr.bf16.gmra.mrb[132].mxu0 %v3847_v27 }
 0x12f   : > { %v3982_v59 = vadd.f32 %v2731_v37, %v3927_v44  ;;  %2091 = vmatprep.mubr.bf16.mxu1 %v3787_v1  ;;  %3098 = vmatprep.mubr.bf16.mxu0 %v3853_v60 }
 0x131   : > { %v2644_v41 = vpop.f32.mrb[28].mxu0  ;;  %v2732_v62 = vpop.f32.mrb[28].mxu1 }
 0x132   : > { %v2645_v56 = vpop.f32.mrb[29].mxu0  ;;  %v2733_v19 = vpop.f32.mrb[29].mxu1 }
 0x133   : > { %v3986_v58 = vadd.f32 %v2645_v56, %v2644_v41  ;;  %v2734_v33 = vadd.f32 %v2733_v19, %v2732_v62  ;;  %v2647_v5 = vpop.f32.mrb[30].mxu0  ;;  %v2735_v20 = vpop.f32.mrb[30].mxu1 }
 0x134   : > { %v2648_v27 = vpop.f32.mrb[31].mxu0  ;;  %v2736_v7 = vpop.f32.mrb[31].mxu1 }
 0x135   : > { %v3989_v44 = vadd.f32 %v2734_v33, %v3935_v36  ;;  %v3991_v1 = vadd.f32 %v2648_v27, %v2647_v5  ;;  %v2737_v60 = vadd.f32 %v2736_v7, %v2735_v20 }
 0x136   : > { %2092 = vmatmul.mubr.bf16.gmra.mrb[136].mxu1 %v3855_v54  ;;  %3099 = vmatmul.mubr.bf16.gmra.mrb[136].mxu0 %v3861_v42 }
 0x137   : > { %v3996_v47 = vadd.f32 %v2737_v60, %v3939_v49  ;;  %2099 = vmatprep.mubr.bf16.mxu1 %v839_v6  ;;  %3102 = vmatprep.mubr.bf16.mxu0 %v3895_v34 }
 0x139   : > { %v2650_v50 = vpop.f32.mrb[32].mxu0  ;;  %v2738_v15 = vpop.f32.mrb[32].mxu1 }
 0x13a   : > { %v2651_v36 = vpop.f32.mrb[33].mxu0  ;;  %v2739_v21 = vpop.f32.mrb[33].mxu1 }
 0x13b   : > { %v3999_v18 = vadd.f32 %v2651_v36, %v2650_v50  ;;  %v2740_v54 = vadd.f32 %v2739_v21, %v2738_v15  ;;  %v2653_v42 = vpop.f32.mrb[34].mxu0  ;;  %v2741_v51 = vpop.f32.mrb[34].mxu1 }
 0x13c   : > { %v2654_v49 = vpop.f32.mrb[35].mxu0  ;;  %v2742_v10 = vpop.f32.mrb[35].mxu1 }
 0x13d   : > { %v4002_v52 = vadd.f32 %v2740_v54, %v3947_v17  ;;  %v2655_v34 = vadd.f32 %v2654_v49, %v2653_v42  ;;  %v2743_v29 = vadd.f32 %v2742_v10, %v2741_v51 }
 0x13e   : > { %2100 = vmatmul.mubr.bf16.gmra.mrb[140].mxu1 %v791_v28  ;;  %3103 = vmatmul.mubr.bf16.gmra.mrb[140].mxu0 %v887_v32 }
 0x13f   : > { %v4005_v63 = vadd.f32 %v2743_v29, %v3952_v23 }
 0x141   : > { %v2656_v39 = vpop.f32.mrb[36].mxu0  ;;  %v2744_v43 = vpop.f32.mrb[36].mxu1 }
 0x142   : > { %v2657_v22 = vpop.f32.mrb[37].mxu0  ;;  %v2745_v3 = vpop.f32.mrb[37].mxu1 }
 0x143   : > { %v4007_v25 = vadd.f32 %v2657_v22, %v2656_v39  ;;  %v2746_v55 = vadd.f32 %v2745_v3, %v2744_v43  ;;  %v2659_v37 = vpop.f32.mrb[38].mxu0  ;;  %v2747_v31 = vpop.f32.mrb[38].mxu1 }
 0x144   : > { %v2660_v12 = vpop.f32.mrb[39].mxu0  ;;  %v2748_v41 = vpop.f32.mrb[39].mxu1 }
 0x145   : > { %v4010_v17 = vadd.f32 %v2746_v55, %v3960_v14  ;;  %v2661_v62 = vadd.f32 %v2660_v12, %v2659_v37  ;;  %v2749_v56 = vadd.f32 %v2748_v41, %v2747_v31 }
 0x147   : > { %v4013_v19 = vadd.f32 %v2749_v56, %v3965_v24 }
 0x149   : > { %v2662_v23 = vpop.f32.mrb[40].mxu0  ;;  %v2750_v33 = vpop.f32.mrb[40].mxu1 }
 0x14a   : > { %v2663_v5 = vpop.f32.mrb[41].mxu0  ;;  %v2751_v20 = vpop.f32.mrb[41].mxu1 }
 0x14b   : > { %v4015_v6 = vadd.f32 %v2663_v5, %v2662_v23  ;;  %v2752_v27 = vadd.f32 %v2751_v20, %v2750_v33  ;;  %v2665_v7 = vpop.f32.mrb[42].mxu0  ;;  %v2753_v60 = vpop.f32.mrb[42].mxu1 }
 0x14c   : > { %v2666_v57 = vpop.f32.mrb[43].mxu0  ;;  %v2754_v35 = vpop.f32.mrb[43].mxu1 }
 0x14d   : > { %v4018_v45 = vadd.f32 %v2752_v27, %v3973_v8  ;;  %v4020_v14 = vadd.f32 %v2666_v57, %v2665_v7  ;;  %v2755_v50 = vadd.f32 %v2754_v35, %v2753_v60 }
 0x14f   : > { %v4023_v24 = vadd.f32 %v2755_v50, %v3978_v11 }
 0x151   : > { %v2668_v15 = vpop.f32.mrb[44].mxu0  ;;  %v2756_v36 = vpop.f32.mrb[44].mxu1 }
 0x152   : > { %v2669_v21 = vpop.f32.mrb[45].mxu0  ;;  %v2757_v16 = vpop.f32.mrb[45].mxu1 }
 0x153   : > { %v4025_v28 = vadd.f32 %v2669_v21, %v2668_v15  ;;  %v2758_v32 = vadd.f32 %v2757_v16, %v2756_v36  ;;  %v2671_v54 = vpop.f32.mrb[46].mxu0  ;;  %v2759_v42 = vpop.f32.mrb[46].mxu1 }
 0x154   : > { %v2672_v51 = vpop.f32.mrb[47].mxu0  ;;  %v2760_v49 = vpop.f32.mrb[47].mxu1 }
 0x155   : > { %v4028_v8 = vadd.f32 %v2758_v32, %v3986_v58  ;;  %v4030_v10 = vadd.f32 %v2672_v51, %v2671_v54  ;;  %v2761_v29 = vadd.f32 %v2760_v49, %v2759_v42 }
 0x157   : > { %v4033_v11 = vadd.f32 %v2761_v29, %v3991_v1 }
 0x159   : > { %v2762_v39 = vpop.f32.mrb[48].mxu1  ;;  %v2826_v43 = vpop.f32.mrb[48].mxu0 }
 0x15a   : > { %v2763_v22 = vpop.f32.mrb[49].mxu1  ;;  %v2827_v3 = vpop.f32.mrb[49].mxu0 }
 0x15b   : > { %v2764_v55 = vadd.f32 %v2763_v22, %v2762_v39  ;;  %v2828_v37 = vadd.f32 %v2827_v3, %v2826_v43  ;;  %v2765_v31 = vpop.f32.mrb[50].mxu1  ;;  %v2829_v12 = vpop.f32.mrb[50].mxu0 }
 0x15c   : > { %v2766_v41 = vpop.f32.mrb[51].mxu1  ;;  %v2830_v56 = vpop.f32.mrb[51].mxu0 }
 0x15d   : > { %v4036_v23 = vadd.f32 %v2764_v55, %v3999_v18  ;;  %v4039_v58 = vadd.f32 %v2828_v37, %v3950_v9  ;;  %v2767_v33 = vadd.f32 %v2766_v41, %v2765_v31  ;;  %v2831_v5 = vadd.f32 %v2830_v56, %v2829_v12 }
 0x15f   : > { %v4041_v1 = vadd.f32 %v2767_v33, %v2655_v34  ;;  %v4044_v20 = vadd.f32 %v2831_v5, %v3956_v4 }
 0x161   : > { %v2768_v27 = vpop.f32.mrb[52].mxu1  ;;  %v2832_v7 = vpop.f32.mrb[52].mxu0 }
 0x162   : > { %v2769_v60 = vpop.f32.mrb[53].mxu1  ;;  %v2833_v57 = vpop.f32.mrb[53].mxu0 }
 0x163   : > { %v2770_v35 = vadd.f32 %v2769_v60, %v2768_v27  ;;  %v2834_v50 = vadd.f32 %v2833_v57, %v2832_v7  ;;  %v2771_v15 = vpop.f32.mrb[54].mxu1  ;;  %v2835_v36 = vpop.f32.mrb[54].mxu0 }
 0x164   : > { %v2772_v18 = vpop.f32.mrb[55].mxu1  ;;  %v2836_v21 = vpop.f32.mrb[55].mxu0 }
 0x165   : > { %v4047_v9 = vadd.f32 %v2770_v35, %v4007_v25  ;;  %v4050_v16 = vadd.f32 %v2834_v50, %v3963_v26  ;;  %v2773_v34 = vadd.f32 %v2772_v18, %v2771_v15  ;;  %v2837_v32 = vadd.f32 %v2836_v21, %v2835_v36 }
 0x167   : > { %v4052_v4 = vadd.f32 %v2773_v34, %v2661_v62  ;;  %v4055_v54 = vadd.f32 %v2837_v32, %v3969_v30 }
 0x169   : > { %v2774_v42 = vpop.f32.mrb[56].mxu1  ;;  %v2838_v51 = vpop.f32.mrb[56].mxu0 }
 0x16a   : > { %v2775_v49 = vpop.f32.mrb[57].mxu1  ;;  %v2839_v29 = vpop.f32.mrb[57].mxu0 }
 0x16b   : > { %v2776_v39 = vadd.f32 %v2775_v49, %v2774_v42  ;;  %v2840_v43 = vadd.f32 %v2839_v29, %v2838_v51  ;;  %v2777_v22 = vpop.f32.mrb[58].mxu1  ;;  %v2841_v3 = vpop.f32.mrb[58].mxu0 }
 0x16c   : > { %v2778_v25 = vpop.f32.mrb[59].mxu1  ;;  %v2842_v55 = vpop.f32.mrb[59].mxu0 }
 0x16d   : > { %v4058_v26 = vadd.f32 %v2776_v39, %v4015_v6  ;;  %v4061_v37 = vadd.f32 %v2840_v43, %v3976_v53  ;;  %v2779_v62 = vadd.f32 %v2778_v25, %v2777_v22  ;;  %v2843_v31 = vadd.f32 %v2842_v55, %v2841_v3 }
 0x16f   : > { %v4064_v30 = vadd.f32 %v2779_v62, %v4020_v14  ;;  %v4067_v12 = vadd.f32 %v2843_v31, %v3982_v59 }
 0x171   : > { %v2780_v41 = vpop.f32.mrb[60].mxu1  ;;  %v2844_v56 = vpop.f32.mrb[60].mxu0 }
 0x172   : > { %v2781_v33 = vpop.f32.mrb[61].mxu1  ;;  %v2845_v5 = vpop.f32.mrb[61].mxu0 }
 0x173   : > { %v2782_v27 = vadd.f32 %v2781_v33, %v2780_v41  ;;  %v2846_v7 = vadd.f32 %v2845_v5, %v2844_v56  ;;  %v2783_v60 = vpop.f32.mrb[62].mxu1  ;;  %v2847_v6 = vpop.f32.mrb[62].mxu0 }
 0x174   : > { %v2784_v57 = vpop.f32.mrb[63].mxu1  ;;  %v2848_v35 = vpop.f32.mrb[63].mxu0 }
 0x175   : > { %v4070_v53 = vadd.f32 %v2782_v27, %v4025_v28  ;;  %v4073_v50 = vadd.f32 %v2846_v7, %v3989_v44  ;;  %v2785_v14 = vadd.f32 %v2784_v57, %v2783_v60  ;;  %v2849_v15 = vadd.f32 %v2848_v35, %v2847_v6 }
 0x177   : > { %v4076_v59 = vadd.f32 %v2785_v14, %v4030_v10  ;;  %v4079_v36 = vadd.f32 %v2849_v15, %v3996_v47 }
 0x179   : > { %v2786_v18 = vpop.f32.mrb[64].mxu1  ;;  %v2850_v21 = vpop.f32.mrb[64].mxu0 }
 0x17a   : > { %v2787_v34 = vpop.f32.mrb[65].mxu1  ;;  %v2851_v32 = vpop.f32.mrb[65].mxu0 }
 0x17b   : > { %v2788_v42 = vadd.f32 %v2787_v34, %v2786_v18  ;;  %v2852_v51 = vadd.f32 %v2851_v32, %v2850_v21  ;;  %v2789_v49 = vpop.f32.mrb[66].mxu1  ;;  %v2853_v28 = vpop.f32.mrb[66].mxu0 }
 0x17c   : > { %v2790_v29 = vpop.f32.mrb[67].mxu1  ;;  %v2854_v39 = vpop.f32.mrb[67].mxu0 }
 0x17d   : > { %v4082_v44 = vadd.f32 %v2788_v42, %v3903_v38  ;;  %v4085_v43 = vadd.f32 %v2852_v51, %v4002_v52  ;;  %v2791_v10 = vadd.f32 %v2790_v29, %v2789_v49  ;;  %v2855_v22 = vadd.f32 %v2854_v39, %v2853_v28 }
 0x17f   : > { %v4088_v47 = vadd.f32 %v2791_v10, %v3907_v61  ;;  %v4091_v3 = vadd.f32 %v2855_v22, %v4005_v63 }
 0x181   : > { %v2792_v25 = vpop.f32.mrb[68].mxu1  ;;  %v2856_v55 = vpop.f32.mrb[68].mxu0 }
 0x182   : > { %v2793_v62 = vpop.f32.mrb[69].mxu1  ;;  %v2857_v31 = vpop.f32.mrb[69].mxu0 }
 0x183   : > { %v2794_v41 = vadd.f32 %v2793_v62, %v2792_v25  ;;  %v2858_v56 = vadd.f32 %v2857_v31, %v2856_v55  ;;  %v2795_v33 = vpop.f32.mrb[70].mxu1  ;;  %v2859_v38 = vpop.f32.mrb[70].mxu0 }
 0x184   : > { %v2796_v5 = vpop.f32.mrb[71].mxu1  ;;  %v2860_v27 = vpop.f32.mrb[71].mxu0 }
 0x185   : > { %v4094_v52 = vadd.f32 %v2794_v41, %v3914_v2  ;;  %v4097_v7 = vadd.f32 %v2858_v56, %v4010_v17  ;;  %v2797_v61 = vadd.f32 %v2796_v5, %v2795_v33  ;;  %v2861_v60 = vadd.f32 %v2860_v27, %v2859_v38 }
 0x187   : > { %v4100_v63 = vadd.f32 %v2797_v61, %v3918_v40  ;;  %v4103_v6 = vadd.f32 %v2861_v60, %v4013_v19 }
 0x189   : > { %v2798_v57 = vpop.f32.mrb[72].mxu1  ;;  %v2862_v35 = vpop.f32.mrb[72].mxu0 }
 0x18a   : > { %v2799_v14 = vpop.f32.mrb[73].mxu1  ;;  %v2863_v15 = vpop.f32.mrb[73].mxu0 }
 0x18b   : > { %v2800_v18 = vadd.f32 %v2799_v14, %v2798_v57  ;;  %v2864_v21 = vadd.f32 %v2863_v15, %v2862_v35  ;;  %v2801_v34 = vpop.f32.mrb[74].mxu1  ;;  %v2865_v2 = vpop.f32.mrb[74].mxu0 }
 0x18c   : > { %v2802_v32 = vpop.f32.mrb[75].mxu1  ;;  %v2866_v42 = vpop.f32.mrb[75].mxu0 }
 0x18d   : > { %v4106_v17 = vadd.f32 %v2800_v18, %v3925_v48  ;;  %v4109_v51 = vadd.f32 %v2864_v21, %v4018_v45  ;;  %v2803_v40 = vadd.f32 %v2802_v32, %v2801_v34  ;;  %v2867_v49 = vadd.f32 %v2866_v42, %v2865_v2 }
 0x18f   : > { %v4112_v19 = vadd.f32 %v2803_v40, %v3929_v46  ;;  %v4115_v28 = vadd.f32 %v2867_v49, %v4023_v24 }
 0x191   : > { %v2804_v29 = vpop.f32.mrb[76].mxu1  ;;  %v2868_v39 = vpop.f32.mrb[76].mxu0 }
 0x192   : > { %v2805_v10 = vpop.f32.mrb[77].mxu1  ;;  %v2869_v22 = vpop.f32.mrb[77].mxu0 }
 0x193   : > { %v2806_v25 = vadd.f32 %v2805_v10, %v2804_v29  ;;  %v2870_v55 = vadd.f32 %v2869_v22, %v2868_v39  ;;  %v2807_v62 = vpop.f32.mrb[78].mxu1  ;;  %v2871_v48 = vpop.f32.mrb[78].mxu0 }
 0x194   : > { %v2808_v31 = vpop.f32.mrb[79].mxu1  ;;  %v2872_v41 = vpop.f32.mrb[79].mxu0 }
 0x195   : > { %v4118_v45 = vadd.f32 %v2806_v25, %v3937_v13  ;;  %v4121_v56 = vadd.f32 %v2870_v55, %v4028_v8  ;;  %v2809_v46 = vadd.f32 %v2808_v31, %v2807_v62  ;;  %v2873_v33 = vadd.f32 %v2872_v41, %v2871_v48 }
 0x197   : > { %v4124_v24 = vadd.f32 %v2809_v46, %v3941_v0  ;;  %v4127_v38 = vadd.f32 %v2873_v33, %v4033_v11 }
 0x199   : > { %v2874_v5 = vpop.f32.mrb[80].mxu0  ;;  %v2938_v27 = vpop.f32.mrb[80].mxu1 }
 0x19a   : > { %v2875_v61 = vpop.f32.mrb[81].mxu0  ;;  %v2939_v60 = vpop.f32.mrb[81].mxu1 }
 0x19b   : > { %v2876_v57 = vadd.f32 %v2875_v61, %v2874_v5  ;;  %v2940_v35 = vadd.f32 %v2939_v60, %v2938_v27  ;;  %v2877_v14 = vpop.f32.mrb[82].mxu0  ;;  %v2941_v13 = vpop.f32.mrb[82].mxu1 }
 0x19c   : > { %v2878_v15 = vpop.f32.mrb[83].mxu0  ;;  %v2942_v18 = vpop.f32.mrb[83].mxu1 }
 0x19d   : > { %v4130_v8 = vadd.f32 %v2876_v57, %v4036_v23  ;;  %v2879_v21 = vadd.f32 %v2878_v15, %v2877_v14  ;;  %v2943_v34 = vadd.f32 %v2942_v18, %v2941_v13  ;;  %v4133_v0 = vadd.f32 %v2940_v35, %v4039_v58 }
 0x19f   : > { %v4136_v11 = vadd.f32 %v2879_v21, %v4041_v1  ;;  %v4139_v2 = vadd.f32 %v2943_v34, %v4044_v20 }
 0x1a1   : > { %v2880_v32 = vpop.f32.mrb[84].mxu0  ;;  %v2944_v42 = vpop.f32.mrb[84].mxu1 }
 0x1a2   : > { %v2881_v40 = vpop.f32.mrb[85].mxu0  ;;  %v2945_v49 = vpop.f32.mrb[85].mxu1 }
 0x1a3   : > { %v2882_v29 = vadd.f32 %v2881_v40, %v2880_v32  ;;  %v2946_v39 = vadd.f32 %v2945_v49, %v2944_v42  ;;  %v2883_v10 = vpop.f32.mrb[86].mxu0  ;;  %v2947_v23 = vpop.f32.mrb[86].mxu1 }
 0x1a4   : > { %v2884_v22 = vpop.f32.mrb[87].mxu0  ;;  %v2948_v25 = vpop.f32.mrb[87].mxu1 }
 0x1a5   : > { %v4142_v55 = vadd.f32 %v2882_v29, %v4047_v9  ;;  %v2885_v58 = vadd.f32 %v2884_v22, %v2883_v10  ;;  %v2949_v62 = vadd.f32 %v2948_v25, %v2947_v23  ;;  %v4145_v1 = vadd.f32 %v2946_v39, %v4050_v16 }
 0x1a7   : > { %v4148_v20 = vadd.f32 %v2885_v58, %v4052_v4  ;;  %v4151_v48 = vadd.f32 %v2949_v62, %v4055_v54 }
 0x1a9   : > { %v2886_v31 = vpop.f32.mrb[88].mxu0  ;;  %v2950_v41 = vpop.f32.mrb[88].mxu1 }
 0x1aa   : > { %v2887_v46 = vpop.f32.mrb[89].mxu0  ;;  %v2951_v33 = vpop.f32.mrb[89].mxu1 }
 0x1ab   : > { %v2888_v5 = vadd.f32 %v2887_v46, %v2886_v31  ;;  %v2952_v27 = vadd.f32 %v2951_v33, %v2950_v41  ;;  %v2889_v61 = vpop.f32.mrb[90].mxu0  ;;  %v2953_v9 = vpop.f32.mrb[90].mxu1 }
 0x1ac   : > { %v2890_v60 = vpop.f32.mrb[91].mxu0  ;;  %v2954_v57 = vpop.f32.mrb[91].mxu1 }
 0x1ad   : > { %v4154_v35 = vadd.f32 %v2888_v5, %v4058_v26  ;;  %v2891_v16 = vadd.f32 %v2890_v60, %v2889_v61  ;;  %v2955_v14 = vadd.f32 %v2954_v57, %v2953_v9  ;;  %v4157_v4 = vadd.f32 %v2952_v27, %v4061_v37 }
 0x1af   : > { %v4160_v54 = vadd.f32 %v2891_v16, %v4064_v30  ;;  %v4163_v13 = vadd.f32 %v2955_v14, %v4067_v12 }
 0x1b1   : > { %v2892_v15 = vpop.f32.mrb[92].mxu0  ;;  %v2956_v18 = vpop.f32.mrb[92].mxu1 }
 0x1b2   : > { %v2893_v21 = vpop.f32.mrb[93].mxu0  ;;  %v2957_v34 = vpop.f32.mrb[93].mxu1 }
 0x1b3   : > { %v2894_v32 = vadd.f32 %v2893_v21, %v2892_v15  ;;  %v2958_v42 = vadd.f32 %v2957_v34, %v2956_v18  ;;  %v2895_v40 = vpop.f32.mrb[94].mxu0  ;;  %v2959_v26 = vpop.f32.mrb[94].mxu1 }
 0x1b4   : > { %v2896_v49 = vpop.f32.mrb[95].mxu0  ;;  %v2960_v29 = vpop.f32.mrb[95].mxu1 }
 0x1b5   : > { %v4166_v39 = vadd.f32 %v2894_v32, %v4070_v53  ;;  %v2897_v37 = vadd.f32 %v2896_v49, %v2895_v40  ;;  %v2961_v10 = vadd.f32 %v2960_v29, %v2959_v26  ;;  %v4169_v30 = vadd.f32 %v2958_v42, %v4073_v50 }
 0x1b7   : > { %v4172_v12 = vadd.f32 %v2897_v37, %v4076_v59  ;;  %v4175_v23 = vadd.f32 %v2961_v10, %v4079_v36 }
 0x1b9   : > { %v2898_v22 = vpop.f32.mrb[96].mxu0  ;;  %v2962_v25 = vpop.f32.mrb[96].mxu1 }
 0x1ba   : > { %v2899_v58 = vpop.f32.mrb[97].mxu0  ;;  %v2963_v62 = vpop.f32.mrb[97].mxu1 }
 0x1bb   : > { %v2900_v31 = vadd.f32 %v2899_v58, %v2898_v22  ;;  %v2964_v41 = vadd.f32 %v2963_v62, %v2962_v25  ;;  %v2901_v46 = vpop.f32.mrb[98].mxu0  ;;  %v2965_v53 = vpop.f32.mrb[98].mxu1 }
 0x1bc   : > { %v2902_v33 = vpop.f32.mrb[99].mxu0  ;;  %v2966_v5 = vpop.f32.mrb[99].mxu1 }
 0x1bd   : > { %v4178_v27 = vadd.f32 %v2900_v31, %v4082_v44  ;;  %v2903_v50 = vadd.f32 %v2902_v33, %v2901_v46  ;;  %v2967_v61 = vadd.f32 %v2966_v5, %v2965_v53  ;;  %v4181_v59 = vadd.f32 %v2964_v41, %v4085_v43 }
 0x1bf   : > { %v4184_v36 = vadd.f32 %v2903_v50, %v4088_v47  ;;  %v4187_v9 = vadd.f32 %v2967_v61, %v4091_v3 }
 0x1c1   : > { %v2904_v60 = vpop.f32.mrb[100].mxu0  ;;  %v2968_v57 = vpop.f32.mrb[100].mxu1 }
 0x1c2   : > { %v2905_v16 = vpop.f32.mrb[101].mxu0  ;;  %v2969_v14 = vpop.f32.mrb[101].mxu1 }
 0x1c3   : > { %v2906_v15 = vadd.f32 %v2905_v16, %v2904_v60  ;;  %v2970_v18 = vadd.f32 %v2969_v14, %v2968_v57  ;;  %v2907_v21 = vpop.f32.mrb[102].mxu0  ;;  %v2971_v44 = vpop.f32.mrb[102].mxu1 }
 0x1c4   : > { %v2908_v34 = vpop.f32.mrb[103].mxu0  ;;  %v2972_v32 = vpop.f32.mrb[103].mxu1 }
 0x1c5   : > { %v4190_v42 = vadd.f32 %v2906_v15, %v4094_v52  ;;  %v2909_v43 = vadd.f32 %v2908_v34, %v2907_v21  ;;  %v2973_v40 = vadd.f32 %v2972_v32, %v2971_v44  ;;  %v4193_v47 = vadd.f32 %v2970_v18, %v4097_v7 }
 0x1c7   : > { %v4196_v3 = vadd.f32 %v2909_v43, %v4100_v63  ;;  %v4199_v26 = vadd.f32 %v2973_v40, %v4103_v6 }
 0x1c9   : > { %v2910_v49 = vpop.f32.mrb[104].mxu0  ;;  %v2974_v29 = vpop.f32.mrb[104].mxu1 }
 0x1ca   : > { %v2911_v37 = vpop.f32.mrb[105].mxu0  ;;  %v2975_v10 = vpop.f32.mrb[105].mxu1 }
 0x1cb   : > { %v2912_v22 = vadd.f32 %v2911_v37, %v2910_v49  ;;  %v2976_v25 = vadd.f32 %v2975_v10, %v2974_v29  ;;  %v2913_v58 = vpop.f32.mrb[106].mxu0  ;;  %v2977_v52 = vpop.f32.mrb[106].mxu1 }
 0x1cc   : > { %v2914_v62 = vpop.f32.mrb[107].mxu0  ;;  %v2978_v31 = vpop.f32.mrb[107].mxu1 }
 0x1cd   : > { %v4202_v41 = vadd.f32 %v2912_v22, %v4106_v17  ;;  %v2915_v7 = vadd.f32 %v2914_v62, %v2913_v58  ;;  %v2979_v46 = vadd.f32 %v2978_v31, %v2977_v52  ;;  %v4205_v63 = vadd.f32 %v2976_v25, %v4109_v51 }
 0x1cf   : > { %v4208_v6 = vadd.f32 %v2915_v7, %v4112_v19  ;;  %v4211_v53 = vadd.f32 %v2979_v46, %v4115_v28 }
 0x1d1   : > { %v2916_v33 = vpop.f32.mrb[108].mxu0  ;;  %v2980_v5 = vpop.f32.mrb[108].mxu1 }
 0x1d2   : > { %v2917_v50 = vpop.f32.mrb[109].mxu0  ;;  %v2981_v61 = vpop.f32.mrb[109].mxu1 }
 0x1d3   : > { %v2918_v60 = vadd.f32 %v2917_v50, %v2916_v33  ;;  %v2982_v57 = vadd.f32 %v2981_v61, %v2980_v5  ;;  %v2919_v17 = vpop.f32.mrb[110].mxu0  ;;  %v2983_v16 = vpop.f32.mrb[110].mxu1 }
 0x1d4   : > { %v2920_v14 = vpop.f32.mrb[111].mxu0  ;;  %v2984_v15 = vpop.f32.mrb[111].mxu1 }
 0x1d5   : > { %v4214_v51 = vadd.f32 %v2918_v60, %v4118_v45  ;;  %v2921_v18 = vadd.f32 %v2920_v14, %v2919_v17  ;;  %v2985_v19 = vadd.f32 %v2984_v15, %v2983_v16  ;;  %v4217_v21 = vadd.f32 %v2982_v57, %v4121_v56 }
 0x1d7   : > { %v4220_v28 = vadd.f32 %v2921_v18, %v4124_v24  ;;  %v4223_v44 = vadd.f32 %v2985_v19, %v4127_v38 }
 0x1d9   : > { %v2986_v34 = vpop.f32.mrb[112].mxu1  ;;  %v3076_v45 = vpop.f32.mrb[112].mxu0 }
 0x1da   : > { %v2151_v56 = vadd.f32 %v3076_v45, %v4145_v1  ;;  %v2987_v32 = vpop.f32.mrb[113].mxu1  ;;  %v2142_v24 = vpop.f32.mrb[113].mxu0 }
 0x1db   : > { %v2988_v43 = vadd.f32 %v2987_v32, %v2986_v34  ;;  %v2143_v38 = vadd.f32 %v2142_v24, %v4133_v0  ;;  %v2989_v40 = vpop.f32.mrb[114].mxu1  ;;  %v3077_v49 = vpop.f32.mrb[114].mxu0 }
 0x1dc   : > { %2271 = vst [vmem:[%s4230_s24 + $0x10] sm:$0xff] %v2151_v56  ;;  %v2154_v29 = vadd.f32 %v3077_v49, %v4151_v48  ;;  %v2990_v37 = vpop.f32.mrb[115].mxu1  ;;  %v2145_v10 = vpop.f32.mrb[115].mxu0  ;;  %v2340_v31 = vmul.f32 %v2151_v56, %v2151_v56 }
 0x1dd   : > { %2269 = vst [vmem:[%s4230_s24] sm:$0xff] %v2143_v38  ;;  %v2991_v22 = vadd.f32 %v2990_v37, %v2989_v40  ;;  %v2146_v25 = vadd.f32 %v2145_v10, %v4139_v2  ;;  %v4239_v58 = vadd.f32 %v2988_v43, %v4130_v8  ;;  %v2338_v1 = vmul.f32 %v2143_v38, %v2143_v38 }
 0x1de   : > { %2272 = vst [vmem:[%s4230_s24 + $0x18] sm:$0xff] %v2154_v29  ;;  %v2341_v5 = vmul.f32 %v2154_v29, %v2154_v29 }
 0x1df   : > { %2270 = vst [vmem:[%s4230_s24 + $0x8] sm:$0xff] %v2146_v25  ;;  %v2301_v52 = vadd.f32 %v2146_v25, %v2143_v38  ;;  %v2339_v62 = vmul.f32 %v2146_v25, %v2146_v25  ;;  %v4244_v0 = vadd.f32 %v2991_v22, %v4136_v11 }
 0x1e1   : > { %v2302_v48 = vadd.f32 %v2301_v52, %v2151_v56  ;;  %v2370_v7 = vadd.f32 %v2339_v62, %v2338_v1  ;;  %v2992_v46 = vpop.f32.mrb[116].mxu1  ;;  %v3080_v33 = vpop.f32.mrb[116].mxu0 }
 0x1e2   : > { %v2167_v2 = vadd.f32 %v3080_v33, %v4169_v30  ;;  %v2993_v8 = vpop.f32.mrb[117].mxu1  ;;  %v2158_v50 = vpop.f32.mrb[117].mxu0 }
 0x1e3   : > { %v2371_v61 = vadd.f32 %v2370_v7, %v2340_v31  ;;  %v2994_v60 = vadd.f32 %v2993_v8, %v2992_v46  ;;  %v2159_v57 = vadd.f32 %v2158_v50, %v4157_v4  ;;  %v2303_v17 = vadd.f32 %v2302_v48, %v2154_v29  ;;  %v2995_v11 = vpop.f32.mrb[118].mxu1  ;;  %v3081_v16 = vpop.f32.mrb[118].mxu0 }
 0x1e4   : > { %2275 = vst [vmem:[%s4230_s24 + $0x30] sm:$0xff] %v2167_v2  ;;  %v2170_v14 = vadd.f32 %v3081_v16, %v4175_v23  ;;  %v2996_v15 = vpop.f32.mrb[119].mxu1  ;;  %v2161_v18 = vpop.f32.mrb[119].mxu0  ;;  %v2344_v49 = vmul.f32 %v2167_v2, %v2167_v2 }
 0x1e5   : > { %2273 = vst [vmem:[%s4230_s24 + $0x20] sm:$0xff] %v2159_v57  ;;  %v2304_v19 = vadd.f32 %v2303_v17, %v2159_v57  ;;  %v2342_v34 = vmul.f32 %v2159_v57, %v2159_v57  ;;  %v2372_v30 = vadd.f32 %v2371_v61, %v2341_v5  ;;  %v2997_v45 = vadd.f32 %v2996_v15, %v2995_v11 }
 0x1e6   : > { %2276 = vst [vmem:[%s4230_s24 + $0x38] sm:$0xff] %v2170_v14  ;;  %v2162_v56 = vadd.f32 %v2161_v18, %v4163_v13  ;;  %v4254_v32 = vadd.f32 %v2994_v60, %v4142_v55  ;;  %v2345_v52 = vmul.f32 %v2170_v14, %v2170_v14 }
 0x1e7   : > { %v2373_v4 = vadd.f32 %v2372_v30, %v2342_v34  ;;  %v4257_v24 = vadd.f32 %v2997_v45, %v4148_v20 }
 0x1e8   : > { %2274 = vst [vmem:[%s4230_s24 + $0x28] sm:$0xff] %v2162_v56  ;;  %v2305_v43 = vadd.f32 %v2304_v19, %v2162_v56  ;;  %v2343_v23 = vmul.f32 %v2162_v56, %v2162_v56 }
 0x1e9   : > { %v2998_v38 = vpop.f32.mrb[120].mxu1  ;;  %v3084_v40 = vpop.f32.mrb[120].mxu0 }
 0x1ea   : > { %v2306_v29 = vadd.f32 %v2305_v43, %v2167_v2  ;;  %v2374_v37 = vadd.f32 %v2373_v4, %v2343_v23  ;;  %v2183_v10 = vadd.f32 %v3084_v40, %v4193_v47  ;;  %v2999_v13 = vpop.f32.mrb[121].mxu1  ;;  %v2174_v22 = vpop.f32.mrb[121].mxu0 }
 0x1eb   : > { %v3000_v55 = vadd.f32 %v2999_v13, %v2998_v38  ;;  %v2175_v25 = vadd.f32 %v2174_v22, %v4181_v59  ;;  %v3001_v1 = vpop.f32.mrb[122].mxu1  ;;  %v3085_v20 = vpop.f32.mrb[122].mxu0 }
 0x1ec   : > { %v2375_v62 = vadd.f32 %v2374_v37, %v2344_v49  ;;  %2279 = vst [vmem:[%s4230_s24 + $0x50] sm:$0xff] %v2183_v10  ;;  %v2307_v31 = vadd.f32 %v2306_v29, %v2170_v14  ;;  %v2186_v48 = vadd.f32 %v3085_v20, %v4199_v26  ;;  %v3002_v7 = vpop.f32.mrb[123].mxu1  ;;  %v2177_v46 = vpop.f32.mrb[123].mxu0  ;;  %v2348_v11 = vmul.f32 %v2183_v10, %v2183_v10 }
 0x1ed   : > { %2277 = vst [vmem:[%s4230_s24 + $0x40] sm:$0xff] %v2175_v25  ;;  %v2346_v33 = vmul.f32 %v2175_v25, %v2175_v25  ;;  %v3003_v47 = vadd.f32 %v3002_v7, %v3001_v1  ;;  %v2178_v5 = vadd.f32 %v2177_v46, %v4187_v9  ;;  %v4267_v2 = vadd.f32 %v3000_v55, %v4154_v35 }
 0x1ee   : > { %v2308_v59 = vadd.f32 %v2307_v31, %v2175_v25  ;;  %v2376_v8 = vadd.f32 %v2375_v62, %v2345_v52  ;;  %2280 = vst [vmem:[%s4230_s24 + $0x58] sm:$0xff] %v2186_v48  ;;  %v2349_v30 = vmul.f32 %v2186_v48, %v2186_v48 }
 0x1ef   : > { %2278 = vst [vmem:[%s4230_s24 + $0x48] sm:$0xff] %v2178_v5  ;;  %v2347_v50 = vmul.f32 %v2178_v5, %v2178_v5  ;;  %v4272_v61 = vadd.f32 %v3003_v47, %v4160_v54 }
 0x1f0   : > { %v2377_v60 = vadd.f32 %v2376_v8, %v2346_v33  ;;  %v2309_v26 = vadd.f32 %v2308_v59, %v2178_v5 }
 0x1f1   : > { %v3004_v57 = vpop.f32.mrb[124].mxu1  ;;  %v3088_v17 = vpop.f32.mrb[124].mxu0 }
 0x1f2   : > { %v2310_v16 = vadd.f32 %v2309_v26, %v2183_v10  ;;  %v2378_v9 = vadd.f32 %v2377_v60, %v2347_v50  ;;  %v2199_v35 = vadd.f32 %v3088_v17, %v4217_v21  ;;  %v3005_v14 = vpop.f32.mrb[125].mxu1  ;;  %v2190_v15 = vpop.f32.mrb[125].mxu0 }
 0x1f3   : > { %v3006_v18 = vadd.f32 %v3005_v14, %v3004_v57  ;;  %v2191_v19 = vadd.f32 %v2190_v15, %v4205_v63  ;;  %v3007_v34 = vpop.f32.mrb[126].mxu1  ;;  %v3089_v54 = vpop.f32.mrb[126].mxu0 }
 0x1f4   : > { %v2379_v45 = vadd.f32 %v2378_v9, %v2348_v11  ;;  %2283 = vst [vmem:[%s4230_s24 + $0x70] sm:$0xff] %v2199_v35  ;;  %v2311_v56 = vadd.f32 %v2310_v16, %v2186_v48  ;;  %v2202_v4 = vadd.f32 %v3089_v54, %v4223_v44  ;;  %v3008_v43 = vpop.f32.mrb[127].mxu1  ;;  %v2193_v23 = vpop.f32.mrb[127].mxu0  ;;  %v2352_v25 = vmul.f32 %v2199_v35, %v2199_v35 }
 0x1f5   : > { %2281 = vst [vmem:[%s4230_s24 + $0x60] sm:$0xff] %v2191_v19  ;;  %v2350_v38 = vmul.f32 %v2191_v19, %v2191_v19  ;;  %v3009_v21 = vadd.f32 %v3008_v43, %v3007_v34  ;;  %v2194_v40 = vadd.f32 %v2193_v23, %v4211_v53  ;;  %v2070_v49 = vadd.f32 %v3006_v18, %v4166_v39 }
 0x1f6   : > { %v2312_v63 = vadd.f32 %v2311_v56, %v2191_v19  ;;  %v2380_v29 = vadd.f32 %v2379_v45, %v2349_v30  ;;  %2284 = vst [vmem:[%s4230_s24 + $0x78] sm:$0xff] %v2202_v4 }
 0x1f7   : > { %2282 = vst [vmem:[%s4230_s24 + $0x68] sm:$0xff] %v2194_v40  ;;  %v2351_v37 = vmul.f32 %v2194_v40, %v2194_v40  ;;  %v2073_v10 = vadd.f32 %v3009_v21, %v4172_v12  ;;  %v2353_v12 = vmul.f32 %v2202_v4, %v2202_v4 }
 0x1f8   : > { %v2381_v13 = vadd.f32 %v2380_v29, %v2350_v38  ;;  %v2313_v22 = vadd.f32 %v2312_v63, %v2194_v40 }
 0x1f9   : > { %v3010_v44 = vpop.f32.mrb[128].mxu1  ;;  %v3092_v55 = vpop.f32.mrb[128].mxu0 }
 0x1fa   : > { %v2314_v1 = vadd.f32 %v2313_v22, %v2199_v35  ;;  %v2382_v20 = vadd.f32 %v2381_v13, %v2351_v37  ;;  %v2215_v53 = vadd.f32 %v3092_v55, %v4254_v32  ;;  %v3011_v52 = vpop.f32.mrb[129].mxu1  ;;  %v2206_v39 = vpop.f32.mrb[129].mxu0 }
 0x1fb   : > { %v3012_v62 = vadd.f32 %v3011_v52, %v3010_v44  ;;  %v2207_v31 = vadd.f32 %v2206_v39, %v4239_v58  ;;  %v3013_v48 = vpop.f32.mrb[130].mxu1  ;;  %v3093_v7 = vpop.f32.mrb[130].mxu0 }
 0x1fc   : > { %v2383_v46 = vadd.f32 %v2382_v20, %v2352_v25  ;;  %2287 = vst [vmem:[%s4230_s24 + $0x90] sm:$0xff] %v2215_v53  ;;  %v2315_v33 = vadd.f32 %v2314_v1, %v2202_v4  ;;  %v2218_v47 = vadd.f32 %v3093_v7, %v4257_v24  ;;  %v3014_v5 = vpop.f32.mrb[131].mxu1  ;;  %v2209_v59 = vpop.f32.mrb[131].mxu0  ;;  %v2356_v35 = vmul.f32 %v2215_v53, %v2215_v53 }
 0x1fd   : > { %2285 = vst [vmem:[%s4230_s24 + $0x80] sm:$0xff] %v2207_v31  ;;  %v2354_v8 = vmul.f32 %v2207_v31, %v2207_v31  ;;  %v3015_v32 = vadd.f32 %v3014_v5, %v3013_v48  ;;  %v2210_v50 = vadd.f32 %v2209_v59, %v4244_v0  ;;  %v2078_v60 = vadd.f32 %v3012_v62, %v4178_v27 }
 0x1fe   : > { %v2316_v58 = vadd.f32 %v2315_v33, %v2207_v31  ;;  %v2384_v26 = vadd.f32 %v2383_v46, %v2353_v12  ;;  %2288 = vst [vmem:[%s4230_s24 + $0x98] sm:$0xff] %v2218_v47 }
 0x1ff   : > { %2286 = vst [vmem:[%s4230_s24 + $0x88] sm:$0xff] %v2210_v50  ;;  %v2355_v57 = vmul.f32 %v2210_v50, %v2210_v50  ;;  %v2081_v17 = vadd.f32 %v3015_v32, %v4184_v36  ;;  %v2357_v36 = vmul.f32 %v2218_v47, %v2218_v47 }
 0x200   : > { %v2385_v11 = vadd.f32 %v2384_v26, %v2354_v8  ;;  %v2317_v16 = vadd.f32 %v2316_v58, %v2210_v50 }
 0x201   : > { %v3016_v24 = vpop.f32.mrb[132].mxu1  ;;  %v3096_v9 = vpop.f32.mrb[132].mxu0 }
 0x202   : > { %v2318_v14 = vadd.f32 %v2317_v16, %v2215_v53  ;;  %v2386_v15 = vadd.f32 %v2385_v11, %v2355_v57  ;;  %v2231_v18 = vadd.f32 %v3096_v9, %v2070_v49  ;;  %v3017_v0 = vpop.f32.mrb[133].mxu1  ;;  %v2222_v19 = vpop.f32.mrb[133].mxu0 }
 0x203   : > { %v3018_v27 = vadd.f32 %v3017_v0, %v3016_v24  ;;  %v2223_v34 = vadd.f32 %v2222_v19, %v4267_v2  ;;  %v3019_v54 = vpop.f32.mrb[134].mxu1  ;;  %v3097_v30 = vpop.f32.mrb[134].mxu0 }
 0x204   : > { %v2387_v45 = vadd.f32 %v2386_v15, %v2356_v35  ;;  %2291 = vst [vmem:[%s4230_s24 + $0xb0] sm:$0xff] %v2231_v18  ;;  %v2319_v56 = vadd.f32 %v2318_v14, %v2218_v47  ;;  %v2234_v4 = vadd.f32 %v3097_v30, %v2073_v10  ;;  %v3020_v43 = vpop.f32.mrb[135].mxu1  ;;  %v2225_v23 = vpop.f32.mrb[135].mxu0  ;;  %v2360_v55 = vmul.f32 %v2231_v18, %v2231_v18 }
 0x205   : > { %2289 = vst [vmem:[%s4230_s24 + $0xa0] sm:$0xff] %v2223_v34  ;;  %v2358_v38 = vmul.f32 %v2223_v34, %v2223_v34  ;;  %v3021_v21 = vadd.f32 %v3020_v43, %v3019_v54  ;;  %v2226_v40 = vadd.f32 %v2225_v23, %v4272_v61  ;;  %v2086_v49 = vadd.f32 %v3018_v27, %v4190_v42 }
 0x206   : > { %v2320_v63 = vadd.f32 %v2319_v56, %v2223_v34  ;;  %v2388_v2 = vadd.f32 %v2387_v45, %v2357_v36  ;;  %2292 = vst [vmem:[%s4230_s24 + $0xb8] sm:$0xff] %v2234_v4  ;;  %v2361_v31 = vmul.f32 %v2234_v4, %v2234_v4 }
 0x207   : > { %2290 = vst [vmem:[%s4230_s24 + $0xa8] sm:$0xff] %v2226_v40  ;;  %v2359_v29 = vmul.f32 %v2226_v40, %v2226_v40  ;;  %v2089_v37 = vadd.f32 %v3021_v21, %v4196_v3 }
 0x208   : > { %v2389_v13 = vadd.f32 %v2388_v2, %v2358_v38  ;;  %v2321_v22 = vadd.f32 %v2320_v63, %v2226_v40 }
 0x209   : > { %v3022_v10 = vpop.f32.mrb[136].mxu1  ;;  %v3100_v44 = vpop.f32.mrb[136].mxu0 }
 0x20a   : > { %v2322_v25 = vadd.f32 %v2321_v22, %v2231_v18  ;;  %v2390_v1 = vadd.f32 %v2389_v13, %v2359_v29  ;;  %v2247_v20 = vadd.f32 %v3100_v44, %v2086_v49  ;;  %v3023_v61 = vpop.f32.mrb[137].mxu1  ;;  %v2238_v53 = vpop.f32.mrb[137].mxu0 }
 0x20b   : > { %v3024_v42 = vadd.f32 %v3023_v61, %v3022_v10  ;;  %v2239_v52 = vadd.f32 %v2238_v53, %v2078_v60  ;;  %v3025_v39 = vpop.f32.mrb[138].mxu1  ;;  %v3101_v62 = vpop.f32.mrb[138].mxu0 }
 0x20c   : > { %v2391_v3 = vadd.f32 %v2390_v1, %v2360_v55  ;;  %2295 = vst [vmem:[%s4230_s24 + $0xd0] sm:$0xff] %v2247_v20  ;;  %v2323_v48 = vadd.f32 %v2322_v25, %v2234_v4  ;;  %v2250_v7 = vadd.f32 %v3101_v62, %v2089_v37  ;;  %v3026_v12 = vpop.f32.mrb[139].mxu1  ;;  %v2241_v46 = vpop.f32.mrb[139].mxu0  ;;  %v2364_v16 = vmul.f32 %v2247_v20, %v2247_v20 }
 0x20d   : > { %2293 = vst [vmem:[%s4230_s24 + $0xc0] sm:$0xff] %v2239_v52  ;;  %v2362_v33 = vmul.f32 %v2239_v52, %v2239_v52  ;;  %v3027_v47 = vadd.f32 %v3026_v12, %v3025_v39  ;;  %v2242_v5 = vadd.f32 %v2241_v46, %v2081_v17  ;;  %v2094_v59 = vadd.f32 %v3024_v42, %v4202_v41 }
 0x20e   : > { %v2324_v8 = vadd.f32 %v2323_v48, %v2239_v52  ;;  %v2392_v32 = vadd.f32 %v2391_v3, %v2361_v31  ;;  %2296 = vst [vmem:[%s4230_s24 + $0xd8] sm:$0xff] %v2250_v7  ;;  %v2365_v0 = vmul.f32 %v2250_v7, %v2250_v7 }
 0x20f   : > { %2294 = vst [vmem:[%s4230_s24 + $0xc8] sm:$0xff] %v2242_v5  ;;  %v2363_v50 = vmul.f32 %v2242_v5, %v2242_v5  ;;  %v2097_v60 = vadd.f32 %v3027_v47, %v4208_v6 }
 0x210   : > { %v2393_v58 = vadd.f32 %v2392_v32, %v2362_v33  ;;  %v2325_v26 = vadd.f32 %v2324_v8, %v2242_v5 }
 0x211   : > { %v3028_v57 = vpop.f32.mrb[140].mxu1  ;;  %v3104_v11 = vpop.f32.mrb[140].mxu0 }
 0x212   : > { %v2326_v24 = vadd.f32 %v2325_v26, %v2247_v20  ;;  %v2394_v9 = vadd.f32 %v2393_v58, %v2363_v50  ;;  %v3029_v35 = vpop.f32.mrb[141].mxu1  ;;  %v2254_v14 = vpop.f32.mrb[141].mxu0 }
 0x213   : > { %v3030_v17 = vadd.f32 %v3029_v35, %v3028_v57  ;;  %v2255_v15 = vadd.f32 %v2254_v14, %v2094_v59  ;;  %v3031_v41 = vpop.f32.mrb[142].mxu1  ;;  %v3105_v18 = vpop.f32.mrb[142].mxu0 }
 0x214   : > { %v2395_v19 = vadd.f32 %v2394_v9, %v2364_v16  ;;  %v2327_v27 = vadd.f32 %v2326_v24, %v2250_v7  ;;  %v3032_v6 = vpop.f32.mrb[143].mxu1  ;;  %v2257_v34 = vpop.f32.mrb[143].mxu0 }
 0x215   : > { %v2102_v54 = vadd.f32 %v3030_v17, %v4214_v51  ;;  %2297 = vst [vmem:[%s4230_s24 + $0xe0] sm:$0xff] %v2255_v15  ;;  %v2366_v30 = vmul.f32 %v2255_v15, %v2255_v15  ;;  %v3033_v36 = vadd.f32 %v3032_v6, %v3031_v41  ;;  %v2258_v45 = vadd.f32 %v2257_v34, %v2097_v60 }
 0x216   : > { %v2328_v56 = vadd.f32 %v2327_v27, %v2255_v15  ;;  %v2396_v4 = vadd.f32 %v2395_v19, %v2365_v0 }
 0x217   : > { %v2263_v43 = vadd.f32 %v3104_v11, %v2102_v54  ;;  %v2105_v23 = vadd.f32 %v3033_v36, %v4220_v28  ;;  %2298 = vst [vmem:[%s4230_s24 + $0xe8] sm:$0xff] %v2258_v45  ;;  %v2367_v38 = vmul.f32 %v2258_v45, %v2258_v45 }
 0x218   : > { %v2397_v21 = vadd.f32 %v2396_v4, %v2366_v30  ;;  %v2329_v40 = vadd.f32 %v2328_v56, %v2258_v45 }
 0x219   : > { %2299 = vst [vmem:[%s4230_s24 + $0xf0] sm:$0xff] %v2263_v43  ;;  %v2368_v49 = vmul.f32 %v2263_v43, %v2263_v43  ;;  %v2266_v63 = vadd.f32 %v3105_v18, %v2105_v23 }
 0x21a   : > { %v2330_v2 = vadd.f32 %v2329_v40, %v2263_v43  ;;  %v2398_v51 = vadd.f32 %v2397_v21, %v2367_v38 }
 0x21b   : > { %2300 = vst [vmem:[%s4230_s24 + $0xf8] sm:$0xff] %v2266_v63  ;;  %v2369_v29 = vmul.f32 %v2266_v63, %v2266_v63 }
 0x21c   : > { %v2331_v37 = vadd.f32 %v2330_v2, %v2266_v63  ;;  %v2399_v13 = vadd.f32 %v2398_v51, %v2368_v49 }
 0x21e   : > { %v2332_v22 = vrot.slane %v2331_v37, 4  ;;  %v2400_v10 = vadd.f32 %v2399_v13, %v2369_v29 }
 0x220   : > { %v2333_v44 = vadd.f32 %v2332_v22, %v2331_v37  ;;  %v2401_v55 = vrot.slane %v2400_v10, 4 }
 0x222   : > { %v2334_v25 = vrot.slane %v2333_v44, 2  ;;  %v2402_v28 = vadd.f32 %v2401_v55, %v2400_v10 }
 0x224   : > { %v2335_v1 = vadd.f32 %v2334_v25, %v2333_v44  ;;  %v2403_v20 = vrot.slane %v2402_v28, 2 }
 0x226   : > { %v2336_v61 = vrot.slane %v2335_v1, 1  ;;  %v2404_v53 = vadd.f32 %v2403_v20, %v2402_v28 }
 0x228   : > { %v2405_v42 = vrot.slane %v2404_v53, 1  ;;  %v2337_v52 = vadd.f32 %v2336_v61, %v2335_v1 }
 0x22a   : > { %v2406_v39 = vadd.f32 %v2405_v42, %v2404_v53 }
 0x22c   : > { %v2408_v62 = vsel %vm2407_vm0, %v2337_v52, %v2406_v39 }
 0x22d   : > { %v2410_v31 = vsel %vm2409_vm1, %v2408_v62, 0.0 }
 0x22e   : > { %2411 = vst [vmem:[%s235_s27] sm:$0xff] %v2410_v31 }
 0x22f PF: > { %s16_s18 = sadd.s32 1, %s3210_s18  }
 0x230   : > { %p13_p4 = scmp.ge.s32.totalorder %s16_s18, 4  }
 0x232   :  { %15 = sbr.rel (!%p13_p4) target bundleno = 1 (0x1), region = 81 }

</bundles_post_ra>
